<compile_context>
chip_gen: v6e
topology: v6e:2x2x1
jax: 0.10.0
libtpu: 0.0.40
codegen_flags: <defaults>
</compile_context>

<pallas_src>
import math
import functools

import jax
import jax.numpy as jnp
from jax.experimental import pallas as pl
from jax.experimental.pallas import tpu as pltpu


MM_DTYPE = jnp.float32     # set to jnp.bfloat16 on v6e/v7x for native-MXU matmuls
APPROX_RECIP = True        # softmax denom via EUP reciprocal; False = exact division
NB_PER_STEP = 1            # batch elems per grid step (raise to 2-8 on v5e/v6e)


# ------------------------------ fused kernel -------------------------------

def _decoder_kernel(
    tok_sref,                                            # SMEM (N, T) int32
    emb_ref, pe_ref, enc_ref, trg_ref, src_ref,
    sa_wqkv_ref, sa_bqkv_ref, sa_wo_ref, sa_bo_ref, ln0_g_ref, ln0_b_ref,
    ca_wq_ref, ca_bq_ref, ca_wkv_ref, ca_bkv_ref, ca_wo_ref, ca_bo_ref,
    ln1_g_ref, ln1_b_ref, ln2_g_ref, ln2_b_ref,
    w1_ref, b1_ref, w2_ref, b2_ref,
    wout_ref, bout_ref,
    out_ref,
    *, heads, num_layers, nb, eps, mm_dtype, approx_recip):
  """Full decoder forward for `nb` batch elements (one grid point)."""
  V, E = emb_ref.shape
  T = trg_ref.shape[0]
  Dh = E // heads

  def mm(a, b, dtype):
    return jnp.dot(a.astype(dtype), b.astype(dtype),
                   preferred_element_type=jnp.float32)

  def layernorm(x, g, b):
    mu = jnp.mean(x, axis=-1, keepdims=True)
    var = jnp.mean((x - mu) ** 2, axis=-1, keepdims=True)
    return (x - mu) * jax.lax.rsqrt(var + eps) * g + b

  def split_heads(x2d):
    # (L, E) -> (H, L, Dh): static lane slices stacked along a new batch axis.
    return jnp.stack([x2d[:, h * Dh:(h + 1) * Dh] for h in range(heads)], axis=0)

  def softmax_last(s):
    s = s - jnp.max(s, axis=-1, keepdims=True)
    p = jnp.exp(s)
    denom = jnp.sum(p, axis=-1, keepdims=True)
    if approx_recip:
      return p * pl.reciprocal(denom, approx=True)
    return p / denom

  def attend(q, k, v, bias, wo3, bo):
    # q: (Lq, E) with 1/sqrt(Dh) pre-folded; k/v: (Lk, E)
    # bias: additive mask, broadcastable to (Lq, Lk); wo3: (H, Dh, E)
    q3 = split_heads(q)                                   # (H, Lq, Dh)
    k3 = split_heads(k)                                   # (H, Lk, Dh)
    v3 = split_heads(v)                                   # (H, Lk, Dh)
    s = jnp.einsum('hqd,hkd->hqk', q3.astype(mm_dtype), k3.astype(mm_dtype),
                   preferred_element_type=jnp.float32)    # (H, Lq, Lk)
    p = softmax_last(s + bias)
    ctx = jnp.einsum('hqk,hkd->hqd', p.astype(mm_dtype), v3.astype(mm_dtype),
                     preferred_element_type=jnp.float32)  # (H, Lq, Dh)
    outs = jnp.einsum('hqd,hde->hqe', ctx.astype(mm_dtype), wo3.astype(mm_dtype),
                      preferred_element_type=jnp.float32)  # (H, Lq, E)
    return jnp.sum(outs, axis=0) + bo                     # heads summed, no concat

  trg_bias = trg_ref[...]                                 # (T, T) additive bias
  b0 = pl.program_id(0) * nb

  # TODO(synk): dropout layers are eval-mode identity (no RNG dropout here).
  for i in range(nb):
    # -- embedding (one-hot MXU gather, f32) + positional encoding ----------
    tok_col = jnp.concatenate(
        [jnp.full((1, 1), tok_sref[b0 + i, t], dtype=jnp.int32) for t in range(T)],
        axis=0)                                           # (T, 1)
    onehot = (jax.lax.broadcasted_iota(jnp.int32, (T, V), 1) == tok_col)
    x = mm(onehot, emb_ref[...], jnp.float32) + pe_ref[i]  # (T, E)
    # NOTE: pe_ref[i] is pos_encoding[batch_index] -> reproduces the PyTorch
    # quirk of indexing the PE buffer by the BATCH dim, broadcast over T.

    enc = enc_ref[i]                                      # (S, E)
    src_bias = src_ref[i]                                 # (1, S)

    for l in range(num_layers):
      # ---- masked self-attention (fused QKV projection) ----
      qkv = mm(x, sa_wqkv_ref[l], mm_dtype) + sa_bqkv_ref[l]   # (T, 3E)
      attn = attend(qkv[:, 0:E], qkv[:, E:2 * E], qkv[:, 2 * E:3 * E],
                    trg_bias, sa_wo_ref[l], sa_bo_ref[l])
      x = layernorm(attn + x, ln0_g_ref[l], ln0_b_ref[l])      # DecoderBlock.norm

      # ---- cross-attention on encoder output (fused KV projection) ----
      q = mm(x, ca_wq_ref[l], mm_dtype) + ca_bq_ref[l]         # (T, E)
      kv = mm(enc, ca_wkv_ref[l], mm_dtype) + ca_bkv_ref[l]    # (S, 2E)
      attn = attend(q, kv[:, 0:E], kv[:, E:2 * E],
                    src_bias, ca_wo_ref[l], ca_bo_ref[l])
      x = layernorm(attn + x, ln1_g_ref[l], ln1_b_ref[l])

      # ---- feed-forward ----
      ff = jnp.maximum(mm(x, w1_ref[l], mm_dtype) + b1_ref[l], 0.0)  # (T, 4E)
      ff = mm(ff, w2_ref[l], mm_dtype) + b2_ref[l]                   # (T, E)
      x = layernorm(ff + x, ln2_g_ref[l], ln2_b_ref[l])

    # -- final vocab projection (lane-padded, kept f32) ----------------------
    out_ref[i] = (mm(x, wout_ref[...], jnp.float32)
                  + bout_ref[...]).astype(out_ref.dtype)


# ------------------------------ forward wrapper -----------------------------

def decoder_forward(params, tokens, enc_out, src_mask, trg_mask, *, heads):
  N, T = tokens.shape
  V, E = params['emb'].shape
  S = enc_out.shape[1]
  L = params['w1'].shape[0]
  assert E % heads == 0
  Dh = E // heads
  Vpad = pl.cdiv(V, 128) * 128

  nb = NB_PER_STEP if (N % NB_PER_STEP == 0) else 1

  # Tiny one-time prep: lane-dense output weights, additive mask biases,
  # scale folded into Q projections, head-major reshape of attn out-proj.
  scale = 1.0 / math.sqrt(Dh)
  sa_wqkv = params['sa_wqkv'].at[:, :, :E].multiply(scale)
  sa_bqkv = params['sa_bqkv'].at[:, :, :E].multiply(scale)
  ca_wq = params['ca_wq'] * scale
  ca_bq = params['ca_bq'] * scale
  sa_wo3 = params['sa_wo'].reshape(L, heads, Dh, E)
  ca_wo3 = params['ca_wo'].reshape(L, heads, Dh, E)

  wout_pad = jnp.pad(params['w_out'], ((0, 0), (0, Vpad - V)))
  bout_pad = jnp.pad(params['b_out'], (0, Vpad - V)).reshape(1, Vpad)
  pe_n = params['pe'][:N]                                   # (N, 1, E) quirk

  # Additive mask biases.  trg (causal) mask is assumed batch-invariant and
  # passed once; src (padding) mask stays per-batch but only (1, S).
  trg_bias = jnp.where(trg_mask[0, 0] == 0, -1e9, 0.0).astype(jnp.float32)   # (T,T)
  src_bias = jnp.where(src_mask[:, 0, 0] == 0, -1e9, 0.0)\
               .astype(jnp.float32).reshape(N, 1, S)

  tok_i32 = tokens.astype(jnp.int32)                        # scalar-prefetched

  kernel = functools.partial(_decoder_kernel, heads=heads, num_layers=L,
                             nb=nb, eps=1e-5, mm_dtype=MM_DTYPE,
                             approx_recip=APPROX_RECIP)

  def full(shape):            # grid-invariant block (whole array)
    n = len(shape)
    def imap(b, tok_ref):
      return (0,) * n
    return pl.BlockSpec(shape, imap)

  def per_step(*tail):        # (nb, ...) block indexed by the batch grid axis
    n = len(tail)
    def imap(b, tok_ref):
      return (b,) + (0,) * n
    return pl.BlockSpec((nb,) + tail, imap)

  grid_spec = pltpu.PrefetchScalarGridSpec(
      num_scalar_prefetch=1,
      grid=(N // nb,),
      in_specs=[
          full((V, E)),                    # embedding table
          per_step(1, E),                  # positional encoding rows
          per_step(S, E),                  # encoder output
          full((T, T)),                    # trg (causal) additive bias - once
          per_step(1, S),                  # src additive bias
          full(sa_wqkv.shape), full(sa_bqkv.shape),
          full(sa_wo3.shape),  full(params['sa_bo'].shape),
          full(params['ln0_g'].shape), full(params['ln0_b'].shape),
          full(ca_wq.shape),   full(ca_bq.shape),
          full(params['ca_wkv'].shape), full(params['ca_bkv'].shape),
          full(ca_wo3.shape),  full(params['ca_bo'].shape),
          full(params['ln1_g'].shape), full(params['ln1_b'].shape),
          full(params['ln2_g'].shape), full(params['ln2_b'].shape),
          full(params['w1'].shape), full(params['b1'].shape),
          full(params['w2'].shape), full(params['b2'].shape),
          full((E, Vpad)),                 # padded output weight
          full((1, Vpad)),                 # padded output bias
      ],
      out_specs=per_step(T, Vpad),
  )

  logits_pad = pl.pallas_call(
      kernel,
      out_shape=jax.ShapeDtypeStruct((N, T, Vpad), jnp.float32),
      grid_spec=grid_spec,
      compiler_params=pltpu.CompilerParams(
          dimension_semantics=("parallel",),
          vmem_limit_bytes=64 * 1024 * 1024),
  )(tok_i32,
    params['emb'], pe_n, enc_out, trg_bias, src_bias,
    sa_wqkv, sa_bqkv, sa_wo3, params['sa_bo'],
    params['ln0_g'], params['ln0_b'],
    ca_wq, ca_bq, params['ca_wkv'], params['ca_bkv'],
    ca_wo3, params['ca_bo'],
    params['ln1_g'], params['ln1_b'], params['ln2_g'], params['ln2_b'],
    params['w1'], params['b1'], params['w2'], params['b2'],
    wout_pad, bout_pad)

  return logits_pad[:, :, :V]


# ------------------------------ init helpers -------------------------------

def init_linear(key, d_in, d_out):
  kw, kb = jax.random.split(key)
  w = jax.random.normal(kw, (d_in, d_out), jnp.float32) * 0.05
  b = jax.random.normal(kb, (d_out,), jnp.float32) * 0.05
  return w, b


def init_layer(key, E, expansion):
  ks = jax.random.split(key, 10)
  wq, bq = init_linear(ks[0], E, E)
  wk, bk = init_linear(ks[1], E, E)
  wv, bv = init_linear(ks[2], E, E)
  wo, bo = init_linear(ks[3], E, E)           # self-attn out proj
  cwq, cbq = init_linear(ks[4], E, E)
  cwk, cbk = init_linear(ks[5], E, E)
  cwv, cbv = init_linear(ks[6], E, E)
  cwo, cbo = init_linear(ks[7], E, E)         # cross-attn out proj
  w1, b1 = init_linear(ks[8], E, expansion * E)
  w2, b2 = init_linear(ks[9], expansion * E, E)
  ones = jnp.ones((1, E), jnp.float32)
  zeros = jnp.zeros((1, E), jnp.float32)
  return dict(
      sa_wqkv=jnp.concatenate([wq, wk, wv], axis=1),
      sa_bqkv=jnp.concatenate([bq, bk, bv])[None, :],
      sa_wo=wo, sa_bo=bo[None, :],
      ln0_g=ones, ln0_b=zeros,
      ca_wq=cwq, ca_bq=cbq[None, :],
      ca_wkv=jnp.concatenate([cwk, cwv], axis=1),
      ca_bkv=jnp.concatenate([cbk, cbv])[None, :],
      ca_wo=cwo, ca_bo=cbo[None, :],
      ln1_g=ones, ln1_b=zeros,
      ln2_g=ones, ln2_b=zeros,
      w1=w1, b1=b1[None, :], w2=w2, b2=b2[None, :],
  )


def make_pos_encoding(max_len, embed_size):
  position = jnp.arange(max_len, dtype=jnp.float32)[:, None]
  div_term = jnp.exp(jnp.arange(0, embed_size, 2, dtype=jnp.float32)
                     * (-math.log(10000.0) / embed_size))
  pe = jnp.zeros((max_len, embed_size), jnp.float32)
  pe = pe.at[:, 0::2].set(jnp.sin(position * div_term))
  pe = pe.at[:, 1::2].set(jnp.cos(position * div_term))
  return pe[:, None, :]   # (max_len, 1, embed_size), matches the torch buffer


def init_params(key, num_layers, E, expansion, vocab, max_len):
  ks = jax.random.split(key, num_layers + 2)
  layer_dicts = [init_layer(ks[2 + i], E, expansion) for i in range(num_layers)]
  stacked = {k: jnp.stack([ld[k] for ld in layer_dicts])
             for k in layer_dicts[0]}
  w_out, b_out = init_linear(ks[1], E, vocab)
  return dict(
      emb=jax.random.normal(ks[0], (vocab, E), jnp.float32) * 0.05,
      pe=make_pos_encoding(max_len, E),
      w_out=w_out, b_out=b_out,
      **stacked,
  )


# ---------------------------------- main ------------------------------------

if __name__ == "__main__":
  N, T, S = 2, 8, 8
  E, heads, expansion, num_layers = 32, 4, 4, 2
  vocab, max_len = 50, 100

  key = jax.random.PRNGKey(0)
  k_params, k_tok, k_enc = jax.random.split(key, 3)
  params = init_params(k_params, num_layers, E, expansion, vocab, max_len)

  tokens = jax.random.randint(k_tok, (N, T), 0, vocab, dtype=jnp.int32)
  enc_out = jax.random.normal(k_enc, (N, S, E), jnp.float32)
  src_mask = jnp.ones((N, 1, 1, S), jnp.float32)                      # no padding
  trg_mask = jnp.broadcast_to(jnp.tril(jnp.ones((T, T), jnp.float32)),
                              (N, 1, T, T))                           # causal

  fwd = jax.jit(functools.partial(decoder_forward, heads=heads))
  logits = fwd(params, tokens, enc_out, src_mask, trg_mask)
  jax.block_until_ready(logits)

  assert logits.shape == (N, T, vocab)
  assert bool(jnp.all(jnp.isfinite(logits)))
  print("KERNEL_OK")
</pallas_src>

<mosaic_0001>
module attributes {stable_mosaic.version = 11 : i64} {
  func.func @_decoder_kernel(%arg0: i32, %arg1: memref<2x8xi32, #tpu.memory_space<smem>>, %arg2: memref<50x32xf32, #tpu.memory_space<vmem>>, %arg3: memref<1x1x32xf32, #tpu.memory_space<vmem>>, %arg4: memref<1x8x32xf32, #tpu.memory_space<vmem>>, %arg5: memref<8x8xf32, #tpu.memory_space<vmem>>, %arg6: memref<1x1x8xf32, #tpu.memory_space<vmem>>, %arg7: memref<2x32x96xf32, #tpu.memory_space<vmem>>, %arg8: memref<2x1x96xf32, #tpu.memory_space<vmem>>, %arg9: memref<2x4x8x32xf32, #tpu.memory_space<vmem>>, %arg10: memref<2x1x32xf32, #tpu.memory_space<vmem>>, %arg11: memref<2x1x32xf32, #tpu.memory_space<vmem>>, %arg12: memref<2x1x32xf32, #tpu.memory_space<vmem>>, %arg13: memref<2x32x32xf32, #tpu.memory_space<vmem>>, %arg14: memref<2x1x32xf32, #tpu.memory_space<vmem>>, %arg15: memref<2x32x64xf32, #tpu.memory_space<vmem>>, %arg16: memref<2x1x64xf32, #tpu.memory_space<vmem>>, %arg17: memref<2x4x8x32xf32, #tpu.memory_space<vmem>>, %arg18: memref<2x1x32xf32, #tpu.memory_space<vmem>>, %arg19: memref<2x1x32xf32, #tpu.memory_space<vmem>>, %arg20: memref<2x1x32xf32, #tpu.memory_space<vmem>>, %arg21: memref<2x1x32xf32, #tpu.memory_space<vmem>>, %arg22: memref<2x1x32xf32, #tpu.memory_space<vmem>>, %arg23: memref<2x32x128xf32, #tpu.memory_space<vmem>>, %arg24: memref<2x1x128xf32, #tpu.memory_space<vmem>>, %arg25: memref<2x128x32xf32, #tpu.memory_space<vmem>>, %arg26: memref<2x1x32xf32, #tpu.memory_space<vmem>>, %arg27: memref<32x128xf32, #tpu.memory_space<vmem>>, %arg28: memref<1x128xf32, #tpu.memory_space<vmem>>, %arg29: memref<1x8x128xf32, #tpu.memory_space<vmem>>) attributes {dimension_semantics = [#tpu.dimension_semantics<parallel>], iteration_bounds = array<i64: 2>, scalar_prefetch = 1 : i64, scratch_operands = 0 : i64, tpu.core_type = #tpu.core_type<tc>, window_params = [{pipeline_mode = #tpu.pipeline_mode<synchronous>, transform_indices = @transform_0, window_bounds = array<i64: 50, 32>}, {transform_indices = @transform_1, window_bounds = array<i64: 1, 1, 32>}, {transform_indices = @transform_2, window_bounds = array<i64: 1, 8, 32>}, {pipeline_mode = #tpu.pipeline_mode<synchronous>, transform_indices = @transform_3, window_bounds = array<i64: 8, 8>}, {transform_indices = @transform_4, window_bounds = array<i64: 1, 1, 8>}, {pipeline_mode = #tpu.pipeline_mode<synchronous>, transform_indices = @transform_5, window_bounds = array<i64: 2, 32, 96>}, {pipeline_mode = #tpu.pipeline_mode<synchronous>, transform_indices = @transform_6, window_bounds = array<i64: 2, 1, 96>}, {pipeline_mode = #tpu.pipeline_mode<synchronous>, transform_indices = @transform_7, window_bounds = array<i64: 2, 4, 8, 32>}, {pipeline_mode = #tpu.pipeline_mode<synchronous>, transform_indices = @transform_8, window_bounds = array<i64: 2, 1, 32>}, {pipeline_mode = #tpu.pipeline_mode<synchronous>, transform_indices = @transform_9, window_bounds = array<i64: 2, 1, 32>}, {pipeline_mode = #tpu.pipeline_mode<synchronous>, transform_indices = @transform_10, window_bounds = array<i64: 2, 1, 32>}, {pipeline_mode = #tpu.pipeline_mode<synchronous>, transform_indices = @transform_11, window_bounds = array<i64: 2, 32, 32>}, {pipeline_mode = #tpu.pipeline_mode<synchronous>, transform_indices = @transform_12, window_bounds = array<i64: 2, 1, 32>}, {pipeline_mode = #tpu.pipeline_mode<synchronous>, transform_indices = @transform_13, window_bounds = array<i64: 2, 32, 64>}, {pipeline_mode = #tpu.pipeline_mode<synchronous>, transform_indices = @transform_14, window_bounds = array<i64: 2, 1, 64>}, {pipeline_mode = #tpu.pipeline_mode<synchronous>, transform_indices = @transform_15, window_bounds = array<i64: 2, 4, 8, 32>}, {pipeline_mode = #tpu.pipeline_mode<synchronous>, transform_indices = @transform_16, window_bounds = array<i64: 2, 1, 32>}, {pipeline_mode = #tpu.pipeline_mode<synchronous>, transform_indices = @transform_17, window_bounds = array<i64: 2, 1, 32>}, {pipeline_mode = #tpu.pipeline_mode<synchronous>, transform_indices = @transform_18, window_bounds = array<i64: 2, 1, 32>}, {pipeline_mode = #tpu.pipeline_mode<synchronous>, transform_indices = @transform_19, window_bounds = array<i64: 2, 1, 32>}, {pipeline_mode = #tpu.pipeline_mode<synchronous>, transform_indices = @transform_20, window_bounds = array<i64: 2, 1, 32>}, {pipeline_mode = #tpu.pipeline_mode<synchronous>, transform_indices = @transform_21, window_bounds = array<i64: 2, 32, 128>}, {pipeline_mode = #tpu.pipeline_mode<synchronous>, transform_indices = @transform_22, window_bounds = array<i64: 2, 1, 128>}, {pipeline_mode = #tpu.pipeline_mode<synchronous>, transform_indices = @transform_23, window_bounds = array<i64: 2, 128, 32>}, {pipeline_mode = #tpu.pipeline_mode<synchronous>, transform_indices = @transform_24, window_bounds = array<i64: 2, 1, 32>}, {pipeline_mode = #tpu.pipeline_mode<synchronous>, transform_indices = @transform_25, window_bounds = array<i64: 32, 128>}, {pipeline_mode = #tpu.pipeline_mode<synchronous>, transform_indices = @transform_26, window_bounds = array<i64: 1, 128>}, {transform_indices = @transform_27, window_bounds = array<i64: 1, 8, 128>}]} {
    %c0 = arith.constant 0 : index
    %c0_0 = arith.constant 0 : index
    %0 = vector.load %arg5[%c0, %c0_0] : memref<8x8xf32, #tpu.memory_space<vmem>>, vector<8x8xf32>
    %c1_i32 = arith.constant 1 : i32
    %1 = arith.muli %arg0, %c1_i32 : i32
    %c0_i32 = arith.constant 0 : i32
    %2 = arith.addi %1, %c0_i32 : i32
    %3 = arith.index_cast %2 : i32 to index
    %c0_1 = arith.constant 0 : index
    %4 = memref.load %arg1[%3, %c0_1] : memref<2x8xi32, #tpu.memory_space<smem>>
    %5 = vector.broadcast %4 : i32 to vector<1x1xi32>
    %c0_i32_2 = arith.constant 0 : i32
    %6 = arith.addi %1, %c0_i32_2 : i32
    %7 = arith.index_cast %6 : i32 to index
    %c1 = arith.constant 1 : index
    %8 = memref.load %arg1[%7, %c1] : memref<2x8xi32, #tpu.memory_space<smem>>
    %9 = vector.broadcast %8 : i32 to vector<1x1xi32>
    %c0_i32_3 = arith.constant 0 : i32
    %10 = arith.addi %1, %c0_i32_3 : i32
    %11 = arith.index_cast %10 : i32 to index
    %c2 = arith.constant 2 : index
    %12 = memref.load %arg1[%11, %c2] : memref<2x8xi32, #tpu.memory_space<smem>>
    %13 = vector.broadcast %12 : i32 to vector<1x1xi32>
    %c0_i32_4 = arith.constant 0 : i32
    %14 = arith.addi %1, %c0_i32_4 : i32
    %15 = arith.index_cast %14 : i32 to index
    %c3 = arith.constant 3 : index
    %16 = memref.load %arg1[%15, %c3] : memref<2x8xi32, #tpu.memory_space<smem>>
    %17 = vector.broadcast %16 : i32 to vector<1x1xi32>
    %c0_i32_5 = arith.constant 0 : i32
    %18 = arith.addi %1, %c0_i32_5 : i32
    %19 = arith.index_cast %18 : i32 to index
    %c4 = arith.constant 4 : index
    %20 = memref.load %arg1[%19, %c4] : memref<2x8xi32, #tpu.memory_space<smem>>
    %21 = vector.broadcast %20 : i32 to vector<1x1xi32>
    %c0_i32_6 = arith.constant 0 : i32
    %22 = arith.addi %1, %c0_i32_6 : i32
    %23 = arith.index_cast %22 : i32 to index
    %c5 = arith.constant 5 : index
    %24 = memref.load %arg1[%23, %c5] : memref<2x8xi32, #tpu.memory_space<smem>>
    %25 = vector.broadcast %24 : i32 to vector<1x1xi32>
    %c0_i32_7 = arith.constant 0 : i32
    %26 = arith.addi %1, %c0_i32_7 : i32
    %27 = arith.index_cast %26 : i32 to index
    %c6 = arith.constant 6 : index
    %28 = memref.load %arg1[%27, %c6] : memref<2x8xi32, #tpu.memory_space<smem>>
    %29 = vector.broadcast %28 : i32 to vector<1x1xi32>
    %c0_i32_8 = arith.constant 0 : i32
    %30 = arith.addi %1, %c0_i32_8 : i32
    %31 = arith.index_cast %30 : i32 to index
    %c7 = arith.constant 7 : index
    %32 = memref.load %arg1[%31, %c7] : memref<2x8xi32, #tpu.memory_space<smem>>
    %33 = vector.broadcast %32 : i32 to vector<1x1xi32>
    %34 = tpu.concatenate %5, %9, %13, %17, %21, %25, %29, %33 in 0 : vector<1x1xi32>, vector<1x1xi32>, vector<1x1xi32>, vector<1x1xi32>, vector<1x1xi32>, vector<1x1xi32>, vector<1x1xi32>, vector<1x1xi32> -> vector<8x1xi32>
    %35 = tpu.iota {dimensions = array<i32: 1>} : vector<8x50xi32>
    %36 = vector.broadcast %34 : vector<8x1xi32> to vector<8x50xi32>
    %37 = arith.cmpi eq, %35, %36 : vector<8x50xi32>
    %c0_9 = arith.constant 0 : index
    %c0_10 = arith.constant 0 : index
    %38 = vector.load %arg2[%c0_9, %c0_10] : memref<50x32xf32, #tpu.memory_space<vmem>>, vector<50x32xf32>
    %39 = arith.extui %37 : vector<8x50xi1> to vector<8x50xi32>
    %40 = arith.sitofp %39 : vector<8x50xi32> to vector<8x50xf32>
    %cst = arith.constant dense<0.000000e+00> : vector<8x32xf32>
    %41 = tpu.matmul %40, %38, %cst {dimension_numbers = #tpu.dot_dimension_numbers<[1], [0], [0], [1], [0, 0, 1, 1], [], []>} : vector<8x50xf32>, vector<50x32xf32>, vector<8x32xf32> -> vector<8x32xf32>
    %c0_11 = arith.constant 0 : index
    %c0_12 = arith.constant 0 : index
    %c0_13 = arith.constant 0 : index
    %42 = vector.load %arg3[%c0_11, %c0_12, %c0_13] : memref<1x1x32xf32, #tpu.memory_space<vmem>>, vector<1x1x32xf32>
    %43 = vector.shape_cast %42 : vector<1x1x32xf32> to vector<1x32xf32>
    %44 = vector.broadcast %43 : vector<1x32xf32> to vector<8x32xf32>
    %45 = arith.addf %41, %44 : vector<8x32xf32>
    %c0_14 = arith.constant 0 : index
    %c0_15 = arith.constant 0 : index
    %c0_16 = arith.constant 0 : index
    %46 = vector.load %arg4[%c0_14, %c0_15, %c0_16] : memref<1x8x32xf32, #tpu.memory_space<vmem>>, vector<1x8x32xf32>
    %47 = vector.shape_cast %46 : vector<1x8x32xf32> to vector<8x32xf32>
    %c0_17 = arith.constant 0 : index
    %c0_18 = arith.constant 0 : index
    %c0_19 = arith.constant 0 : index
    %48 = vector.load %arg6[%c0_17, %c0_18, %c0_19] : memref<1x1x8xf32, #tpu.memory_space<vmem>>, vector<1x1x8xf32>
    %49 = vector.shape_cast %48 : vector<1x1x8xf32> to vector<1x8xf32>
    %c0_20 = arith.constant 0 : index
    %c0_21 = arith.constant 0 : index
    %c0_22 = arith.constant 0 : index
    %50 = vector.load %arg7[%c0_20, %c0_21, %c0_22] : memref<2x32x96xf32, #tpu.memory_space<vmem>>, vector<1x32x96xf32>
    %51 = vector.shape_cast %50 : vector<1x32x96xf32> to vector<32x96xf32>
    %cst_23 = arith.constant dense<0.000000e+00> : vector<8x96xf32>
    %52 = tpu.matmul %45, %51, %cst_23 {dimension_numbers = #tpu.dot_dimension_numbers<[1], [0], [0], [1], [0, 0, 1, 1], [], []>} : vector<8x32xf32>, vector<32x96xf32>, vector<8x96xf32> -> vector<8x96xf32>
    %c0_24 = arith.constant 0 : index
    %c0_25 = arith.constant 0 : index
    %c0_26 = arith.constant 0 : index
    %53 = vector.load %arg8[%c0_24, %c0_25, %c0_26] : memref<2x1x96xf32, #tpu.memory_space<vmem>>, vector<1x1x96xf32>
    %54 = vector.shape_cast %53 : vector<1x1x96xf32> to vector<1x96xf32>
    %55 = vector.broadcast %54 : vector<1x96xf32> to vector<8x96xf32>
    %56 = arith.addf %52, %55 : vector<8x96xf32>
    %57 = vector.extract_strided_slice %56 {offsets = [0, 0], sizes = [8, 32], strides = [1, 1]} : vector<8x96xf32> to vector<8x32xf32>
    %58 = vector.extract_strided_slice %56 {offsets = [0, 32], sizes = [8, 32], strides = [1, 1]} : vector<8x96xf32> to vector<8x32xf32>
    %59 = vector.extract_strided_slice %56 {offsets = [0, 64], sizes = [8, 32], strides = [1, 1]} : vector<8x96xf32> to vector<8x32xf32>
    %c0_27 = arith.constant 0 : index
    %c0_28 = arith.constant 0 : index
    %c0_29 = arith.constant 0 : index
    %c0_30 = arith.constant 0 : index
    %60 = vector.load %arg9[%c0_27, %c0_28, %c0_29, %c0_30] : memref<2x4x8x32xf32, #tpu.memory_space<vmem>>, vector<1x4x8x32xf32>
    %61 = vector.shape_cast %60 : vector<1x4x8x32xf32> to vector<4x8x32xf32>
    %c0_31 = arith.constant 0 : index
    %c0_32 = arith.constant 0 : index
    %c0_33 = arith.constant 0 : index
    %62 = vector.load %arg10[%c0_31, %c0_32, %c0_33] : memref<2x1x32xf32, #tpu.memory_space<vmem>>, vector<1x1x32xf32>
    %63 = vector.shape_cast %62 : vector<1x1x32xf32> to vector<1x32xf32>
    %64 = vector.extract_strided_slice %57 {offsets = [0, 0], sizes = [8, 8], strides = [1, 1]} : vector<8x32xf32> to vector<8x8xf32>
    %65 = vector.extract_strided_slice %57 {offsets = [0, 8], sizes = [8, 8], strides = [1, 1]} : vector<8x32xf32> to vector<8x8xf32>
    %66 = vector.extract_strided_slice %57 {offsets = [0, 16], sizes = [8, 8], strides = [1, 1]} : vector<8x32xf32> to vector<8x8xf32>
    %67 = vector.extract_strided_slice %57 {offsets = [0, 24], sizes = [8, 8], strides = [1, 1]} : vector<8x32xf32> to vector<8x8xf32>
    %68 = vector.shape_cast %64 : vector<8x8xf32> to vector<1x8x8xf32>
    %69 = vector.shape_cast %65 : vector<8x8xf32> to vector<1x8x8xf32>
    %70 = vector.shape_cast %66 : vector<8x8xf32> to vector<1x8x8xf32>
    %71 = vector.shape_cast %67 : vector<8x8xf32> to vector<1x8x8xf32>
    %72 = tpu.concatenate %68, %69, %70, %71 in 0 : vector<1x8x8xf32>, vector<1x8x8xf32>, vector<1x8x8xf32>, vector<1x8x8xf32> -> vector<4x8x8xf32>
    %73 = vector.extract_strided_slice %58 {offsets = [0, 0], sizes = [8, 8], strides = [1, 1]} : vector<8x32xf32> to vector<8x8xf32>
    %74 = vector.extract_strided_slice %58 {offsets = [0, 8], sizes = [8, 8], strides = [1, 1]} : vector<8x32xf32> to vector<8x8xf32>
    %75 = vector.extract_strided_slice %58 {offsets = [0, 16], sizes = [8, 8], strides = [1, 1]} : vector<8x32xf32> to vector<8x8xf32>
    %76 = vector.extract_strided_slice %58 {offsets = [0, 24], sizes = [8, 8], strides = [1, 1]} : vector<8x32xf32> to vector<8x8xf32>
    %77 = vector.shape_cast %73 : vector<8x8xf32> to vector<1x8x8xf32>
    %78 = vector.shape_cast %74 : vector<8x8xf32> to vector<1x8x8xf32>
    %79 = vector.shape_cast %75 : vector<8x8xf32> to vector<1x8x8xf32>
    %80 = vector.shape_cast %76 : vector<8x8xf32> to vector<1x8x8xf32>
    %81 = tpu.concatenate %77, %78, %79, %80 in 0 : vector<1x8x8xf32>, vector<1x8x8xf32>, vector<1x8x8xf32>, vector<1x8x8xf32> -> vector<4x8x8xf32>
    %82 = vector.extract_strided_slice %59 {offsets = [0, 0], sizes = [8, 8], strides = [1, 1]} : vector<8x32xf32> to vector<8x8xf32>
    %83 = vector.extract_strided_slice %59 {offsets = [0, 8], sizes = [8, 8], strides = [1, 1]} : vector<8x32xf32> to vector<8x8xf32>
    %84 = vector.extract_strided_slice %59 {offsets = [0, 16], sizes = [8, 8], strides = [1, 1]} : vector<8x32xf32> to vector<8x8xf32>
    %85 = vector.extract_strided_slice %59 {offsets = [0, 24], sizes = [8, 8], strides = [1, 1]} : vector<8x32xf32> to vector<8x8xf32>
    %86 = vector.shape_cast %82 : vector<8x8xf32> to vector<1x8x8xf32>
    %87 = vector.shape_cast %83 : vector<8x8xf32> to vector<1x8x8xf32>
    %88 = vector.shape_cast %84 : vector<8x8xf32> to vector<1x8x8xf32>
    %89 = vector.shape_cast %85 : vector<8x8xf32> to vector<1x8x8xf32>
    %90 = tpu.concatenate %86, %87, %88, %89 in 0 : vector<1x8x8xf32>, vector<1x8x8xf32>, vector<1x8x8xf32>, vector<1x8x8xf32> -> vector<4x8x8xf32>
    "tpu.trace_start"() <{level = 10 : i32, message = "hqd,hkd->hqk"}> : () -> ()
    %cst_34 = arith.constant dense<0.000000e+00> : vector<4x8x8xf32>
    %91 = tpu.matmul %72, %81, %cst_34 {dimension_numbers = #tpu.dot_dimension_numbers<[2], [2], [1], [1], [0, 0, 0, 1, 1, 1], [0], [0]>} : vector<4x8x8xf32>, vector<4x8x8xf32>, vector<4x8x8xf32> -> vector<4x8x8xf32>
    "tpu.trace_stop"() : () -> ()
    %92 = vector.shape_cast %0 : vector<8x8xf32> to vector<1x8x8xf32>
    %93 = vector.broadcast %92 : vector<1x8x8xf32> to vector<4x8x8xf32>
    %94 = arith.addf %91, %93 : vector<4x8x8xf32>
    %cst_35 = arith.constant dense<0xFF800000> : vector<4x8xf32>
    %95 = vector.multi_reduction <maximumf>, %94, %cst_35 [2] : vector<4x8x8xf32> to vector<4x8xf32>
    %96 = vector.shape_cast %95 : vector<4x8xf32> to vector<4x8x1xf32>
    %97 = vector.broadcast %96 : vector<4x8x1xf32> to vector<4x8x8xf32>
    %98 = arith.subf %94, %97 : vector<4x8x8xf32>
    %99 = math.exp %98 : vector<4x8x8xf32>
    %cst_36 = arith.constant dense<0.000000e+00> : vector<4x8xf32>
    %100 = vector.multi_reduction <add>, %99, %cst_36 [2] : vector<4x8x8xf32> to vector<4x8xf32>
    %101 = vector.shape_cast %100 : vector<4x8xf32> to vector<4x8x1xf32>
    %102 = tpu.reciprocal %101 {approx = true} : vector<4x8x1xf32> -> vector<4x8x1xf32>
    %103 = vector.broadcast %102 : vector<4x8x1xf32> to vector<4x8x8xf32>
    %104 = arith.mulf %99, %103 : vector<4x8x8xf32>
    "tpu.trace_start"() <{level = 10 : i32, message = "hqk,hkd->hqd"}> : () -> ()
    %cst_37 = arith.constant dense<0.000000e+00> : vector<4x8x8xf32>
    %105 = tpu.matmul %104, %90, %cst_37 {dimension_numbers = #tpu.dot_dimension_numbers<[2], [1], [1], [2], [0, 0, 0, 1, 1, 2], [0], [0]>} : vector<4x8x8xf32>, vector<4x8x8xf32>, vector<4x8x8xf32> -> vector<4x8x8xf32>
    "tpu.trace_stop"() : () -> ()
    "tpu.trace_start"() <{level = 10 : i32, message = "hqd,hde->hqe"}> : () -> ()
    %cst_38 = arith.constant dense<0.000000e+00> : vector<4x8x32xf32>
    %106 = tpu.matmul %105, %61, %cst_38 {dimension_numbers = #tpu.dot_dimension_numbers<[2], [1], [1], [2], [0, 0, 0, 1, 1, 2], [0], [0]>} : vector<4x8x8xf32>, vector<4x8x32xf32>, vector<4x8x32xf32> -> vector<4x8x32xf32>
    "tpu.trace_stop"() : () -> ()
    %cst_39 = arith.constant dense<0.000000e+00> : vector<8x32xf32>
    %107 = vector.multi_reduction <add>, %106, %cst_39 [0] : vector<4x8x32xf32> to vector<8x32xf32>
    %108 = vector.broadcast %63 : vector<1x32xf32> to vector<8x32xf32>
    %109 = arith.addf %107, %108 : vector<8x32xf32>
    %110 = arith.addf %109, %45 : vector<8x32xf32>
    %c0_40 = arith.constant 0 : index
    %c0_41 = arith.constant 0 : index
    %c0_42 = arith.constant 0 : index
    %111 = vector.load %arg11[%c0_40, %c0_41, %c0_42] : memref<2x1x32xf32, #tpu.memory_space<vmem>>, vector<1x1x32xf32>
    %112 = vector.shape_cast %111 : vector<1x1x32xf32> to vector<1x32xf32>
    %c0_43 = arith.constant 0 : index
    %c0_44 = arith.constant 0 : index
    %c0_45 = arith.constant 0 : index
    %113 = vector.load %arg12[%c0_43, %c0_44, %c0_45] : memref<2x1x32xf32, #tpu.memory_space<vmem>>, vector<1x1x32xf32>
    %114 = vector.shape_cast %113 : vector<1x1x32xf32> to vector<1x32xf32>
    %cst_46 = arith.constant dense<0.000000e+00> : vector<8xf32>
    %115 = vector.multi_reduction <add>, %110, %cst_46 [1] : vector<8x32xf32> to vector<8xf32>
    %116 = vector.shape_cast %115 : vector<8xf32> to vector<8x1xf32>
    %cst_47 = arith.constant 3.200000e+01 : f32
    %117 = vector.broadcast %cst_47 : f32 to vector<8x1xf32>
    %118 = arith.divf %116, %117 : vector<8x1xf32>
    %119 = vector.broadcast %118 : vector<8x1xf32> to vector<8x32xf32>
    %120 = arith.subf %110, %119 : vector<8x32xf32>
    %121 = arith.mulf %120, %120 : vector<8x32xf32>
    %cst_48 = arith.constant dense<0.000000e+00> : vector<8xf32>
    %122 = vector.multi_reduction <add>, %121, %cst_48 [1] : vector<8x32xf32> to vector<8xf32>
    %123 = vector.shape_cast %122 : vector<8xf32> to vector<8x1xf32>
    %cst_49 = arith.constant 3.200000e+01 : f32
    %124 = vector.broadcast %cst_49 : f32 to vector<8x1xf32>
    %125 = arith.divf %123, %124 : vector<8x1xf32>
    %126 = vector.broadcast %118 : vector<8x1xf32> to vector<8x32xf32>
    %127 = arith.subf %110, %126 : vector<8x32xf32>
    %cst_50 = arith.constant 9.99999974E-6 : f32
    %128 = vector.broadcast %cst_50 : f32 to vector<8x1xf32>
    %129 = arith.addf %125, %128 : vector<8x1xf32>
    %130 = math.rsqrt %129 : vector<8x1xf32>
    %131 = vector.broadcast %130 : vector<8x1xf32> to vector<8x32xf32>
    %132 = arith.mulf %127, %131 : vector<8x32xf32>
    %133 = vector.broadcast %112 : vector<1x32xf32> to vector<8x32xf32>
    %134 = arith.mulf %132, %133 : vector<8x32xf32>
    %135 = vector.broadcast %114 : vector<1x32xf32> to vector<8x32xf32>
    %136 = arith.addf %134, %135 : vector<8x32xf32>
    %c0_51 = arith.constant 0 : index
    %c0_52 = arith.constant 0 : index
    %c0_53 = arith.constant 0 : index
    %137 = vector.load %arg13[%c0_51, %c0_52, %c0_53] : memref<2x32x32xf32, #tpu.memory_space<vmem>>, vector<1x32x32xf32>
    %138 = vector.shape_cast %137 : vector<1x32x32xf32> to vector<32x32xf32>
    %cst_54 = arith.constant dense<0.000000e+00> : vector<8x32xf32>
    %139 = tpu.matmul %136, %138, %cst_54 {dimension_numbers = #tpu.dot_dimension_numbers<[1], [0], [0], [1], [0, 0, 1, 1], [], []>} : vector<8x32xf32>, vector<32x32xf32>, vector<8x32xf32> -> vector<8x32xf32>
    %c0_55 = arith.constant 0 : index
    %c0_56 = arith.constant 0 : index
    %c0_57 = arith.constant 0 : index
    %140 = vector.load %arg14[%c0_55, %c0_56, %c0_57] : memref<2x1x32xf32, #tpu.memory_space<vmem>>, vector<1x1x32xf32>
    %141 = vector.shape_cast %140 : vector<1x1x32xf32> to vector<1x32xf32>
    %142 = vector.broadcast %141 : vector<1x32xf32> to vector<8x32xf32>
    %143 = arith.addf %139, %142 : vector<8x32xf32>
    %c0_58 = arith.constant 0 : index
    %c0_59 = arith.constant 0 : index
    %c0_60 = arith.constant 0 : index
    %144 = vector.load %arg15[%c0_58, %c0_59, %c0_60] : memref<2x32x64xf32, #tpu.memory_space<vmem>>, vector<1x32x64xf32>
    %145 = vector.shape_cast %144 : vector<1x32x64xf32> to vector<32x64xf32>
    %cst_61 = arith.constant dense<0.000000e+00> : vector<8x64xf32>
    %146 = tpu.matmul %47, %145, %cst_61 {dimension_numbers = #tpu.dot_dimension_numbers<[1], [0], [0], [1], [0, 0, 1, 1], [], []>} : vector<8x32xf32>, vector<32x64xf32>, vector<8x64xf32> -> vector<8x64xf32>
    %c0_62 = arith.constant 0 : index
    %c0_63 = arith.constant 0 : index
    %c0_64 = arith.constant 0 : index
    %147 = vector.load %arg16[%c0_62, %c0_63, %c0_64] : memref<2x1x64xf32, #tpu.memory_space<vmem>>, vector<1x1x64xf32>
    %148 = vector.shape_cast %147 : vector<1x1x64xf32> to vector<1x64xf32>
    %149 = vector.broadcast %148 : vector<1x64xf32> to vector<8x64xf32>
    %150 = arith.addf %146, %149 : vector<8x64xf32>
    %151 = vector.extract_strided_slice %150 {offsets = [0, 0], sizes = [8, 32], strides = [1, 1]} : vector<8x64xf32> to vector<8x32xf32>
    %152 = vector.extract_strided_slice %150 {offsets = [0, 32], sizes = [8, 32], strides = [1, 1]} : vector<8x64xf32> to vector<8x32xf32>
    %c0_65 = arith.constant 0 : index
    %c0_66 = arith.constant 0 : index
    %c0_67 = arith.constant 0 : index
    %c0_68 = arith.constant 0 : index
    %153 = vector.load %arg17[%c0_65, %c0_66, %c0_67, %c0_68] : memref<2x4x8x32xf32, #tpu.memory_space<vmem>>, vector<1x4x8x32xf32>
    %154 = vector.shape_cast %153 : vector<1x4x8x32xf32> to vector<4x8x32xf32>
    %c0_69 = arith.constant 0 : index
    %c0_70 = arith.constant 0 : index
    %c0_71 = arith.constant 0 : index
    %155 = vector.load %arg18[%c0_69, %c0_70, %c0_71] : memref<2x1x32xf32, #tpu.memory_space<vmem>>, vector<1x1x32xf32>
    %156 = vector.shape_cast %155 : vector<1x1x32xf32> to vector<1x32xf32>
    %157 = vector.extract_strided_slice %143 {offsets = [0, 0], sizes = [8, 8], strides = [1, 1]} : vector<8x32xf32> to vector<8x8xf32>
    %158 = vector.extract_strided_slice %143 {offsets = [0, 8], sizes = [8, 8], strides = [1, 1]} : vector<8x32xf32> to vector<8x8xf32>
    %159 = vector.extract_strided_slice %143 {offsets = [0, 16], sizes = [8, 8], strides = [1, 1]} : vector<8x32xf32> to vector<8x8xf32>
    %160 = vector.extract_strided_slice %143 {offsets = [0, 24], sizes = [8, 8], strides = [1, 1]} : vector<8x32xf32> to vector<8x8xf32>
    %161 = vector.shape_cast %157 : vector<8x8xf32> to vector<1x8x8xf32>
    %162 = vector.shape_cast %158 : vector<8x8xf32> to vector<1x8x8xf32>
    %163 = vector.shape_cast %159 : vector<8x8xf32> to vector<1x8x8xf32>
    %164 = vector.shape_cast %160 : vector<8x8xf32> to vector<1x8x8xf32>
    %165 = tpu.concatenate %161, %162, %163, %164 in 0 : vector<1x8x8xf32>, vector<1x8x8xf32>, vector<1x8x8xf32>, vector<1x8x8xf32> -> vector<4x8x8xf32>
    %166 = vector.extract_strided_slice %151 {offsets = [0, 0], sizes = [8, 8], strides = [1, 1]} : vector<8x32xf32> to vector<8x8xf32>
    %167 = vector.extract_strided_slice %151 {offsets = [0, 8], sizes = [8, 8], strides = [1, 1]} : vector<8x32xf32> to vector<8x8xf32>
    %168 = vector.extract_strided_slice %151 {offsets = [0, 16], sizes = [8, 8], strides = [1, 1]} : vector<8x32xf32> to vector<8x8xf32>
    %169 = vector.extract_strided_slice %151 {offsets = [0, 24], sizes = [8, 8], strides = [1, 1]} : vector<8x32xf32> to vector<8x8xf32>
    %170 = vector.shape_cast %166 : vector<8x8xf32> to vector<1x8x8xf32>
    %171 = vector.shape_cast %167 : vector<8x8xf32> to vector<1x8x8xf32>
    %172 = vector.shape_cast %168 : vector<8x8xf32> to vector<1x8x8xf32>
    %173 = vector.shape_cast %169 : vector<8x8xf32> to vector<1x8x8xf32>
    %174 = tpu.concatenate %170, %171, %172, %173 in 0 : vector<1x8x8xf32>, vector<1x8x8xf32>, vector<1x8x8xf32>, vector<1x8x8xf32> -> vector<4x8x8xf32>
    %175 = vector.extract_strided_slice %152 {offsets = [0, 0], sizes = [8, 8], strides = [1, 1]} : vector<8x32xf32> to vector<8x8xf32>
    %176 = vector.extract_strided_slice %152 {offsets = [0, 8], sizes = [8, 8], strides = [1, 1]} : vector<8x32xf32> to vector<8x8xf32>
    %177 = vector.extract_strided_slice %152 {offsets = [0, 16], sizes = [8, 8], strides = [1, 1]} : vector<8x32xf32> to vector<8x8xf32>
    %178 = vector.extract_strided_slice %152 {offsets = [0, 24], sizes = [8, 8], strides = [1, 1]} : vector<8x32xf32> to vector<8x8xf32>
    %179 = vector.shape_cast %175 : vector<8x8xf32> to vector<1x8x8xf32>
    %180 = vector.shape_cast %176 : vector<8x8xf32> to vector<1x8x8xf32>
    %181 = vector.shape_cast %177 : vector<8x8xf32> to vector<1x8x8xf32>
    %182 = vector.shape_cast %178 : vector<8x8xf32> to vector<1x8x8xf32>
    %183 = tpu.concatenate %179, %180, %181, %182 in 0 : vector<1x8x8xf32>, vector<1x8x8xf32>, vector<1x8x8xf32>, vector<1x8x8xf32> -> vector<4x8x8xf32>
    "tpu.trace_start"() <{level = 10 : i32, message = "hqd,hkd->hqk"}> : () -> ()
    %cst_72 = arith.constant dense<0.000000e+00> : vector<4x8x8xf32>
    %184 = tpu.matmul %165, %174, %cst_72 {dimension_numbers = #tpu.dot_dimension_numbers<[2], [2], [1], [1], [0, 0, 0, 1, 1, 1], [0], [0]>} : vector<4x8x8xf32>, vector<4x8x8xf32>, vector<4x8x8xf32> -> vector<4x8x8xf32>
    "tpu.trace_stop"() : () -> ()
    %185 = vector.shape_cast %49 : vector<1x8xf32> to vector<1x1x8xf32>
    %186 = vector.broadcast %185 : vector<1x1x8xf32> to vector<4x8x8xf32>
    %187 = arith.addf %184, %186 : vector<4x8x8xf32>
    %cst_73 = arith.constant dense<0xFF800000> : vector<4x8xf32>
    %188 = vector.multi_reduction <maximumf>, %187, %cst_73 [2] : vector<4x8x8xf32> to vector<4x8xf32>
    %189 = vector.shape_cast %188 : vector<4x8xf32> to vector<4x8x1xf32>
    %190 = vector.broadcast %189 : vector<4x8x1xf32> to vector<4x8x8xf32>
    %191 = arith.subf %187, %190 : vector<4x8x8xf32>
    %192 = math.exp %191 : vector<4x8x8xf32>
    %cst_74 = arith.constant dense<0.000000e+00> : vector<4x8xf32>
    %193 = vector.multi_reduction <add>, %192, %cst_74 [2] : vector<4x8x8xf32> to vector<4x8xf32>
    %194 = vector.shape_cast %193 : vector<4x8xf32> to vector<4x8x1xf32>
    %195 = tpu.reciprocal %194 {approx = true} : vector<4x8x1xf32> -> vector<4x8x1xf32>
    %196 = vector.broadcast %195 : vector<4x8x1xf32> to vector<4x8x8xf32>
    %197 = arith.mulf %192, %196 : vector<4x8x8xf32>
    "tpu.trace_start"() <{level = 10 : i32, message = "hqk,hkd->hqd"}> : () -> ()
    %cst_75 = arith.constant dense<0.000000e+00> : vector<4x8x8xf32>
    %198 = tpu.matmul %197, %183, %cst_75 {dimension_numbers = #tpu.dot_dimension_numbers<[2], [1], [1], [2], [0, 0, 0, 1, 1, 2], [0], [0]>} : vector<4x8x8xf32>, vector<4x8x8xf32>, vector<4x8x8xf32> -> vector<4x8x8xf32>
    "tpu.trace_stop"() : () -> ()
    "tpu.trace_start"() <{level = 10 : i32, message = "hqd,hde->hqe"}> : () -> ()
    %cst_76 = arith.constant dense<0.000000e+00> : vector<4x8x32xf32>
    %199 = tpu.matmul %198, %154, %cst_76 {dimension_numbers = #tpu.dot_dimension_numbers<[2], [1], [1], [2], [0, 0, 0, 1, 1, 2], [0], [0]>} : vector<4x8x8xf32>, vector<4x8x32xf32>, vector<4x8x32xf32> -> vector<4x8x32xf32>
    "tpu.trace_stop"() : () -> ()
    %cst_77 = arith.constant dense<0.000000e+00> : vector<8x32xf32>
    %200 = vector.multi_reduction <add>, %199, %cst_77 [0] : vector<4x8x32xf32> to vector<8x32xf32>
    %201 = vector.broadcast %156 : vector<1x32xf32> to vector<8x32xf32>
    %202 = arith.addf %200, %201 : vector<8x32xf32>
    %203 = arith.addf %202, %136 : vector<8x32xf32>
    %c0_78 = arith.constant 0 : index
    %c0_79 = arith.constant 0 : index
    %c0_80 = arith.constant 0 : index
    %204 = vector.load %arg19[%c0_78, %c0_79, %c0_80] : memref<2x1x32xf32, #tpu.memory_space<vmem>>, vector<1x1x32xf32>
    %205 = vector.shape_cast %204 : vector<1x1x32xf32> to vector<1x32xf32>
    %c0_81 = arith.constant 0 : index
    %c0_82 = arith.constant 0 : index
    %c0_83 = arith.constant 0 : index
    %206 = vector.load %arg20[%c0_81, %c0_82, %c0_83] : memref<2x1x32xf32, #tpu.memory_space<vmem>>, vector<1x1x32xf32>
    %207 = vector.shape_cast %206 : vector<1x1x32xf32> to vector<1x32xf32>
    %cst_84 = arith.constant dense<0.000000e+00> : vector<8xf32>
    %208 = vector.multi_reduction <add>, %203, %cst_84 [1] : vector<8x32xf32> to vector<8xf32>
    %209 = vector.shape_cast %208 : vector<8xf32> to vector<8x1xf32>
    %cst_85 = arith.constant 3.200000e+01 : f32
    %210 = vector.broadcast %cst_85 : f32 to vector<8x1xf32>
    %211 = arith.divf %209, %210 : vector<8x1xf32>
    %212 = vector.broadcast %211 : vector<8x1xf32> to vector<8x32xf32>
    %213 = arith.subf %203, %212 : vector<8x32xf32>
    %214 = arith.mulf %213, %213 : vector<8x32xf32>
    %cst_86 = arith.constant dense<0.000000e+00> : vector<8xf32>
    %215 = vector.multi_reduction <add>, %214, %cst_86 [1] : vector<8x32xf32> to vector<8xf32>
    %216 = vector.shape_cast %215 : vector<8xf32> to vector<8x1xf32>
    %cst_87 = arith.constant 3.200000e+01 : f32
    %217 = vector.broadcast %cst_87 : f32 to vector<8x1xf32>
    %218 = arith.divf %216, %217 : vector<8x1xf32>
    %219 = vector.broadcast %211 : vector<8x1xf32> to vector<8x32xf32>
    %220 = arith.subf %203, %219 : vector<8x32xf32>
    %cst_88 = arith.constant 9.99999974E-6 : f32
    %221 = vector.broadcast %cst_88 : f32 to vector<8x1xf32>
    %222 = arith.addf %218, %221 : vector<8x1xf32>
    %223 = math.rsqrt %222 : vector<8x1xf32>
    %224 = vector.broadcast %223 : vector<8x1xf32> to vector<8x32xf32>
    %225 = arith.mulf %220, %224 : vector<8x32xf32>
    %226 = vector.broadcast %205 : vector<1x32xf32> to vector<8x32xf32>
    %227 = arith.mulf %225, %226 : vector<8x32xf32>
    %228 = vector.broadcast %207 : vector<1x32xf32> to vector<8x32xf32>
    %229 = arith.addf %227, %228 : vector<8x32xf32>
    %c0_89 = arith.constant 0 : index
    %c0_90 = arith.constant 0 : index
    %c0_91 = arith.constant 0 : index
    %230 = vector.load %arg23[%c0_89, %c0_90, %c0_91] : memref<2x32x128xf32, #tpu.memory_space<vmem>>, vector<1x32x128xf32>
    %231 = vector.shape_cast %230 : vector<1x32x128xf32> to vector<32x128xf32>
    %cst_92 = arith.constant dense<0.000000e+00> : vector<8x128xf32>
    %232 = tpu.matmul %229, %231, %cst_92 {dimension_numbers = #tpu.dot_dimension_numbers<[1], [0], [0], [1], [0, 0, 1, 1], [], []>} : vector<8x32xf32>, vector<32x128xf32>, vector<8x128xf32> -> vector<8x128xf32>
    %c0_93 = arith.constant 0 : index
    %c0_94 = arith.constant 0 : index
    %c0_95 = arith.constant 0 : index
    %233 = vector.load %arg24[%c0_93, %c0_94, %c0_95] : memref<2x1x128xf32, #tpu.memory_space<vmem>>, vector<1x1x128xf32>
    %234 = vector.shape_cast %233 : vector<1x1x128xf32> to vector<1x128xf32>
    %235 = vector.broadcast %234 : vector<1x128xf32> to vector<8x128xf32>
    %236 = arith.addf %232, %235 : vector<8x128xf32>
    %cst_96 = arith.constant 0.000000e+00 : f32
    %237 = vector.broadcast %cst_96 : f32 to vector<8x128xf32>
    %238 = arith.maximumf %236, %237 : vector<8x128xf32>
    %c0_97 = arith.constant 0 : index
    %c0_98 = arith.constant 0 : index
    %c0_99 = arith.constant 0 : index
    %239 = vector.load %arg25[%c0_97, %c0_98, %c0_99] : memref<2x128x32xf32, #tpu.memory_space<vmem>>, vector<1x128x32xf32>
    %240 = vector.shape_cast %239 : vector<1x128x32xf32> to vector<128x32xf32>
    %cst_100 = arith.constant dense<0.000000e+00> : vector<8x32xf32>
    %241 = tpu.matmul %238, %240, %cst_100 {dimension_numbers = #tpu.dot_dimension_numbers<[1], [0], [0], [1], [0, 0, 1, 1], [], []>} : vector<8x128xf32>, vector<128x32xf32>, vector<8x32xf32> -> vector<8x32xf32>
    %c0_101 = arith.constant 0 : index
    %c0_102 = arith.constant 0 : index
    %c0_103 = arith.constant 0 : index
    %242 = vector.load %arg26[%c0_101, %c0_102, %c0_103] : memref<2x1x32xf32, #tpu.memory_space<vmem>>, vector<1x1x32xf32>
    %243 = vector.shape_cast %242 : vector<1x1x32xf32> to vector<1x32xf32>
    %244 = vector.broadcast %243 : vector<1x32xf32> to vector<8x32xf32>
    %245 = arith.addf %241, %244 : vector<8x32xf32>
    %246 = arith.addf %245, %229 : vector<8x32xf32>
    %c0_104 = arith.constant 0 : index
    %c0_105 = arith.constant 0 : index
    %c0_106 = arith.constant 0 : index
    %247 = vector.load %arg21[%c0_104, %c0_105, %c0_106] : memref<2x1x32xf32, #tpu.memory_space<vmem>>, vector<1x1x32xf32>
    %248 = vector.shape_cast %247 : vector<1x1x32xf32> to vector<1x32xf32>
    %c0_107 = arith.constant 0 : index
    %c0_108 = arith.constant 0 : index
    %c0_109 = arith.constant 0 : index
    %249 = vector.load %arg22[%c0_107, %c0_108, %c0_109] : memref<2x1x32xf32, #tpu.memory_space<vmem>>, vector<1x1x32xf32>
    %250 = vector.shape_cast %249 : vector<1x1x32xf32> to vector<1x32xf32>
    %cst_110 = arith.constant dense<0.000000e+00> : vector<8xf32>
    %251 = vector.multi_reduction <add>, %246, %cst_110 [1] : vector<8x32xf32> to vector<8xf32>
    %252 = vector.shape_cast %251 : vector<8xf32> to vector<8x1xf32>
    %cst_111 = arith.constant 3.200000e+01 : f32
    %253 = vector.broadcast %cst_111 : f32 to vector<8x1xf32>
    %254 = arith.divf %252, %253 : vector<8x1xf32>
    %255 = vector.broadcast %254 : vector<8x1xf32> to vector<8x32xf32>
    %256 = arith.subf %246, %255 : vector<8x32xf32>
    %257 = arith.mulf %256, %256 : vector<8x32xf32>
    %cst_112 = arith.constant dense<0.000000e+00> : vector<8xf32>
    %258 = vector.multi_reduction <add>, %257, %cst_112 [1] : vector<8x32xf32> to vector<8xf32>
    %259 = vector.shape_cast %258 : vector<8xf32> to vector<8x1xf32>
    %cst_113 = arith.constant 3.200000e+01 : f32
    %260 = vector.broadcast %cst_113 : f32 to vector<8x1xf32>
    %261 = arith.divf %259, %260 : vector<8x1xf32>
    %262 = vector.broadcast %254 : vector<8x1xf32> to vector<8x32xf32>
    %263 = arith.subf %246, %262 : vector<8x32xf32>
    %cst_114 = arith.constant 9.99999974E-6 : f32
    %264 = vector.broadcast %cst_114 : f32 to vector<8x1xf32>
    %265 = arith.addf %261, %264 : vector<8x1xf32>
    %266 = math.rsqrt %265 : vector<8x1xf32>
    %267 = vector.broadcast %266 : vector<8x1xf32> to vector<8x32xf32>
    %268 = arith.mulf %263, %267 : vector<8x32xf32>
    %269 = vector.broadcast %248 : vector<1x32xf32> to vector<8x32xf32>
    %270 = arith.mulf %268, %269 : vector<8x32xf32>
    %271 = vector.broadcast %250 : vector<1x32xf32> to vector<8x32xf32>
    %272 = arith.addf %270, %271 : vector<8x32xf32>
    %c1_115 = arith.constant 1 : index
    %c0_116 = arith.constant 0 : index
    %c0_117 = arith.constant 0 : index
    %273 = vector.load %arg7[%c1_115, %c0_116, %c0_117] : memref<2x32x96xf32, #tpu.memory_space<vmem>>, vector<1x32x96xf32>
    %274 = vector.shape_cast %273 : vector<1x32x96xf32> to vector<32x96xf32>
    %cst_118 = arith.constant dense<0.000000e+00> : vector<8x96xf32>
    %275 = tpu.matmul %272, %274, %cst_118 {dimension_numbers = #tpu.dot_dimension_numbers<[1], [0], [0], [1], [0, 0, 1, 1], [], []>} : vector<8x32xf32>, vector<32x96xf32>, vector<8x96xf32> -> vector<8x96xf32>
    %c1_119 = arith.constant 1 : index
    %c0_120 = arith.constant 0 : index
    %c0_121 = arith.constant 0 : index
    %276 = vector.load %arg8[%c1_119, %c0_120, %c0_121] : memref<2x1x96xf32, #tpu.memory_space<vmem>>, vector<1x1x96xf32>
    %277 = vector.shape_cast %276 : vector<1x1x96xf32> to vector<1x96xf32>
    %278 = vector.broadcast %277 : vector<1x96xf32> to vector<8x96xf32>
    %279 = arith.addf %275, %278 : vector<8x96xf32>
    %280 = vector.extract_strided_slice %279 {offsets = [0, 0], sizes = [8, 32], strides = [1, 1]} : vector<8x96xf32> to vector<8x32xf32>
    %281 = vector.extract_strided_slice %279 {offsets = [0, 32], sizes = [8, 32], strides = [1, 1]} : vector<8x96xf32> to vector<8x32xf32>
    %282 = vector.extract_strided_slice %279 {offsets = [0, 64], sizes = [8, 32], strides = [1, 1]} : vector<8x96xf32> to vector<8x32xf32>
    %c1_122 = arith.constant 1 : index
    %c0_123 = arith.constant 0 : index
    %c0_124 = arith.constant 0 : index
    %c0_125 = arith.constant 0 : index
    %283 = vector.load %arg9[%c1_122, %c0_123, %c0_124, %c0_125] : memref<2x4x8x32xf32, #tpu.memory_space<vmem>>, vector<1x4x8x32xf32>
    %284 = vector.shape_cast %283 : vector<1x4x8x32xf32> to vector<4x8x32xf32>
    %c1_126 = arith.constant 1 : index
    %c0_127 = arith.constant 0 : index
    %c0_128 = arith.constant 0 : index
    %285 = vector.load %arg10[%c1_126, %c0_127, %c0_128] : memref<2x1x32xf32, #tpu.memory_space<vmem>>, vector<1x1x32xf32>
    %286 = vector.shape_cast %285 : vector<1x1x32xf32> to vector<1x32xf32>
    %287 = vector.extract_strided_slice %280 {offsets = [0, 0], sizes = [8, 8], strides = [1, 1]} : vector<8x32xf32> to vector<8x8xf32>
    %288 = vector.extract_strided_slice %280 {offsets = [0, 8], sizes = [8, 8], strides = [1, 1]} : vector<8x32xf32> to vector<8x8xf32>
    %289 = vector.extract_strided_slice %280 {offsets = [0, 16], sizes = [8, 8], strides = [1, 1]} : vector<8x32xf32> to vector<8x8xf32>
    %290 = vector.extract_strided_slice %280 {offsets = [0, 24], sizes = [8, 8], strides = [1, 1]} : vector<8x32xf32> to vector<8x8xf32>
    %291 = vector.shape_cast %287 : vector<8x8xf32> to vector<1x8x8xf32>
    %292 = vector.shape_cast %288 : vector<8x8xf32> to vector<1x8x8xf32>
    %293 = vector.shape_cast %289 : vector<8x8xf32> to vector<1x8x8xf32>
    %294 = vector.shape_cast %290 : vector<8x8xf32> to vector<1x8x8xf32>
    %295 = tpu.concatenate %291, %292, %293, %294 in 0 : vector<1x8x8xf32>, vector<1x8x8xf32>, vector<1x8x8xf32>, vector<1x8x8xf32> -> vector<4x8x8xf32>
    %296 = vector.extract_strided_slice %281 {offsets = [0, 0], sizes = [8, 8], strides = [1, 1]} : vector<8x32xf32> to vector<8x8xf32>
    %297 = vector.extract_strided_slice %281 {offsets = [0, 8], sizes = [8, 8], strides = [1, 1]} : vector<8x32xf32> to vector<8x8xf32>
    %298 = vector.extract_strided_slice %281 {offsets = [0, 16], sizes = [8, 8], strides = [1, 1]} : vector<8x32xf32> to vector<8x8xf32>
    %299 = vector.extract_strided_slice %281 {offsets = [0, 24], sizes = [8, 8], strides = [1, 1]} : vector<8x32xf32> to vector<8x8xf32>
    %300 = vector.shape_cast %296 : vector<8x8xf32> to vector<1x8x8xf32>
    %301 = vector.shape_cast %297 : vector<8x8xf32> to vector<1x8x8xf32>
    %302 = vector.shape_cast %298 : vector<8x8xf32> to vector<1x8x8xf32>
    %303 = vector.shape_cast %299 : vector<8x8xf32> to vector<1x8x8xf32>
    %304 = tpu.concatenate %300, %301, %302, %303 in 0 : vector<1x8x8xf32>, vector<1x8x8xf32>, vector<1x8x8xf32>, vector<1x8x8xf32> -> vector<4x8x8xf32>
    %305 = vector.extract_strided_slice %282 {offsets = [0, 0], sizes = [8, 8], strides = [1, 1]} : vector<8x32xf32> to vector<8x8xf32>
    %306 = vector.extract_strided_slice %282 {offsets = [0, 8], sizes = [8, 8], strides = [1, 1]} : vector<8x32xf32> to vector<8x8xf32>
    %307 = vector.extract_strided_slice %282 {offsets = [0, 16], sizes = [8, 8], strides = [1, 1]} : vector<8x32xf32> to vector<8x8xf32>
    %308 = vector.extract_strided_slice %282 {offsets = [0, 24], sizes = [8, 8], strides = [1, 1]} : vector<8x32xf32> to vector<8x8xf32>
    %309 = vector.shape_cast %305 : vector<8x8xf32> to vector<1x8x8xf32>
    %310 = vector.shape_cast %306 : vector<8x8xf32> to vector<1x8x8xf32>
    %311 = vector.shape_cast %307 : vector<8x8xf32> to vector<1x8x8xf32>
    %312 = vector.shape_cast %308 : vector<8x8xf32> to vector<1x8x8xf32>
    %313 = tpu.concatenate %309, %310, %311, %312 in 0 : vector<1x8x8xf32>, vector<1x8x8xf32>, vector<1x8x8xf32>, vector<1x8x8xf32> -> vector<4x8x8xf32>
    "tpu.trace_start"() <{level = 10 : i32, message = "hqd,hkd->hqk"}> : () -> ()
    %cst_129 = arith.constant dense<0.000000e+00> : vector<4x8x8xf32>
    %314 = tpu.matmul %295, %304, %cst_129 {dimension_numbers = #tpu.dot_dimension_numbers<[2], [2], [1], [1], [0, 0, 0, 1, 1, 1], [0], [0]>} : vector<4x8x8xf32>, vector<4x8x8xf32>, vector<4x8x8xf32> -> vector<4x8x8xf32>
    "tpu.trace_stop"() : () -> ()
    %315 = vector.shape_cast %0 : vector<8x8xf32> to vector<1x8x8xf32>
    %316 = vector.broadcast %315 : vector<1x8x8xf32> to vector<4x8x8xf32>
    %317 = arith.addf %314, %316 : vector<4x8x8xf32>
    %cst_130 = arith.constant dense<0xFF800000> : vector<4x8xf32>
    %318 = vector.multi_reduction <maximumf>, %317, %cst_130 [2] : vector<4x8x8xf32> to vector<4x8xf32>
    %319 = vector.shape_cast %318 : vector<4x8xf32> to vector<4x8x1xf32>
    %320 = vector.broadcast %319 : vector<4x8x1xf32> to vector<4x8x8xf32>
    %321 = arith.subf %317, %320 : vector<4x8x8xf32>
    %322 = math.exp %321 : vector<4x8x8xf32>
    %cst_131 = arith.constant dense<0.000000e+00> : vector<4x8xf32>
    %323 = vector.multi_reduction <add>, %322, %cst_131 [2] : vector<4x8x8xf32> to vector<4x8xf32>
    %324 = vector.shape_cast %323 : vector<4x8xf32> to vector<4x8x1xf32>
    %325 = tpu.reciprocal %324 {approx = true} : vector<4x8x1xf32> -> vector<4x8x1xf32>
    %326 = vector.broadcast %325 : vector<4x8x1xf32> to vector<4x8x8xf32>
    %327 = arith.mulf %322, %326 : vector<4x8x8xf32>
    "tpu.trace_start"() <{level = 10 : i32, message = "hqk,hkd->hqd"}> : () -> ()
    %cst_132 = arith.constant dense<0.000000e+00> : vector<4x8x8xf32>
    %328 = tpu.matmul %327, %313, %cst_132 {dimension_numbers = #tpu.dot_dimension_numbers<[2], [1], [1], [2], [0, 0, 0, 1, 1, 2], [0], [0]>} : vector<4x8x8xf32>, vector<4x8x8xf32>, vector<4x8x8xf32> -> vector<4x8x8xf32>
    "tpu.trace_stop"() : () -> ()
    "tpu.trace_start"() <{level = 10 : i32, message = "hqd,hde->hqe"}> : () -> ()
    %cst_133 = arith.constant dense<0.000000e+00> : vector<4x8x32xf32>
    %329 = tpu.matmul %328, %284, %cst_133 {dimension_numbers = #tpu.dot_dimension_numbers<[2], [1], [1], [2], [0, 0, 0, 1, 1, 2], [0], [0]>} : vector<4x8x8xf32>, vector<4x8x32xf32>, vector<4x8x32xf32> -> vector<4x8x32xf32>
    "tpu.trace_stop"() : () -> ()
    %cst_134 = arith.constant dense<0.000000e+00> : vector<8x32xf32>
    %330 = vector.multi_reduction <add>, %329, %cst_134 [0] : vector<4x8x32xf32> to vector<8x32xf32>
    %331 = vector.broadcast %286 : vector<1x32xf32> to vector<8x32xf32>
    %332 = arith.addf %330, %331 : vector<8x32xf32>
    %333 = arith.addf %332, %272 : vector<8x32xf32>
    %c1_135 = arith.constant 1 : index
    %c0_136 = arith.constant 0 : index
    %c0_137 = arith.constant 0 : index
    %334 = vector.load %arg11[%c1_135, %c0_136, %c0_137] : memref<2x1x32xf32, #tpu.memory_space<vmem>>, vector<1x1x32xf32>
    %335 = vector.shape_cast %334 : vector<1x1x32xf32> to vector<1x32xf32>
    %c1_138 = arith.constant 1 : index
    %c0_139 = arith.constant 0 : index
    %c0_140 = arith.constant 0 : index
    %336 = vector.load %arg12[%c1_138, %c0_139, %c0_140] : memref<2x1x32xf32, #tpu.memory_space<vmem>>, vector<1x1x32xf32>
    %337 = vector.shape_cast %336 : vector<1x1x32xf32> to vector<1x32xf32>
    %cst_141 = arith.constant dense<0.000000e+00> : vector<8xf32>
    %338 = vector.multi_reduction <add>, %333, %cst_141 [1] : vector<8x32xf32> to vector<8xf32>
    %339 = vector.shape_cast %338 : vector<8xf32> to vector<8x1xf32>
    %cst_142 = arith.constant 3.200000e+01 : f32
    %340 = vector.broadcast %cst_142 : f32 to vector<8x1xf32>
    %341 = arith.divf %339, %340 : vector<8x1xf32>
    %342 = vector.broadcast %341 : vector<8x1xf32> to vector<8x32xf32>
    %343 = arith.subf %333, %342 : vector<8x32xf32>
    %344 = arith.mulf %343, %343 : vector<8x32xf32>
    %cst_143 = arith.constant dense<0.000000e+00> : vector<8xf32>
    %345 = vector.multi_reduction <add>, %344, %cst_143 [1] : vector<8x32xf32> to vector<8xf32>
    %346 = vector.shape_cast %345 : vector<8xf32> to vector<8x1xf32>
    %cst_144 = arith.constant 3.200000e+01 : f32
    %347 = vector.broadcast %cst_144 : f32 to vector<8x1xf32>
    %348 = arith.divf %346, %347 : vector<8x1xf32>
    %349 = vector.broadcast %341 : vector<8x1xf32> to vector<8x32xf32>
    %350 = arith.subf %333, %349 : vector<8x32xf32>
    %cst_145 = arith.constant 9.99999974E-6 : f32
    %351 = vector.broadcast %cst_145 : f32 to vector<8x1xf32>
    %352 = arith.addf %348, %351 : vector<8x1xf32>
    %353 = math.rsqrt %352 : vector<8x1xf32>
    %354 = vector.broadcast %353 : vector<8x1xf32> to vector<8x32xf32>
    %355 = arith.mulf %350, %354 : vector<8x32xf32>
    %356 = vector.broadcast %335 : vector<1x32xf32> to vector<8x32xf32>
    %357 = arith.mulf %355, %356 : vector<8x32xf32>
    %358 = vector.broadcast %337 : vector<1x32xf32> to vector<8x32xf32>
    %359 = arith.addf %357, %358 : vector<8x32xf32>
    %c1_146 = arith.constant 1 : index
    %c0_147 = arith.constant 0 : index
    %c0_148 = arith.constant 0 : index
    %360 = vector.load %arg13[%c1_146, %c0_147, %c0_148] : memref<2x32x32xf32, #tpu.memory_space<vmem>>, vector<1x32x32xf32>
    %361 = vector.shape_cast %360 : vector<1x32x32xf32> to vector<32x32xf32>
    %cst_149 = arith.constant dense<0.000000e+00> : vector<8x32xf32>
    %362 = tpu.matmul %359, %361, %cst_149 {dimension_numbers = #tpu.dot_dimension_numbers<[1], [0], [0], [1], [0, 0, 1, 1], [], []>} : vector<8x32xf32>, vector<32x32xf32>, vector<8x32xf32> -> vector<8x32xf32>
    %c1_150 = arith.constant 1 : index
    %c0_151 = arith.constant 0 : index
    %c0_152 = arith.constant 0 : index
    %363 = vector.load %arg14[%c1_150, %c0_151, %c0_152] : memref<2x1x32xf32, #tpu.memory_space<vmem>>, vector<1x1x32xf32>
    %364 = vector.shape_cast %363 : vector<1x1x32xf32> to vector<1x32xf32>
    %365 = vector.broadcast %364 : vector<1x32xf32> to vector<8x32xf32>
    %366 = arith.addf %362, %365 : vector<8x32xf32>
    %c1_153 = arith.constant 1 : index
    %c0_154 = arith.constant 0 : index
    %c0_155 = arith.constant 0 : index
    %367 = vector.load %arg15[%c1_153, %c0_154, %c0_155] : memref<2x32x64xf32, #tpu.memory_space<vmem>>, vector<1x32x64xf32>
    %368 = vector.shape_cast %367 : vector<1x32x64xf32> to vector<32x64xf32>
    %cst_156 = arith.constant dense<0.000000e+00> : vector<8x64xf32>
    %369 = tpu.matmul %47, %368, %cst_156 {dimension_numbers = #tpu.dot_dimension_numbers<[1], [0], [0], [1], [0, 0, 1, 1], [], []>} : vector<8x32xf32>, vector<32x64xf32>, vector<8x64xf32> -> vector<8x64xf32>
    %c1_157 = arith.constant 1 : index
    %c0_158 = arith.constant 0 : index
    %c0_159 = arith.constant 0 : index
    %370 = vector.load %arg16[%c1_157, %c0_158, %c0_159] : memref<2x1x64xf32, #tpu.memory_space<vmem>>, vector<1x1x64xf32>
    %371 = vector.shape_cast %370 : vector<1x1x64xf32> to vector<1x64xf32>
    %372 = vector.broadcast %371 : vector<1x64xf32> to vector<8x64xf32>
    %373 = arith.addf %369, %372 : vector<8x64xf32>
    %374 = vector.extract_strided_slice %373 {offsets = [0, 0], sizes = [8, 32], strides = [1, 1]} : vector<8x64xf32> to vector<8x32xf32>
    %375 = vector.extract_strided_slice %373 {offsets = [0, 32], sizes = [8, 32], strides = [1, 1]} : vector<8x64xf32> to vector<8x32xf32>
    %c1_160 = arith.constant 1 : index
    %c0_161 = arith.constant 0 : index
    %c0_162 = arith.constant 0 : index
    %c0_163 = arith.constant 0 : index
    %376 = vector.load %arg17[%c1_160, %c0_161, %c0_162, %c0_163] : memref<2x4x8x32xf32, #tpu.memory_space<vmem>>, vector<1x4x8x32xf32>
    %377 = vector.shape_cast %376 : vector<1x4x8x32xf32> to vector<4x8x32xf32>
    %c1_164 = arith.constant 1 : index
    %c0_165 = arith.constant 0 : index
    %c0_166 = arith.constant 0 : index
    %378 = vector.load %arg18[%c1_164, %c0_165, %c0_166] : memref<2x1x32xf32, #tpu.memory_space<vmem>>, vector<1x1x32xf32>
    %379 = vector.shape_cast %378 : vector<1x1x32xf32> to vector<1x32xf32>
    %380 = vector.extract_strided_slice %366 {offsets = [0, 0], sizes = [8, 8], strides = [1, 1]} : vector<8x32xf32> to vector<8x8xf32>
    %381 = vector.extract_strided_slice %366 {offsets = [0, 8], sizes = [8, 8], strides = [1, 1]} : vector<8x32xf32> to vector<8x8xf32>
    %382 = vector.extract_strided_slice %366 {offsets = [0, 16], sizes = [8, 8], strides = [1, 1]} : vector<8x32xf32> to vector<8x8xf32>
    %383 = vector.extract_strided_slice %366 {offsets = [0, 24], sizes = [8, 8], strides = [1, 1]} : vector<8x32xf32> to vector<8x8xf32>
    %384 = vector.shape_cast %380 : vector<8x8xf32> to vector<1x8x8xf32>
    %385 = vector.shape_cast %381 : vector<8x8xf32> to vector<1x8x8xf32>
    %386 = vector.shape_cast %382 : vector<8x8xf32> to vector<1x8x8xf32>
    %387 = vector.shape_cast %383 : vector<8x8xf32> to vector<1x8x8xf32>
    %388 = tpu.concatenate %384, %385, %386, %387 in 0 : vector<1x8x8xf32>, vector<1x8x8xf32>, vector<1x8x8xf32>, vector<1x8x8xf32> -> vector<4x8x8xf32>
    %389 = vector.extract_strided_slice %374 {offsets = [0, 0], sizes = [8, 8], strides = [1, 1]} : vector<8x32xf32> to vector<8x8xf32>
    %390 = vector.extract_strided_slice %374 {offsets = [0, 8], sizes = [8, 8], strides = [1, 1]} : vector<8x32xf32> to vector<8x8xf32>
    %391 = vector.extract_strided_slice %374 {offsets = [0, 16], sizes = [8, 8], strides = [1, 1]} : vector<8x32xf32> to vector<8x8xf32>
    %392 = vector.extract_strided_slice %374 {offsets = [0, 24], sizes = [8, 8], strides = [1, 1]} : vector<8x32xf32> to vector<8x8xf32>
    %393 = vector.shape_cast %389 : vector<8x8xf32> to vector<1x8x8xf32>
    %394 = vector.shape_cast %390 : vector<8x8xf32> to vector<1x8x8xf32>
    %395 = vector.shape_cast %391 : vector<8x8xf32> to vector<1x8x8xf32>
    %396 = vector.shape_cast %392 : vector<8x8xf32> to vector<1x8x8xf32>
    %397 = tpu.concatenate %393, %394, %395, %396 in 0 : vector<1x8x8xf32>, vector<1x8x8xf32>, vector<1x8x8xf32>, vector<1x8x8xf32> -> vector<4x8x8xf32>
    %398 = vector.extract_strided_slice %375 {offsets = [0, 0], sizes = [8, 8], strides = [1, 1]} : vector<8x32xf32> to vector<8x8xf32>
    %399 = vector.extract_strided_slice %375 {offsets = [0, 8], sizes = [8, 8], strides = [1, 1]} : vector<8x32xf32> to vector<8x8xf32>
    %400 = vector.extract_strided_slice %375 {offsets = [0, 16], sizes = [8, 8], strides = [1, 1]} : vector<8x32xf32> to vector<8x8xf32>
    %401 = vector.extract_strided_slice %375 {offsets = [0, 24], sizes = [8, 8], strides = [1, 1]} : vector<8x32xf32> to vector<8x8xf32>
    %402 = vector.shape_cast %398 : vector<8x8xf32> to vector<1x8x8xf32>
    %403 = vector.shape_cast %399 : vector<8x8xf32> to vector<1x8x8xf32>
    %404 = vector.shape_cast %400 : vector<8x8xf32> to vector<1x8x8xf32>
    %405 = vector.shape_cast %401 : vector<8x8xf32> to vector<1x8x8xf32>
    %406 = tpu.concatenate %402, %403, %404, %405 in 0 : vector<1x8x8xf32>, vector<1x8x8xf32>, vector<1x8x8xf32>, vector<1x8x8xf32> -> vector<4x8x8xf32>
    "tpu.trace_start"() <{level = 10 : i32, message = "hqd,hkd->hqk"}> : () -> ()
    %cst_167 = arith.constant dense<0.000000e+00> : vector<4x8x8xf32>
    %407 = tpu.matmul %388, %397, %cst_167 {dimension_numbers = #tpu.dot_dimension_numbers<[2], [2], [1], [1], [0, 0, 0, 1, 1, 1], [0], [0]>} : vector<4x8x8xf32>, vector<4x8x8xf32>, vector<4x8x8xf32> -> vector<4x8x8xf32>
    "tpu.trace_stop"() : () -> ()
    %408 = vector.shape_cast %49 : vector<1x8xf32> to vector<1x1x8xf32>
    %409 = vector.broadcast %408 : vector<1x1x8xf32> to vector<4x8x8xf32>
    %410 = arith.addf %407, %409 : vector<4x8x8xf32>
    %cst_168 = arith.constant dense<0xFF800000> : vector<4x8xf32>
    %411 = vector.multi_reduction <maximumf>, %410, %cst_168 [2] : vector<4x8x8xf32> to vector<4x8xf32>
    %412 = vector.shape_cast %411 : vector<4x8xf32> to vector<4x8x1xf32>
    %413 = vector.broadcast %412 : vector<4x8x1xf32> to vector<4x8x8xf32>
    %414 = arith.subf %410, %413 : vector<4x8x8xf32>
    %415 = math.exp %414 : vector<4x8x8xf32>
    %cst_169 = arith.constant dense<0.000000e+00> : vector<4x8xf32>
    %416 = vector.multi_reduction <add>, %415, %cst_169 [2] : vector<4x8x8xf32> to vector<4x8xf32>
    %417 = vector.shape_cast %416 : vector<4x8xf32> to vector<4x8x1xf32>
    %418 = tpu.reciprocal %417 {approx = true} : vector<4x8x1xf32> -> vector<4x8x1xf32>
    %419 = vector.broadcast %418 : vector<4x8x1xf32> to vector<4x8x8xf32>
    %420 = arith.mulf %415, %419 : vector<4x8x8xf32>
    "tpu.trace_start"() <{level = 10 : i32, message = "hqk,hkd->hqd"}> : () -> ()
    %cst_170 = arith.constant dense<0.000000e+00> : vector<4x8x8xf32>
    %421 = tpu.matmul %420, %406, %cst_170 {dimension_numbers = #tpu.dot_dimension_numbers<[2], [1], [1], [2], [0, 0, 0, 1, 1, 2], [0], [0]>} : vector<4x8x8xf32>, vector<4x8x8xf32>, vector<4x8x8xf32> -> vector<4x8x8xf32>
    "tpu.trace_stop"() : () -> ()
    "tpu.trace_start"() <{level = 10 : i32, message = "hqd,hde->hqe"}> : () -> ()
    %cst_171 = arith.constant dense<0.000000e+00> : vector<4x8x32xf32>
    %422 = tpu.matmul %421, %377, %cst_171 {dimension_numbers = #tpu.dot_dimension_numbers<[2], [1], [1], [2], [0, 0, 0, 1, 1, 2], [0], [0]>} : vector<4x8x8xf32>, vector<4x8x32xf32>, vector<4x8x32xf32> -> vector<4x8x32xf32>
    "tpu.trace_stop"() : () -> ()
    %cst_172 = arith.constant dense<0.000000e+00> : vector<8x32xf32>
    %423 = vector.multi_reduction <add>, %422, %cst_172 [0] : vector<4x8x32xf32> to vector<8x32xf32>
    %424 = vector.broadcast %379 : vector<1x32xf32> to vector<8x32xf32>
    %425 = arith.addf %423, %424 : vector<8x32xf32>
    %426 = arith.addf %425, %359 : vector<8x32xf32>
    %c1_173 = arith.constant 1 : index
    %c0_174 = arith.constant 0 : index
    %c0_175 = arith.constant 0 : index
    %427 = vector.load %arg19[%c1_173, %c0_174, %c0_175] : memref<2x1x32xf32, #tpu.memory_space<vmem>>, vector<1x1x32xf32>
    %428 = vector.shape_cast %427 : vector<1x1x32xf32> to vector<1x32xf32>
    %c1_176 = arith.constant 1 : index
    %c0_177 = arith.constant 0 : index
    %c0_178 = arith.constant 0 : index
    %429 = vector.load %arg20[%c1_176, %c0_177, %c0_178] : memref<2x1x32xf32, #tpu.memory_space<vmem>>, vector<1x1x32xf32>
    %430 = vector.shape_cast %429 : vector<1x1x32xf32> to vector<1x32xf32>
    %cst_179 = arith.constant dense<0.000000e+00> : vector<8xf32>
    %431 = vector.multi_reduction <add>, %426, %cst_179 [1] : vector<8x32xf32> to vector<8xf32>
    %432 = vector.shape_cast %431 : vector<8xf32> to vector<8x1xf32>
    %cst_180 = arith.constant 3.200000e+01 : f32
    %433 = vector.broadcast %cst_180 : f32 to vector<8x1xf32>
    %434 = arith.divf %432, %433 : vector<8x1xf32>
    %435 = vector.broadcast %434 : vector<8x1xf32> to vector<8x32xf32>
    %436 = arith.subf %426, %435 : vector<8x32xf32>
    %437 = arith.mulf %436, %436 : vector<8x32xf32>
    %cst_181 = arith.constant dense<0.000000e+00> : vector<8xf32>
    %438 = vector.multi_reduction <add>, %437, %cst_181 [1] : vector<8x32xf32> to vector<8xf32>
    %439 = vector.shape_cast %438 : vector<8xf32> to vector<8x1xf32>
    %cst_182 = arith.constant 3.200000e+01 : f32
    %440 = vector.broadcast %cst_182 : f32 to vector<8x1xf32>
    %441 = arith.divf %439, %440 : vector<8x1xf32>
    %442 = vector.broadcast %434 : vector<8x1xf32> to vector<8x32xf32>
    %443 = arith.subf %426, %442 : vector<8x32xf32>
    %cst_183 = arith.constant 9.99999974E-6 : f32
    %444 = vector.broadcast %cst_183 : f32 to vector<8x1xf32>
    %445 = arith.addf %441, %444 : vector<8x1xf32>
    %446 = math.rsqrt %445 : vector<8x1xf32>
    %447 = vector.broadcast %446 : vector<8x1xf32> to vector<8x32xf32>
    %448 = arith.mulf %443, %447 : vector<8x32xf32>
    %449 = vector.broadcast %428 : vector<1x32xf32> to vector<8x32xf32>
    %450 = arith.mulf %448, %449 : vector<8x32xf32>
    %451 = vector.broadcast %430 : vector<1x32xf32> to vector<8x32xf32>
    %452 = arith.addf %450, %451 : vector<8x32xf32>
    %c1_184 = arith.constant 1 : index
    %c0_185 = arith.constant 0 : index
    %c0_186 = arith.constant 0 : index
    %453 = vector.load %arg23[%c1_184, %c0_185, %c0_186] : memref<2x32x128xf32, #tpu.memory_space<vmem>>, vector<1x32x128xf32>
    %454 = vector.shape_cast %453 : vector<1x32x128xf32> to vector<32x128xf32>
    %cst_187 = arith.constant dense<0.000000e+00> : vector<8x128xf32>
    %455 = tpu.matmul %452, %454, %cst_187 {dimension_numbers = #tpu.dot_dimension_numbers<[1], [0], [0], [1], [0, 0, 1, 1], [], []>} : vector<8x32xf32>, vector<32x128xf32>, vector<8x128xf32> -> vector<8x128xf32>
    %c1_188 = arith.constant 1 : index
    %c0_189 = arith.constant 0 : index
    %c0_190 = arith.constant 0 : index
    %456 = vector.load %arg24[%c1_188, %c0_189, %c0_190] : memref<2x1x128xf32, #tpu.memory_space<vmem>>, vector<1x1x128xf32>
    %457 = vector.shape_cast %456 : vector<1x1x128xf32> to vector<1x128xf32>
    %458 = vector.broadcast %457 : vector<1x128xf32> to vector<8x128xf32>
    %459 = arith.addf %455, %458 : vector<8x128xf32>
    %cst_191 = arith.constant 0.000000e+00 : f32
    %460 = vector.broadcast %cst_191 : f32 to vector<8x128xf32>
    %461 = arith.maximumf %459, %460 : vector<8x128xf32>
    %c1_192 = arith.constant 1 : index
    %c0_193 = arith.constant 0 : index
    %c0_194 = arith.constant 0 : index
    %462 = vector.load %arg25[%c1_192, %c0_193, %c0_194] : memref<2x128x32xf32, #tpu.memory_space<vmem>>, vector<1x128x32xf32>
    %463 = vector.shape_cast %462 : vector<1x128x32xf32> to vector<128x32xf32>
    %cst_195 = arith.constant dense<0.000000e+00> : vector<8x32xf32>
    %464 = tpu.matmul %461, %463, %cst_195 {dimension_numbers = #tpu.dot_dimension_numbers<[1], [0], [0], [1], [0, 0, 1, 1], [], []>} : vector<8x128xf32>, vector<128x32xf32>, vector<8x32xf32> -> vector<8x32xf32>
    %c1_196 = arith.constant 1 : index
    %c0_197 = arith.constant 0 : index
    %c0_198 = arith.constant 0 : index
    %465 = vector.load %arg26[%c1_196, %c0_197, %c0_198] : memref<2x1x32xf32, #tpu.memory_space<vmem>>, vector<1x1x32xf32>
    %466 = vector.shape_cast %465 : vector<1x1x32xf32> to vector<1x32xf32>
    %467 = vector.broadcast %466 : vector<1x32xf32> to vector<8x32xf32>
    %468 = arith.addf %464, %467 : vector<8x32xf32>
    %469 = arith.addf %468, %452 : vector<8x32xf32>
    %c1_199 = arith.constant 1 : index
    %c0_200 = arith.constant 0 : index
    %c0_201 = arith.constant 0 : index
    %470 = vector.load %arg21[%c1_199, %c0_200, %c0_201] : memref<2x1x32xf32, #tpu.memory_space<vmem>>, vector<1x1x32xf32>
    %471 = vector.shape_cast %470 : vector<1x1x32xf32> to vector<1x32xf32>
    %c1_202 = arith.constant 1 : index
    %c0_203 = arith.constant 0 : index
    %c0_204 = arith.constant 0 : index
    %472 = vector.load %arg22[%c1_202, %c0_203, %c0_204] : memref<2x1x32xf32, #tpu.memory_space<vmem>>, vector<1x1x32xf32>
    %473 = vector.shape_cast %472 : vector<1x1x32xf32> to vector<1x32xf32>
    %cst_205 = arith.constant dense<0.000000e+00> : vector<8xf32>
    %474 = vector.multi_reduction <add>, %469, %cst_205 [1] : vector<8x32xf32> to vector<8xf32>
    %475 = vector.shape_cast %474 : vector<8xf32> to vector<8x1xf32>
    %cst_206 = arith.constant 3.200000e+01 : f32
    %476 = vector.broadcast %cst_206 : f32 to vector<8x1xf32>
    %477 = arith.divf %475, %476 : vector<8x1xf32>
    %478 = vector.broadcast %477 : vector<8x1xf32> to vector<8x32xf32>
    %479 = arith.subf %469, %478 : vector<8x32xf32>
    %480 = arith.mulf %479, %479 : vector<8x32xf32>
    %cst_207 = arith.constant dense<0.000000e+00> : vector<8xf32>
    %481 = vector.multi_reduction <add>, %480, %cst_207 [1] : vector<8x32xf32> to vector<8xf32>
    %482 = vector.shape_cast %481 : vector<8xf32> to vector<8x1xf32>
    %cst_208 = arith.constant 3.200000e+01 : f32
    %483 = vector.broadcast %cst_208 : f32 to vector<8x1xf32>
    %484 = arith.divf %482, %483 : vector<8x1xf32>
    %485 = vector.broadcast %477 : vector<8x1xf32> to vector<8x32xf32>
    %486 = arith.subf %469, %485 : vector<8x32xf32>
    %cst_209 = arith.constant 9.99999974E-6 : f32
    %487 = vector.broadcast %cst_209 : f32 to vector<8x1xf32>
    %488 = arith.addf %484, %487 : vector<8x1xf32>
    %489 = math.rsqrt %488 : vector<8x1xf32>
    %490 = vector.broadcast %489 : vector<8x1xf32> to vector<8x32xf32>
    %491 = arith.mulf %486, %490 : vector<8x32xf32>
    %492 = vector.broadcast %471 : vector<1x32xf32> to vector<8x32xf32>
    %493 = arith.mulf %491, %492 : vector<8x32xf32>
    %494 = vector.broadcast %473 : vector<1x32xf32> to vector<8x32xf32>
    %495 = arith.addf %493, %494 : vector<8x32xf32>
    %c0_210 = arith.constant 0 : index
    %c0_211 = arith.constant 0 : index
    %496 = vector.load %arg27[%c0_210, %c0_211] : memref<32x128xf32, #tpu.memory_space<vmem>>, vector<32x128xf32>
    %cst_212 = arith.constant dense<0.000000e+00> : vector<8x128xf32>
    %497 = tpu.matmul %495, %496, %cst_212 {dimension_numbers = #tpu.dot_dimension_numbers<[1], [0], [0], [1], [0, 0, 1, 1], [], []>} : vector<8x32xf32>, vector<32x128xf32>, vector<8x128xf32> -> vector<8x128xf32>
    %c0_213 = arith.constant 0 : index
    %c0_214 = arith.constant 0 : index
    %498 = vector.load %arg28[%c0_213, %c0_214] : memref<1x128xf32, #tpu.memory_space<vmem>>, vector<1x128xf32>
    %499 = vector.broadcast %498 : vector<1x128xf32> to vector<8x128xf32>
    %500 = arith.addf %497, %499 : vector<8x128xf32>
    %c0_215 = arith.constant 0 : index
    %c0_216 = arith.constant 0 : index
    %c0_217 = arith.constant 0 : index
    %501 = vector.load %arg29[%c0_215, %c0_216, %c0_217] : memref<1x8x128xf32, #tpu.memory_space<vmem>>, vector<1x8x128xf32>
    %502 = vector.shape_cast %501 : vector<1x8x128xf32> to vector<8x128xf32>
    %503 = vector.shape_cast %500 : vector<8x128xf32> to vector<1x8x128xf32>
    tpu.vector_store %arg29[%c0_215, %c0_216, %c0_217], %503 {strides = array<i32>} : memref<1x8x128xf32, #tpu.memory_space<vmem>>, vector<1x8x128xf32>,
    return
  }
  func.func @transform_0(%arg0: i32, %arg1: memref<2x8xi32, #tpu.memory_space<smem>>) -> (i32, i32) {
    %c0_i32 = arith.constant 0 : i32
    %c0_i32_0 = arith.constant 0 : i32
    %c0_i32_1 = arith.constant 0 : i32
    return %c0_i32, %c0_i32_0 : i32, i32
  }
  func.func @transform_1(%arg0: i32, %arg1: memref<2x8xi32, #tpu.memory_space<smem>>) -> (i32, i32, i32) {
    %c0_i32 = arith.constant 0 : i32
    %c0_i32_0 = arith.constant 0 : i32
    %c0_i32_1 = arith.constant 0 : i32
    return %arg0, %c0_i32, %c0_i32_0 : i32, i32, i32
  }
  func.func @transform_2(%arg0: i32, %arg1: memref<2x8xi32, #tpu.memory_space<smem>>) -> (i32, i32, i32) {
    %c0_i32 = arith.constant 0 : i32
    %c0_i32_0 = arith.constant 0 : i32
    %c0_i32_1 = arith.constant 0 : i32
    return %arg0, %c0_i32, %c0_i32_0 : i32, i32, i32
  }
  func.func @transform_3(%arg0: i32, %arg1: memref<2x8xi32, #tpu.memory_space<smem>>) -> (i32, i32) {
    %c0_i32 = arith.constant 0 : i32
    %c0_i32_0 = arith.constant 0 : i32
    %c0_i32_1 = arith.constant 0 : i32
    return %c0_i32, %c0_i32_0 : i32, i32
  }
  func.func @transform_4(%arg0: i32, %arg1: memref<2x8xi32, #tpu.memory_space<smem>>) -> (i32, i32, i32) {
    %c0_i32 = arith.constant 0 : i32
    %c0_i32_0 = arith.constant 0 : i32
    %c0_i32_1 = arith.constant 0 : i32
    return %arg0, %c0_i32, %c0_i32_0 : i32, i32, i32
  }
  func.func @transform_5(%arg0: i32, %arg1: memref<2x8xi32, #tpu.memory_space<smem>>) -> (i32, i32, i32) {
    %c0_i32 = arith.constant 0 : i32
    %c0_i32_0 = arith.constant 0 : i32
    %c0_i32_1 = arith.constant 0 : i32
    %c0_i32_2 = arith.constant 0 : i32
    return %c0_i32, %c0_i32_0, %c0_i32_1 : i32, i32, i32
  }
  func.func @transform_6(%arg0: i32, %arg1: memref<2x8xi32, #tpu.memory_space<smem>>) -> (i32, i32, i32) {
    %c0_i32 = arith.constant 0 : i32
    %c0_i32_0 = arith.constant 0 : i32
    %c0_i32_1 = arith.constant 0 : i32
    %c0_i32_2 = arith.constant 0 : i32
    return %c0_i32, %c0_i32_0, %c0_i32_1 : i32, i32, i32
  }
  func.func @transform_7(%arg0: i32, %arg1: memref<2x8xi32, #tpu.memory_space<smem>>) -> (i32, i32, i32, i32) {
    %c0_i32 = arith.constant 0 : i32
    %c0_i32_0 = arith.constant 0 : i32
    %c0_i32_1 = arith.constant 0 : i32
    %c0_i32_2 = arith.constant 0 : i32
    %c0_i32_3 = arith.constant 0 : i32
    return %c0_i32, %c0_i32_0, %c0_i32_1, %c0_i32_2 : i32, i32, i32, i32
  }
  func.func @transform_8(%arg0: i32, %arg1: memref<2x8xi32, #tpu.memory_space<smem>>) -> (i32, i32, i32) {
    %c0_i32 = arith.constant 0 : i32
    %c0_i32_0 = arith.constant 0 : i32
    %c0_i32_1 = arith.constant 0 : i32
    %c0_i32_2 = arith.constant 0 : i32
    return %c0_i32, %c0_i32_0, %c0_i32_1 : i32, i32, i32
  }
  func.func @transform_9(%arg0: i32, %arg1: memref<2x8xi32, #tpu.memory_space<smem>>) -> (i32, i32, i32) {
    %c0_i32 = arith.constant 0 : i32
    %c0_i32_0 = arith.constant 0 : i32
    %c0_i32_1 = arith.constant 0 : i32
    %c0_i32_2 = arith.constant 0 : i32
    return %c0_i32, %c0_i32_0, %c0_i32_1 : i32, i32, i32
  }
  func.func @transform_10(%arg0: i32, %arg1: memref<2x8xi32, #tpu.memory_space<smem>>) -> (i32, i32, i32) {
    %c0_i32 = arith.constant 0 : i32
    %c0_i32_0 = arith.constant 0 : i32
    %c0_i32_1 = arith.constant 0 : i32
    %c0_i32_2 = arith.constant 0 : i32
    return %c0_i32, %c0_i32_0, %c0_i32_1 : i32, i32, i32
  }
  func.func @transform_11(%arg0: i32, %arg1: memref<2x8xi32, #tpu.memory_space<smem>>) -> (i32, i32, i32) {
    %c0_i32 = arith.constant 0 : i32
    %c0_i32_0 = arith.constant 0 : i32
    %c0_i32_1 = arith.constant 0 : i32
    %c0_i32_2 = arith.constant 0 : i32
    return %c0_i32, %c0_i32_0, %c0_i32_1 : i32, i32, i32
  }
  func.func @transform_12(%arg0: i32, %arg1: memref<2x8xi32, #tpu.memory_space<smem>>) -> (i32, i32, i32) {
    %c0_i32 = arith.constant 0 : i32
    %c0_i32_0 = arith.constant 0 : i32
    %c0_i32_1 = arith.constant 0 : i32
    %c0_i32_2 = arith.constant 0 : i32
    return %c0_i32, %c0_i32_0, %c0_i32_1 : i32, i32, i32
  }
  func.func @transform_13(%arg0: i32, %arg1: memref<2x8xi32, #tpu.memory_space<smem>>) -> (i32, i32, i32) {
    %c0_i32 = arith.constant 0 : i32
    %c0_i32_0 = arith.constant 0 : i32
    %c0_i32_1 = arith.constant 0 : i32
    %c0_i32_2 = arith.constant 0 : i32
    return %c0_i32, %c0_i32_0, %c0_i32_1 : i32, i32, i32
  }
  func.func @transform_14(%arg0: i32, %arg1: memref<2x8xi32, #tpu.memory_space<smem>>) -> (i32, i32, i32) {
    %c0_i32 = arith.constant 0 : i32
    %c0_i32_0 = arith.constant 0 : i32
    %c0_i32_1 = arith.constant 0 : i32
    %c0_i32_2 = arith.constant 0 : i32
    return %c0_i32, %c0_i32_0, %c0_i32_1 : i32, i32, i32
  }
  func.func @transform_15(%arg0: i32, %arg1: memref<2x8xi32, #tpu.memory_space<smem>>) -> (i32, i32, i32, i32) {
    %c0_i32 = arith.constant 0 : i32
    %c0_i32_0 = arith.constant 0 : i32
    %c0_i32_1 = arith.constant 0 : i32
    %c0_i32_2 = arith.constant 0 : i32
    %c0_i32_3 = arith.constant 0 : i32
    return %c0_i32, %c0_i32_0, %c0_i32_1, %c0_i32_2 : i32, i32, i32, i32
  }
  func.func @transform_16(%arg0: i32, %arg1: memref<2x8xi32, #tpu.memory_space<smem>>) -> (i32, i32, i32) {
    %c0_i32 = arith.constant 0 : i32
    %c0_i32_0 = arith.constant 0 : i32
    %c0_i32_1 = arith.constant 0 : i32
    %c0_i32_2 = arith.constant 0 : i32
    return %c0_i32, %c0_i32_0, %c0_i32_1 : i32, i32, i32
  }
  func.func @transform_17(%arg0: i32, %arg1: memref<2x8xi32, #tpu.memory_space<smem>>) -> (i32, i32, i32) {
    %c0_i32 = arith.constant 0 : i32
    %c0_i32_0 = arith.constant 0 : i32
    %c0_i32_1 = arith.constant 0 : i32
    %c0_i32_2 = arith.constant 0 : i32
    return %c0_i32, %c0_i32_0, %c0_i32_1 : i32, i32, i32
  }
  func.func @transform_18(%arg0: i32, %arg1: memref<2x8xi32, #tpu.memory_space<smem>>) -> (i32, i32, i32) {
    %c0_i32 = arith.constant 0 : i32
    %c0_i32_0 = arith.constant 0 : i32
    %c0_i32_1 = arith.constant 0 : i32
    %c0_i32_2 = arith.constant 0 : i32
    return %c0_i32, %c0_i32_0, %c0_i32_1 : i32, i32, i32
  }
  func.func @transform_19(%arg0: i32, %arg1: memref<2x8xi32, #tpu.memory_space<smem>>) -> (i32, i32, i32) {
    %c0_i32 = arith.constant 0 : i32
    %c0_i32_0 = arith.constant 0 : i32
    %c0_i32_1 = arith.constant 0 : i32
    %c0_i32_2 = arith.constant 0 : i32
    return %c0_i32, %c0_i32_0, %c0_i32_1 : i32, i32, i32
  }
  func.func @transform_20(%arg0: i32, %arg1: memref<2x8xi32, #tpu.memory_space<smem>>) -> (i32, i32, i32) {
    %c0_i32 = arith.constant 0 : i32
    %c0_i32_0 = arith.constant 0 : i32
    %c0_i32_1 = arith.constant 0 : i32
    %c0_i32_2 = arith.constant 0 : i32
    return %c0_i32, %c0_i32_0, %c0_i32_1 : i32, i32, i32
  }
  func.func @transform_21(%arg0: i32, %arg1: memref<2x8xi32, #tpu.memory_space<smem>>) -> (i32, i32, i32) {
    %c0_i32 = arith.constant 0 : i32
    %c0_i32_0 = arith.constant 0 : i32
    %c0_i32_1 = arith.constant 0 : i32
    %c0_i32_2 = arith.constant 0 : i32
    return %c0_i32, %c0_i32_0, %c0_i32_1 : i32, i32, i32
  }
  func.func @transform_22(%arg0: i32, %arg1: memref<2x8xi32, #tpu.memory_space<smem>>) -> (i32, i32, i32) {
    %c0_i32 = arith.constant 0 : i32
    %c0_i32_0 = arith.constant 0 : i32
    %c0_i32_1 = arith.constant 0 : i32
    %c0_i32_2 = arith.constant 0 : i32
    return %c0_i32, %c0_i32_0, %c0_i32_1 : i32, i32, i32
  }
  func.func @transform_23(%arg0: i32, %arg1: memref<2x8xi32, #tpu.memory_space<smem>>) -> (i32, i32, i32) {
    %c0_i32 = arith.constant 0 : i32
    %c0_i32_0 = arith.constant 0 : i32
    %c0_i32_1 = arith.constant 0 : i32
    %c0_i32_2 = arith.constant 0 : i32
    return %c0_i32, %c0_i32_0, %c0_i32_1 : i32, i32, i32
  }
  func.func @transform_24(%arg0: i32, %arg1: memref<2x8xi32, #tpu.memory_space<smem>>) -> (i32, i32, i32) {
    %c0_i32 = arith.constant 0 : i32
    %c0_i32_0 = arith.constant 0 : i32
    %c0_i32_1 = arith.constant 0 : i32
    %c0_i32_2 = arith.constant 0 : i32
    return %c0_i32, %c0_i32_0, %c0_i32_1 : i32, i32, i32
  }
  func.func @transform_25(%arg0: i32, %arg1: memref<2x8xi32, #tpu.memory_space<smem>>) -> (i32, i32) {
    %c0_i32 = arith.constant 0 : i32
    %c0_i32_0 = arith.constant 0 : i32
    %c0_i32_1 = arith.constant 0 : i32
    return %c0_i32, %c0_i32_0 : i32, i32
  }
  func.func @transform_26(%arg0: i32, %arg1: memref<2x8xi32, #tpu.memory_space<smem>>) -> (i32, i32) {
    %c0_i32 = arith.constant 0 : i32
    %c0_i32_0 = arith.constant 0 : i32
    %c0_i32_1 = arith.constant 0 : i32
    return %c0_i32, %c0_i32_0 : i32, i32
  }
  func.func @transform_27(%arg0: i32, %arg1: memref<2x8xi32, #tpu.memory_space<smem>>) -> (i32, i32, i32) {
    %c0_i32 = arith.constant 0 : i32
    %c0_i32_0 = arith.constant 0 : i32
    %c0_i32_1 = arith.constant 0 : i32
    return %arg0, %c0_i32, %c0_i32_0 : i32, i32, i32
  }
}

</mosaic_0001>

<bundles_post_ra>
// kernel: decoder_forward.1
= control target key start
LH: loop header
LB: loop body
LE: loop exit
PB: predicated region body
PF: predicated region fallthrough
CT: control target
= control target key end

     0   :  { %s8244_s0 = inlined_call_operand.vmem [shape: s32[2,8], index: 0, kind: input, shape index: {}]   ;;  %s8245_s1 = inlined_call_operand.vmem [shape: f32[50,32], index: 1, kind: input, shape index: {}]   ;;  %s8246_s2 = inlined_call_operand.vmem [shape: f32[2,1,32], index: 2, kind: input, shape index: {}]   ;;  %s8247_s3 = inlined_call_operand.vmem [shape: f32[2,8,32], index: 3, kind: input, shape index: {}]   ;;  %s8248_s4 = inlined_call_operand.vmem [shape: f32[8,8], index: 4, kind: input, shape index: {}]   ;;  %s8249_s5 = inlined_call_operand.vmem [shape: f32[2,1,8], index: 5, kind: input, shape index: {}]   ;;  %s8250_s6 = inlined_call_operand.vmem [shape: f32[2,32,96], index: 6, kind: input, shape index: {}]   ;;  %s8251_s7 = inlined_call_operand.vmem [shape: f32[2,1,96], index: 7, kind: input, shape index: {}]   ;;  %s8252_s8 = inlined_call_operand.vmem [shape: f32[2,4,8,32], index: 8, kind: input, shape index: {}]   ;;  %s8253_s9 = inlined_call_operand.vmem [shape: f32[2,1,32], index: 9, kind: input, shape index: {}]   ;;  %s8254_s10 = inlined_call_operand.vmem [shape: f32[2,1,32], index: 10, kind: input, shape index: {}]   ;;  %s8255_s11 = inlined_call_operand.vmem [shape: f32[2,1,32], index: 11, kind: input, shape index: {}]   ;;  %s8256_s12 = inlined_call_operand.vmem [shape: f32[2,32,32], index: 12, kind: input, shape index: {}]   ;;  %s8257_s13 = inlined_call_operand.vmem [shape: f32[2,1,32], index: 13, kind: input, shape index: {}]   ;;  %s8258_s14 = inlined_call_operand.vmem [shape: f32[2,32,64], index: 14, kind: input, shape index: {}]   ;;  %s8259_s15 = inlined_call_operand.vmem [shape: f32[2,1,64], index: 15, kind: input, shape index: {}]   ;;  %s8260_s16 = inlined_call_operand.vmem [shape: f32[2,4,8,32], index: 16, kind: input, shape index: {}]   ;;  %s8261_s17 = inlined_call_operand.vmem [shape: f32[2,1,32], index: 17, kind: input, shape index: {}]   ;;  %s8262_s18 = inlined_call_operand.vmem [shape: f32[2,1,32], index: 18, kind: input, shape index: {}]   ;;  %s8263_s19 = inlined_call_operand.vmem [shape: f32[2,1,32], index: 19, kind: input, shape index: {}]   ;;  %s8264_s20 = inlined_call_operand.vmem [shape: f32[2,1,32], index: 20, kind: input, shape index: {}]   ;;  %s8265_s21 = inlined_call_operand.vmem [shape: f32[2,1,32], index: 21, kind: input, shape index: {}]   ;;  %s8266_s22 = inlined_call_operand.vmem [shape: f32[2,32,128], index: 22, kind: input, shape index: {}]   ;;  %s8267_s23 = inlined_call_operand.vmem [shape: f32[2,1,128], index: 23, kind: input, shape index: {}]   ;;  %s8268_s24 = inlined_call_operand.vmem [shape: f32[2,128,32], index: 24, kind: input, shape index: {}]   ;;  %s8269_s25 = inlined_call_operand.vmem [shape: f32[2,1,32], index: 25, kind: input, shape index: {}]   ;;  %s8270_s26 = inlined_call_operand.vmem [shape: f32[32,128], index: 26, kind: input, shape index: {}]   ;;  %s8271_s27 = inlined_call_operand.vmem [shape: f32[1,128], index: 27, kind: input, shape index: {}]   ;;  %s8272_s28 = inlined_call_operand.hbm [shape: f32[2,8,128], index: 28, kind: output, shape index: {}]  }
   0x1   :  { %8312 = sst [smem:[#allocation17_spill]] %s8244_s0 }
   0x2   :  { %8313 = sst [smem:[#allocation18_spill]] %s8245_s1 }
   0x3   :  { %8314 = sst [smem:[#allocation19_spill]] %s8246_s2 }
   0x4   :  { %8315 = sst [smem:[#allocation20_spill]] %s8247_s3 }
   0x5   :  { %8316 = sst [smem:[#allocation21_spill]] %s8248_s4 }
   0x6   :  { %8317 = sst [smem:[#allocation22_spill]] %s8249_s5 }
   0x7   :  { %8318 = sst [smem:[#allocation23_spill]] %s8250_s6 }
   0x8   :  { %8319 = sst [smem:[#allocation24_spill]] %s8251_s7 }
   0x9   :  { %8320 = sst [smem:[#allocation25_spill]] %s8252_s8 }
   0xa   :  { %8321 = sst [smem:[#allocation26_spill]] %s8253_s9 }
   0xb   :  { %8322 = sst [smem:[#allocation27_spill]] %s8254_s10 }
   0xc   :  { %8323 = sst [smem:[#allocation28_spill]] %s8255_s11 }
   0xd   :  { %8324 = sst [smem:[#allocation29_spill]] %s8256_s12 }
   0xe   :  { %8325 = sst [smem:[#allocation30_spill]] %s8260_s16 }
   0xf   :  { %8326 = sst [smem:[#allocation31_spill]] %s8261_s17 }
  0x10   :  { %8327 = sst [smem:[#allocation32_spill]] %s8265_s21 }
  0x11   :  { %8328 = sst [smem:[#allocation33_spill]] %s8270_s26 }
  0x12   :  { %8329 = sst [smem:[#allocation34_spill]] %s8271_s27 }
  0x13   :  { %8330 = sst [smem:[#allocation35_spill]] %s8272_s28 }
  0x14   :  { %s8331_s9 = sld [smem:[#allocation17_spill]] }
  0x1a   :  { %s33_s21 = sshll.u32 %s8331_s9, 4  ;;  %s34_s21 = int_to_ptr.vmem [resolvable:$true] %s33_s21 }
  0x1b   :  { %s7014_s30 = scalar_lea.vmem %s34_s21, 32  ;;  %p7019_p1 = scmp.lt.s32.totalorder %s34_s21, %s34_s21 }
  0x1c   :  { %p7015_p0 = scmp.ne.s32.totalorder %s34_s21, %s7014_s30  ;;  %p7020_p2 = scmp.lt.s32.totalorder %s7014_s30, %s7014_s30 }
  0x1e   :  { %p7021_p3 = por %p7020_p2, %p7019_p1 }
  0x20   :  { %p7022_p4 = pnand %p7021_p3, %p7015_p0 }
  0x22   :  { %7025 = shalt.err (!%p7022_p4)  }
  0x23   :  { %s7090_s3 = smov [#allocation3]  }
  0x24   :  { %36 = dma.vmem_to_smem %s34_s21, 32, %s7090_s3, [#allocation2] }
  0x25   :  { %7068 = dma.done.wait [#allocation2], 32 }
  0x26   :  { %7069 = vsyncadd [#allocation2], 4294967264 }
  0x27   :  { %38 = sfence }
  0x28   :  { %39 = vsyncpa [#allocation5], 0 }
  0x29   :  { %41 = vsyncpa [#allocation5 + $0x1], 0  ;;  %s7248_s6 = smov 0   ;;  %s7250_s10 = smov 0  }
  0x2a   :  { %s7252_s0 = smov 0   ;;  %s7254_s11 = smov 0  }
  0x2b LB: > { %8332 = sst [smem:[#allocation8_spill]] %s7076_s6  ;;  %s7269_s21 = sadd.s32 4294967295, %s7088_s11   ;;  %s7088_s11 = sphi %s7254_s11, %s8378_s11   ;;  %s7084_s0 = sphi %s7252_s0, %s8381_s0   ;;  %s7080_s10 = sphi %s7250_s10, %s8380_s10   ;;  %s7076_s6 = sphi %s7248_s6, %s8379_s6  }
  0x2c   : > { %8333 = sst [smem:[#allocation9_spill]] %s7080_s10  ;;  %s6109_s29 = sadd.s32 4294967294, %s7088_s11  }
  0x2d   : > { %8334 = sst [smem:[#allocation10_spill]] %s7084_s0  ;;  %s7273_s2 = sadd.s32 1, %s7088_s11  }
  0x2e   : > { %8335 = sst [smem:[#allocation11_spill]] %s7088_s11  ;;  %s636_s7 = sadd.s32 1, %s7084_s0 }
  0x2f   : > { %8336 = sst [smem:[#allocation12_spill]] %s7273_s2  ;;  %s633_s12 = ssub.s32 %s7088_s11, %s7273_s2 }
  0x30   : > { %p646_p5 = scmp.ne.s32.totalorder %s7084_s0, %s7080_s10  ;;  %p634_p6 = scmp.eq.s32.totalorder %s633_s12, 0 }
  0x31   : > { %p647_p7 = scmp.eq.s32.totalorder %s7269_s21, 1  ;;  %p652_p8 = scmp.ne.s32.totalorder %s7080_s10, %s7076_s6 }
  0x32   : > { %p653_p9 = scmp.eq.s32.totalorder %s6109_s29, 1  ;;  %p6112_p12 = scmp.ge.s32.totalorder %s7088_s11, 1 }
  0x33   : > { %s7284_s1 = scalar_select %p634_p6, %s7084_s0, %s636_s7  }
  0x34   : > { %p7286_p10 = por %p647_p7, %p646_p5  ;;  %p7290_p11 = por %p653_p9, %p652_p8 }
  0x35   : > { %8337 = sst [smem:[#allocation13_spill]] %s7284_s1  ;;  %p762_p13 = scmp.lt.s32.totalorder %s7088_s11, 3 }
  0x36   : > { %s8338_s4 = scalar_select %p7286_p10, 1, 0 }
  0x37   : > { %s8340_s8 = scalar_select %p7290_p11, 1, 0 }
  0x38   : > { %8339 = sst [smem:[#allocation14_spill]] %s8338_s4  ;;  %p763_p0 = pnand %p6112_p12, %p762_p13 }
  0x39   : > { %8341 = sst [smem:[#allocation15_spill]] %s8340_s8 }
  0x3a   : > { %766 = sbr.rel (%p763_p0) target bundleno = 8348 (0x209c), region = 128 }
  0x3f   : > { %s7297_s5 = sshll.u32 %s7269_s21, 7  ;;  %v7091_v0 = vmov 0   ;;  %s8343_s1 = sld [smem:[#allocation18_spill]]  ;;  %vm876_vm0 = vcmask 1041408   ;;  %v7092_v2 = vmov 0.0   ;;  %vm874_vm1 = vcmask 1040384  }
  0x40   : > { %8342 = sst [smem:[#allocation16_spill]] %s7297_s5  ;;  %6935 = vset.pattern.permute.xlu0 %v7091_v0  ;;  %s853_s30 = sadd.s32 1, %s7297_s5  ;;  %6461 = vmatprep.subr.mxu0 %v7092_v2  ;;  %vm878_vm2 = vcmask 1042432   ;;  %vm880_vm3 = vcmask 1043456   ;;  %vm882_vm4 = vcmask 1044480   ;;  %vm884_vm5 = vcmask 1045504  }
  0x41   : > { %s7300_s9 = sld [smem:[#allocation3 + %s7297_s5]]  ;;  %s856_s29 = sadd.s32 2, %s7297_s5  ;;  %6489 = vmatprep.subr.mxu1 %v7092_v2  ;;  %vm886_vm6 = vcmask 1046528   ;;  %vm7093_vm7 = vmmov 0   ;;  %v888_v24 = vlaneseq  ;;  %vm910_vm8 = vcmask 408576  }
  0x42   : > { %s7303_s3 = sld [smem:[#allocation3 + %s853_s30]]  ;;  %s859_s2 = sadd.s32 3, %s7297_s5  ;;  %6475 = vmatprep.mubr.msk.f32.mxu0 %vm7093_vm7, %v7092_v2  ;;  %6491 = vmatprep.mubr.msk.f32.mxu1 %vm7093_vm7, %v7092_v2  ;;  %vm1000_vm10 = vcmask 261120   ;;  %vm1088_vm11 = vcmask 64512  }
  0x43   : > { %s7309_s0 = sld [smem:[#allocation3 + %s856_s29]]  ;;  %s862_s7 = sadd.s32 4, %s7297_s5  ;;  %v889_v25 = vand.u32 127, %v888_v24 }
  0x44   : > { %s7317_s30 = sld [smem:[#allocation3 + %s859_s2]]  ;;  %s865_s12 = sadd.s32 5, %s7297_s5 }
  0x45   : > { %v900_v1 = vld [vmem:[%s8343_s1 + $0x30] sm:$0x3]  ;;  %v899_v3 = vld [vmem:[%s8343_s1 + $0x28] sm:$0xff]  ;;  %s7321_s29 = sld [smem:[#allocation3 + %s862_s7]]  ;;  %v898_v4 = vld [vmem:[%s8343_s1 + $0x20] sm:$0xff]  ;;  %s868_s8 = sadd.s32 6, %s7297_s5 }
  0x46   : > { %6462 = vmatpush3.msk.msra.mxu0 %vm876_vm0, %v900_v1  ;;  %s7328_s6 = sld [smem:[#allocation3 + %s865_s12]]  ;;  %s871_s27 = sadd.s32 7, %s7297_s5  ;;  %v897_v6 = vld [vmem:[%s8343_s1 + $0x18] sm:$0xff]  ;;  %v896_v10 = vld [vmem:[%s8343_s1 + $0x10] sm:$0xff]  ;;  %v895_v15 = vld [vmem:[%s8343_s1 + $0x8] sm:$0xff] }
  0x47   : > { %6463 = vmatprep.subr.mxu0 %v7092_v2  ;;  %v852_v5 = vstv %s7300_s9  ;;  %s7332_s2 = sld [smem:[#allocation3 + %s868_s8]]  ;;  %v894_v20 = vld [vmem:[%s8343_s1] sm:$0xff]  ;;  %p839_p1 = scmp.lt.s32.totalorder %s7269_s21, 1 }
  0x48   : > { %6464 = vmatpush3.msra.mxu0 %v899_v3  ;;  %v855_v7 = vstv %s7303_s3  ;;  %s7340_s28 = sld [smem:[#allocation3 + %s871_s27]]  ;;  %s8298_s8 = smov 120  }
  0x49   : > { %6465 = vmatprep.subr.mxu0 %v7092_v2  ;;  %v858_v8 = vstv %s7309_s0  ;;  %v875_v9 = vsel %vm874_vm1, %v852_v5, %v855_v7  ;;  %s8344_s12 = sld [smem:[#allocation23_spill]]  ;;  %s8383_s21 = smov (!%p839_p1, %s7269_s21), 1 }
  0x4a   : > { %6466 = vmatpush3.msra.mxu0 %v898_v4  ;;  %v861_v11 = vstv %s7317_s30  ;;  %v877_v12 = vsel %vm876_vm0, %v875_v9, %v858_v8  ;;  %s8345_s0 = sld [smem:[#allocation19_spill]]  ;;  %s8294_s7 = smov 96  }
  0x4b   : > { %6467 = vmatprep.subr.mxu0 %v7092_v2  ;;  %v864_v13 = vstv %s7321_s29  ;;  %v879_v14 = vsel %vm878_vm2, %v877_v12, %v861_v11  ;;  %s8346_s29 = sld [smem:[#allocation24_spill]]  ;;  %s8292_s27 = smov 64  }
  0x4c   : > { %6468 = vmatpush3.msra.mxu0 %v897_v6  ;;  %v867_v16 = vstv %s7328_s6  ;;  %v881_v17 = vsel %vm880_vm3, %v879_v14, %v864_v13  ;;  %s8300_s6 = smov 112   ;;  %s8347_s9 = sld [smem:[#allocation21_spill]] }
  0x4d   : > { %6469 = vmatprep.subr.mxu0 %v7092_v2  ;;  %v870_v18 = vstv %s7332_s2  ;;  %v883_v19 = vsel %vm882_vm4, %v881_v17, %v867_v16  ;;  %s8296_s2 = smov 104   ;;  %s8348_s3 = sld [smem:[#allocation25_spill]] }
  0x4e   : > { %6470 = vmatpush3.msra.mxu0 %v896_v10  ;;  %v873_v21 = vstv %s7340_s28  ;;  %v885_v22 = vsel %vm884_vm5, %v883_v19, %v870_v18  ;;  %s8351_s1 = sld [smem:[#allocation20_spill]]  ;;  %s8359_s10 = smov 104  }
  0x4f   : > { %6471 = vmatprep.subr.mxu0 %v7092_v2  ;;  %v887_v23 = vsel %vm886_vm6, %v885_v22, %v873_v21  ;;  %v992_v27 = vld [vmem:[%s8344_s12 + $0x18] sm:$0xff]  ;;  %v991_v29 = vld [vmem:[%s8344_s12 + $0x10] sm:$0xff]  ;;  %v990_v30 = vld [vmem:[%s8344_s12 + $0x8] sm:$0xff]  ;;  %s8356_s30 = sld [smem:[#allocation28_spill]] }
  0x50   : > { %6472 = vmatpush3.msra.mxu0 %v895_v15  ;;  %891 = vperm.xlu0 %6935, %v887_v23   ;;  %v989_v31 = vld [vmem:[%s8344_s12] sm:$0xff]  ;;  %s841_s4 = scalar_lea.vmem %s8345_s0, %s8383_s21  ;;  %s8349_s0 = sld [smem:[#allocation26_spill]] }
  0x51   : > { %6473 = vmatprep.subr.mxu0 %v7092_v2  ;;  %v6117_v32 = vld [vmem:[%s841_s4] ss:$0 sm:$0xff]  ;;  %s8362_s16 = sld [smem:[#allocation30_spill]] }
  0x52   : > { %6474 = vmatpush3.msra.mxu0 %v894_v20  ;;  %v6120_v36 = vld [vmem:[%s8346_s29] ss:$0 sm:$0xff]  ;;  %s8363_s17 = sld [smem:[#allocation31_spill]] }
  0x53   : > { %6478 = vmatprep.subr.mxu0 %v7092_v2  ;;  %v849_v47 = vld [vmem:[%s8347_s9] sm:$0xff]  ;;  %s8364_s26 = sld [smem:[#allocation32_spill]] }
  0x54   : > { %s8367_s28 = sld [smem:[#allocation31_spill]] }
  0x56   : > { %s8350_s4 = smov %s8349_s0 }
  0xcb   : > { %v892_v26 = vpop.permute.xlu0 %891 }
  0xcc   : > { %vm893_vm9 = vcmp.eq.s32.totalorder %v889_v25, %v892_v26 }
  0xcd   : > { %v6116_v28 = vsel %vm893_vm9, 1.0, %v7092_v2 }
  0xce   : > { %6476 = vmatmul.mubr.msk.f32.vlgmr.msra.gmra.mxu0 %vm910_vm8, %v6116_v28 }
  0xcf   : > { %6479 = vmatpush3.msra.mxu0 %v992_v27  ;;  %6486 = vmatprep.mubr.msk.f32.mxu0 %vm7093_vm7, %v7092_v2 }
  0xd0   : > { %6480 = vmatprep.subr.mxu0 %v7092_v2 }
  0xd1   : > { %6481 = vmatpush3.msra.mxu0 %v991_v29 }
  0xd2   : > { %6482 = vmatprep.subr.mxu0 %v7092_v2 }
  0xd3   : > { %6483 = vmatpush3.msra.mxu0 %v990_v30 }
  0xd4   : > { %6484 = vmatprep.subr.mxu0 %v7092_v2 }
  0xd5   : > { %6485 = vmatpush3.msra.mxu0 %v989_v31 }
  0xd6   : > { %6499 = vmatprep.subr.mxu0 %v7092_v2 }
 0x18e   : > { %v983_v33 = vpop.f32.mrf.mxu0 }
 0x18f   : > { %v7394_v34 = vadd.f32 %v6117_v32, %v983_v33 }
 0x190   : > { %v6477_v35 = vpop.f32.mrf.mxu0 }
 0x191   : > { %6487 = vmatmul.mubr.msk.f32.vlgmr.msra.gmra.mxu0 %vm1000_vm10, %v7394_v34  ;;  %v1074_v35 = vld [vmem:[%s8348_s3] sm:$0xff] }
 0x192   : > { %6501 = vmatprep.mubr.msk.f32.mxu0 %vm7093_vm7, %v7092_v2 }
 0x251   : > { %v1070_v37 = vpop.f32.mrf.mxu0 }
 0x252   : > { %v1071_v38 = vadd.f32 %v6120_v36, %v1070_v37 }
 0x253   : > { %v6488_v39 = vpop.f32.mrf.mxu0 }
 0x254   : > { %1082 = vrot.lane.b32.xlu1 %v1071_v38, %s8300_s6  ;;  %1080 = vrot.lane.b32.xlu0 %v1071_v38, %s8298_s8  ;;  %v1075_v39 = vld [vmem:[%s8348_s3 + $0x8] sm:$0xff]  ;;  %s8357_s8 = smov 112  }
 0x258   : > { %1084 = vrot.lane.b32.xlu1 %v1071_v38, %s8296_s2  ;;  %1086 = vrot.lane.b32.xlu0 %v1071_v38, %s8294_s7  ;;  %s6114_s2 = sshll.u32 %s8383_s21, 3 }
 0x259   : > { %s845_s11 = scalar_lea.vmem %s8351_s1, %s6114_s2  ;;  %s8358_s2 = smov 120  }
 0x25a   : > { %s8360_s1 = sld [smem:[#allocation22_spill]] }
 0x260   : > { %s7613_s6 = scalar_lea.vmem %s8360_s1, %s8383_s21  ;;  %s8361_s21 = smov 96  }
 0x261   : > { %s8370_s1 = sld [smem:[#allocation9_spill]] }
 0x2c6   : > { %v7407_v40 = vpop.permute.xlu1 %1082  ;;  %v7409_v41 = vpop.permute.xlu0 %1080 }
 0x2c7   : > { %1239 = vrot.lane.b32.xlu0 %v7407_v40, %s8294_s7  ;;  %1163 = vrot.lane.b32.xlu1 %v7409_v41, %s8294_s7 }
 0x2ca   : > { %v7415_v42 = vpop.permute.xlu1 %1084  ;;  %v1087_v43 = vpop.permute.xlu0 %1086 }
 0x2cb   : > { %1315 = vrot.lane.b32.xlu1 %v7415_v42, %s8294_s7  ;;  %6490 = vmatpush3.xpose.msk.msra.mxu1 %vm1088_vm11, %v1087_v43  ;;  %v1077_v43 = vld [vmem:[%s8348_s3 + $0x18] sm:$0xff] }
 0x2cc   : > { %6494 = vmatprep.subr.mxu1 %v7092_v2 }
 0x2ce   : > { %6492 = vmatmul.mubr.msk.f32.vlgmr.msra.gmra.mxu1 %vm1088_vm11, %v1071_v38 }
 0x2cf   : > { %6496 = vmatprep.mubr.msk.f32.mxu1 %vm7093_vm7, %v7092_v2 }
 0x339   : > { %v1164_v44 = vpop.permute.xlu1 %1163  ;;  %v1240_v45 = vpop.permute.xlu0 %1239 }
 0x33a   : > { %6495 = vmatpush3.xpose.msk.msra.mxu1 %vm1088_vm11, %v1164_v44  ;;  %6500 = vmatpush3.xpose.msk.msra.mxu0 %vm1088_vm11, %v1240_v45 }
 0x33b   : > { %6504 = vmatprep.subr.mxu1 %v7092_v2  ;;  %6509 = vmatprep.subr.mxu0 %v7092_v2 }
 0x33d   : > { %v1316_v46 = vpop.permute.xlu1 %1315  ;;  %6497 = vmatmul.mubr.msk.f32.vlgmr.msra.gmra.mxu1 %vm1088_vm11, %v7409_v41  ;;  %6502 = vmatmul.mubr.msk.f32.vlgmr.msra.gmra.mxu0 %vm1088_vm11, %v7407_v40 }
 0x33e   : > { %6505 = vmatpush3.xpose.msk.msra.mxu1 %vm1088_vm11, %v1316_v46  ;;  %6506 = vmatprep.mubr.msk.f32.mxu1 %vm7093_vm7, %v7092_v2 }
 0x33f   : > { %6511 = vmatprep.mubr.msk.f32.mxu0 %vm7093_vm7, %v7092_v2  ;;  %6514 = vmatprep.subr.mxu1 %v7092_v2 }
 0x341   : > { %6507 = vmatmul.mubr.msk.f32.vlgmr.msra.gmra.mxu1 %vm1088_vm11, %v7415_v42 }
 0x342   : > { %6516 = vmatprep.mubr.msk.f32.mxu1 %vm7093_vm7, %v7092_v2 }
 0x38e   : > { %v1159_v48 = vpop.f32.mrf.mxu1 }
 0x38f   : > { %v1160_v49 = vadd.f32 %v1159_v48, %v849_v47 }
 0x390   : > { %v6493_v50 = vpop.f32.mrf.mxu1 }
 0x391   : > { %v1391_v51 = vsel %vm1088_vm11, %v1160_v49, -inf }
 0x392   : > { %1392 = vmax.xlane.f32.xlu0 %v1391_v51 }
 0x3fd   : > { %v1235_v52 = vpop.f32.mrf.mxu1  ;;  %v1311_v53 = vpop.f32.mrf.mxu0 }
 0x3fe   : > { %v1236_v54 = vadd.f32 %v1235_v52, %v849_v47  ;;  %v1312_v55 = vadd.f32 %v1311_v53, %v849_v47 }
 0x3ff   : > { %v6498_v56 = vpop.f32.mrf.mxu1  ;;  %v6503_v57 = vpop.f32.mrf.mxu0 }
 0x400   : > { %v1394_v58 = vsel %vm1088_vm11, %v1236_v54, -inf  ;;  %v1397_v59 = vsel %vm1088_vm11, %v1312_v55, -inf }
 0x401   : > { %1395 = vmax.xlane.f32.xlu1 %v1394_v58  ;;  %v1387_v60 = vpop.f32.mrf.mxu1  ;;  %1398 = vmax.xlane.f32.xlu0 %v1397_v59 }
 0x402   : > { %v1388_v61 = vadd.f32 %v1387_v60, %v849_v47 }
 0x403   : > { %v6508_v62 = vpop.f32.mrf.mxu1 }
 0x404   : > { %v1400_v63 = vsel %vm1088_vm11, %v1388_v61, -inf  ;;  %v6138_v62 = vld [vmem:[%s8349_s0] ss:$0 sm:$0xff]  ;;  %s8352_s0 = sld [smem:[#allocation29_spill]] }
 0x405   : > { %1401 = vmax.xlane.f32.xlu0 %v1400_v63 }
 0x40a   : > { %s8353_s5 = smov %s8352_s0 }
 0x412   : > { %1435 = vrot.lane.b32.xlu1 %v1071_v38, %s8292_s27 }
 0x41b   : > { %v1393_v0 = vpop.xlane.xlu0 %1392 }
 0x41c   : > { %v1403_v1 = vsub.f32 %v1160_v49, %v1393_v0 }
 0x41e   : > { %v1407_v3 = vmul.f32 1.442695, %v1403_v1 }
 0x420   : > { %6936 = vpow2.f32 %v1407_v3 }
 0x42d   : > { %v6937_v4 = vpop.eup %6936 }
 0x42e   : > { %v1415_v5 = vsel %vm1088_vm11, %v6937_v4, 0.0 }
 0x436   : > { %1416 = vadd.xlane.f32.xlu1 %v1415_v5 }
 0x48a   : > { %v1396_v6 = vpop.xlane.xlu1 %1395  ;;  %v1399_v7 = vpop.xlane.xlu0 %1398 }
 0x48b   : > { %v1404_v8 = vsub.f32 %v1236_v54, %v1396_v6  ;;  %v1405_v9 = vsub.f32 %v1312_v55, %v1399_v7 }
 0x48d   : > { %v1409_v10 = vmul.f32 1.442695, %v1404_v8  ;;  %v1411_v11 = vmul.f32 1.442695, %v1405_v9 }
 0x48e   : > { %v1436_v12 = vpop.permute.xlu1 %1435  ;;  %v1402_v13 = vpop.xlane.xlu0 %1401 }
 0x48f   : > { %6938 = vpow2.f32 %v1409_v10  ;;  %v1406_v14 = vsub.f32 %v1388_v61, %v1402_v13  ;;  %6510 = vmatpush3.msra.mxu0 %v1436_v12  ;;  %v2161_v12 = vld [vmem:[%s8258_s14 + $0x8] sm:$0xff]  ;;  %v2160_v13 = vld [vmem:[%s8258_s14] sm:$0xff] }
 0x490   : > { %6940 = vpow2.f32 %v1411_v11  ;;  %6519 = vmatprep.subr.mxu0 %v7092_v2  ;;  %v2163_v11 = vld [vmem:[%s8258_s14 + $0x18] sm:$0xff] }
 0x491   : > { %v1413_v15 = vmul.f32 1.442695, %v1406_v14  ;;  %v7533_v14 = vld [vmem:[%s845_s11] sm:$0xff]  ;;  %s8354_s11 = sld [smem:[#allocation27_spill]] }
 0x493   : > { %6942 = vpow2.f32 %v1413_v15  ;;  %v2079_v15 = vld [vmem:[%s8352_s0 + $0x18] sm:$0xff] }
 0x497   : > { %s8355_s7 = smov %s8354_s11 }
 0x49c   : > { %v6939_v16 = vpop.eup %6938 }
 0x49d   : > { %v6941_v17 = vpop.eup %6940  ;;  %v1418_v18 = vsel %vm1088_vm11, %v6939_v16, 0.0 }
 0x49e   : > { %1419 = vadd.xlane.f32.xlu0 %v1418_v18  ;;  %v1421_v19 = vsel %vm1088_vm11, %v6941_v17, 0.0  ;;  %v2076_v18 = vld [vmem:[%s8353_s5] sm:$0xff] }
 0x49f   : > { %1422 = vadd.xlane.f32.xlu1 %v1421_v19 }
 0x4a0   : > { %v6943_v20 = vpop.eup %6942 }
 0x4a1   : > { %v1424_v21 = vsel %vm1088_vm11, %v6943_v20, 0.0 }
 0x4a2   : > { %1425 = vadd.xlane.f32.xlu0 %v1424_v21 }
 0x4b0   : > { %1587 = vrot.lane.b32.xlu1 %v7407_v40, %s8292_s27  ;;  %v1076_v40 = vld [vmem:[%s8348_s3 + $0x10] sm:$0xff] }
 0x4b4   : > { %1663 = vrot.lane.b32.xlu1 %v7415_v42, %s8292_s27 }
 0x4b8   : > { %1511 = vrot.lane.b32.xlu0 %v7409_v41, %s8292_s27  ;;  %s836_s27 = sand.u32 1, %s8370_s1   ;;  %s7099_s1 = smov [#allocation4]  }
 0x4b9   : > { %s6113_s0 = sshll.u32 %s836_s27, 3 }
 0x4bf   : > { %v1417_v22 = vpop.xlane.xlu1 %1416 }
 0x4c0   : > { %6944 = vrcp.f32 %v1417_v22 }
 0x4cd   : > { %v6945_v23 = vpop.eup %6944 }
 0x4ce   : > { %v1431_v24 = vmul.f32 %v6945_v23, %v6937_v4  ;;  %v6139_v23 = vld [vmem:[%s8354_s11] ss:$0 sm:$0xff]  ;;  %s8365_s11 = smov 64  }
 0x4d0   : > { %6512 = vmatmul.mubr.msk.f32.vlgmr.msra.gmra.mxu0 %vm1088_vm11, %v1431_v24 }
 0x4d1   : > { %6521 = vmatprep.mubr.msk.f32.mxu0 %vm7093_vm7, %v7092_v2 }
 0x527   : > { %v1420_v25 = vpop.xlane.xlu0 %1419 }
 0x528   : > { %v1423_v26 = vpop.xlane.xlu1 %1422  ;;  %6946 = vrcp.f32 %v1420_v25  ;;  %v6140_v25 = vld [vmem:[%s8356_s30] ss:$0 sm:$0xff] }
 0x529   : > { %6948 = vrcp.f32 %v1423_v26 }
 0x52b   : > { %v1426_v27 = vpop.xlane.xlu0 %1425 }
 0x52c   : > { %v1588_v28 = vpop.permute.xlu1 %1587  ;;  %6950 = vrcp.f32 %v1426_v27 }
 0x52d   : > { %6520 = vmatpush3.msra.mxu0 %v1588_v28  ;;  %v6143_v28 = vld [vmem:[%s8259_s15] ss:$0 sm:$0xff] }
 0x52e   : > { %6529 = vmatprep.subr.mxu0 %v7092_v2 }
 0x52f   : > { %v1512_v29 = vpop.permute.xlu0 %1511 }
 0x530   : > { %6515 = vmatpush3.msra.mxu1 %v1512_v29  ;;  %v1664_v36 = vpop.permute.xlu1 %1663 }
 0x531   : > { %6524 = vmatprep.subr.mxu1 %v7092_v2 }
 0x535   : > { %v6947_v30 = vpop.eup %6946 }
 0x536   : > { %v6949_v31 = vpop.eup %6948  ;;  %v1432_v32 = vmul.f32 %v6947_v30, %v6939_v16  ;;  %v2078_v16 = vld [vmem:[%s8353_s5 + $0x10] sm:$0xff] }
 0x537   : > { %v1433_v33 = vmul.f32 %v6949_v31, %v6941_v17  ;;  %v2077_v17 = vld [vmem:[%s8353_s5 + $0x8] sm:$0xff] }
 0x538   : > { %6517 = vmatmul.mubr.msk.f32.vlgmr.msra.gmra.mxu1 %vm1088_vm11, %v1432_v32 }
 0x539   : > { %v6951_v37 = vpop.eup %6950  ;;  %6522 = vmatmul.mubr.msk.f32.vlgmr.msra.gmra.mxu0 %vm1088_vm11, %v1433_v33  ;;  %6525 = vmatpush3.msra.mxu1 %v1664_v36  ;;  %v6141_v33 = vld [vmem:[%s8257_s13] ss:$0 sm:$0xff] }
 0x53a   : > { %6526 = vmatprep.mubr.msk.f32.mxu1 %vm7093_vm7, %v7092_v2  ;;  %v1434_v38 = vmul.f32 %v6951_v37, %v6943_v20  ;;  %6530 = vmatpush3.msra.mxu0 %v1074_v35 }
 0x53b   : > { %6531 = vmatprep.mubr.msk.f32.mxu0 %vm7093_vm7, %v7092_v2  ;;  %6534 = vmatprep.subr.mxu1 %v7092_v2 }
 0x53c   : > { %6527 = vmatmul.mubr.msk.f32.vlgmr.msra.gmra.mxu1 %vm1088_vm11, %v1434_v38  ;;  %6539 = vmatprep.subr.mxu0 %v7092_v2 }
 0x53d   : > { %6535 = vmatpush3.msra.mxu1 %v1075_v39  ;;  %6536 = vmatprep.mubr.msk.f32.mxu1 %vm7093_vm7, %v7092_v2 }
 0x53e   : > { %6544 = vmatprep.subr.mxu1 %v7092_v2 }
 0x590   : > { %v1507_v41 = vpop.f32.mrf.mxu0 }
 0x591   : > { %6532 = vmatmul.mubr.msk.f32.vlgmr.msra.gmra.mxu0 %vm1088_vm11, %v1507_v41 }
 0x592   : > { %v6513_v42 = vpop.f32.mrf.mxu0  ;;  %6540 = vmatpush3.msra.mxu0 %v1076_v40  ;;  %6541 = vmatprep.mubr.msk.f32.mxu0 %vm7093_vm7, %v7092_v2 }
 0x593   : > { %6549 = vmatprep.subr.mxu0 %v7092_v2 }
 0x5f8   : > { %v1583_v44 = vpop.f32.mrf.mxu1 }
 0x5f9   : > { %v1659_v45 = vpop.f32.mrf.mxu0  ;;  %6537 = vmatmul.mubr.msk.f32.vlgmr.msra.gmra.mxu1 %vm1088_vm11, %v1583_v44 }
 0x5fa   : > { %6542 = vmatmul.mubr.msk.f32.vlgmr.msra.gmra.mxu0 %vm1088_vm11, %v1659_v45  ;;  %v6518_v46 = vpop.f32.mrf.mxu1  ;;  %6545 = vmatpush3.msra.mxu1 %v1077_v43  ;;  %v7616_v43 = vld [vmem:[%s7613_s6] ss:$0 sm:$0xff] }
 0x5fb   : > { %v6523_v47 = vpop.f32.mrf.mxu0  ;;  %6546 = vmatprep.mubr.msk.f32.mxu1 %vm7093_vm7, %v7092_v2  ;;  %6560 = vmatprep.subr.mxu1 %v7092_v2 }
 0x5fc   : > { %v1735_v48 = vpop.f32.mrf.mxu1  ;;  %6557 = vmatprep.mubr.msk.f32.mxu0 %vm7093_vm7, %v7092_v2  ;;  %6550 = vmatpush3.msra.mxu0 %v2079_v15 }
 0x5fd   : > { %6547 = vmatmul.mubr.msk.f32.vlgmr.msra.gmra.mxu1 %vm1088_vm11, %v1735_v48  ;;  %6551 = vmatprep.subr.mxu0 %v7092_v2 }
 0x5fe   : > { %v6528_v49 = vpop.f32.mrf.mxu1  ;;  %6568 = vmatprep.mubr.msk.f32.mxu1 %vm7093_vm7, %v7092_v2  ;;  %6561 = vmatpush3.msra.mxu1 %v2163_v11 }
 0x5ff   : > { %6562 = vmatprep.subr.mxu1 %v7092_v2  ;;  %6552 = vmatpush3.msra.mxu0 %v2078_v16 }
 0x600   : > { %6553 = vmatprep.subr.mxu0 %v7092_v2 }
 0x601   : > { %6554 = vmatpush3.msra.mxu0 %v2077_v17 }
 0x602   : > { %6555 = vmatprep.subr.mxu0 %v7092_v2 }
 0x603   : > { %6556 = vmatpush3.msra.mxu0 %v2076_v18 }
 0x604   : > { %6571 = vmatprep.subr.mxu0 %v7092_v2 }
 0x651   : > { %v1808_v50 = vpop.f32.mrf.mxu0 }
 0x652   : > { %v2031_v53 = vsel %vm1000_vm10, %v1808_v50, 0.0 }
 0x653   : > { %v6533_v51 = vpop.f32.mrf.mxu0 }
 0x6b9   : > { %v1881_v52 = vpop.f32.mrf.mxu1 }
 0x6ba   : > { %v2032_v54 = vsel %vm1000_vm10, %v1881_v52, 0.0  ;;  %v1954_v55 = vpop.f32.mrf.mxu0 }
 0x6bb   : > { %v2033_v56 = vadd.f32 %v2032_v54, %v2031_v53  ;;  %v6538_v57 = vpop.f32.mrf.mxu1  ;;  %v2034_v58 = vsel %vm1000_vm10, %v1954_v55, 0.0 }
 0x6bc   : > { %v6543_v59 = vpop.f32.mrf.mxu0 }
 0x6bd   : > { %v2035_v60 = vadd.f32 %v2034_v58, %v2033_v56  ;;  %v2027_v61 = vpop.f32.mrf.mxu1 }
 0x6be   : > { %v2036_v63 = vsel %vm1000_vm10, %v2027_v61, 0.0 }
 0x6bf   : > { %v2037_v0 = vadd.f32 %v2036_v63, %v2035_v60  ;;  %v6548_v1 = vpop.f32.mrf.mxu1 }
 0x6c1   : > { %v2044_v3 = vadd.f32 %v6138_v62, %v2037_v0 }
 0x6c3   : > { %v2045_v4 = vadd.f32 %v2044_v3, %v7394_v34  ;;  %v2162_v34 = vld [vmem:[%s8258_s14 + $0x10] sm:$0xff] }
 0x6c4   : > { %6563 = vmatpush3.msra.mxu1 %v2162_v34 }
 0x6c5   : > { %v2048_v5 = vsel %vm1000_vm10, %v2045_v4, 0.0  ;;  %6564 = vmatprep.subr.mxu1 %v7092_v2 }
 0x6c6   : > { %2049 = vadd.xlane.f32.xlu0 %v2048_v5  ;;  %6565 = vmatpush3.msra.mxu1 %v2161_v12 }
 0x6c7   : > { %6566 = vmatprep.subr.mxu1 %v7092_v2 }
 0x6c8   : > { %6567 = vmatpush3.msra.mxu1 %v2160_v13 }
 0x6c9   : > { %6569 = vmatmul.mubr.msk.f32.vlgmr.msra.gmra.mxu1 %vm1000_vm10, %v7533_v14  ;;  %6576 = vmatprep.subr.mxu1 %v7092_v2 }
 0x6ca   : > { %6578 = vmatprep.mubr.msk.f32.mxu1 %vm7093_vm7, %v7092_v2 }
 0x74f   : > { %v2050_v6 = vpop.xlane.xlu0 %2049 }
 0x750   : > { %v2052_v7 = vmul.f32 0.03125, %v2050_v6 }
 0x752   : > { %v2053_v8 = vsub.f32 %v2045_v4, %v2052_v7 }
 0x754   : > { %v2054_v9 = vmul.f32 %v2053_v8, %v2053_v8 }
 0x756   : > { %v2055_v10 = vsel %vm1000_vm10, %v2054_v9, 0.0 }
 0x757   : > { %2056 = vadd.xlane.f32.xlu1 %v2055_v10 }
 0x789   : > { %v2240_v29 = vpop.f32.mrf.mxu1 }
 0x78a   : > { %v2241_v30 = vadd.f32 %v6143_v28, %v2240_v29 }
 0x78b   : > { %v6570_v31 = vpop.f32.mrf.mxu1 }
 0x78c   : > { %2259 = vrot.lane.b32.xlu1 %v2241_v30, %s8357_s8  ;;  %2257 = vrot.lane.b32.xlu0 %v2241_v30, %s8358_s2 }
 0x790   : > { %2261 = vrot.lane.b32.xlu1 %v2241_v30, %s8359_s10 }
 0x7e0   : > { %v2057_v19 = vpop.xlane.xlu1 %2056 }
 0x7e1   : > { %v2058_v20 = vmul.f32 0.03125, %v2057_v19 }
 0x7e3   : > { %v2059_v21 = vadd.f32 1e-05, %v2058_v20 }
 0x7e5   : > { %6952 = vrsqrt.f32 %v2059_v21 }
 0x7f2   : > { %v6953_v22 = vpop.eup %6952 }
 0x7f3   : > { %v2061_v24 = vmul.f32 %v6953_v22, %v2053_v8 }
 0x7f5   : > { %v2068_v26 = vmul.f32 %v6139_v23, %v2061_v24 }
 0x7f7   : > { %v7562_v27 = vadd.f32 %v6140_v25, %v2068_v26 }
 0x7f9   : > { %6558 = vmatmul.mubr.msk.f32.vlgmr.msra.gmra.mxu0 %vm1000_vm10, %v7562_v27 }
 0x7fa   : > { %6573 = vmatprep.mubr.msk.f32.mxu0 %vm7093_vm7, %v7092_v2  ;;  %6572 = vmatpush3.xpose.msk.msra.mxu0 %vm1088_vm11, %v2241_v30 }
 0x7fb   : > { %6581 = vmatprep.subr.mxu0 %v7092_v2 }
 0x7fe   : > { %v7576_v32 = vpop.permute.xlu0 %2257  ;;  %v7587_v38 = vpop.permute.xlu1 %2259 }
 0x7ff   : > { %6577 = vmatpush3.xpose.msk.msra.mxu1 %vm1088_vm11, %v7576_v32 }
 0x800   : > { %6586 = vmatprep.subr.mxu1 %v7092_v2 }
 0x802   : > { %v7595_v39 = vpop.permute.xlu1 %2261 }
 0x8b9   : > { %v2156_v35 = vpop.f32.mrf.mxu0 }
 0x8ba   : > { %v2157_v36 = vadd.f32 %v6141_v33, %v2156_v35 }
 0x8bb   : > { %v6559_v37 = vpop.f32.mrf.mxu0 }
 0x8bc   : > { %2254 = vrot.lane.b32.xlu1 %v2157_v36, %s8359_s10  ;;  %2250 = vrot.lane.b32.xlu0 %v2157_v36, %s8358_s2  ;;  %v2246_v37 = vld [vmem:[%s8362_s16 + $0x10] sm:$0xff] }
 0x8bd   : > { %6574 = vmatmul.mubr.msk.f32.vlgmr.msra.gmra.mxu0 %vm1088_vm11, %v2157_v36 }
 0x8be   : > { %6582 = vmatpush3.xpose.msk.msra.mxu0 %vm1088_vm11, %v7587_v38  ;;  %6583 = vmatprep.mubr.msk.f32.mxu0 %vm7093_vm7, %v7092_v2 }
 0x8bf   : > { %6591 = vmatprep.subr.mxu0 %v7092_v2 }
 0x8c0   : > { %2252 = vrot.lane.b32.xlu0 %v2157_v36, %s8357_s8  ;;  %v2245_v36 = vld [vmem:[%s8362_s16 + $0x8] sm:$0xff] }
 0x92e   : > { %v2251_v40 = vpop.permute.xlu0 %2250  ;;  %v2255_v41 = vpop.permute.xlu1 %2254 }
 0x92f   : > { %6579 = vmatmul.mubr.msk.f32.vlgmr.msra.gmra.mxu1 %vm1088_vm11, %v2251_v40  ;;  %v2247_v40 = vld [vmem:[%s8362_s16 + $0x18] sm:$0xff] }
 0x930   : > { %6587 = vmatpush3.xpose.msk.msra.mxu1 %vm1088_vm11, %v7595_v39  ;;  %6588 = vmatprep.mubr.msk.f32.mxu1 %vm7093_vm7, %v7092_v2 }
 0x931   : > { %6596 = vmatprep.subr.mxu1 %v7092_v2 }
 0x932   : > { %v2253_v42 = vpop.permute.xlu0 %2252 }
 0x933   : > { %6584 = vmatmul.mubr.msk.f32.vlgmr.msra.gmra.mxu0 %vm1088_vm11, %v2253_v42  ;;  %6589 = vmatmul.mubr.msk.f32.vlgmr.msra.gmra.mxu1 %vm1088_vm11, %v2255_v41 }
 0x934   : > { %6593 = vmatprep.mubr.msk.f32.mxu0 %vm7093_vm7, %v7092_v2  ;;  %6598 = vmatprep.mubr.msk.f32.mxu1 %vm7093_vm7, %v7092_v2 }
 0x97d   : > { %v2339_v44 = vpop.f32.mrf.mxu0 }
 0x97e   : > { %v2340_v45 = vadd.f32 %v7616_v43, %v2339_v44 }
 0x97f   : > { %v6575_v46 = vpop.f32.mrf.mxu0 }
 0x980   : > { %v2565_v47 = vsel %vm1088_vm11, %v2340_v45, -inf }
 0x981   : > { %2566 = vmax.xlane.f32.xlu0 %v2565_v47 }
 0x9ef   : > { %v2413_v48 = vpop.f32.mrf.mxu1 }
 0x9f0   : > { %v2414_v49 = vadd.f32 %v7616_v43, %v2413_v48 }
 0x9f1   : > { %v6580_v50 = vpop.f32.mrf.mxu1 }
 0x9f2   : > { %v2568_v51 = vsel %vm1088_vm11, %v2414_v49, -inf }
 0x9f3   : > { %2569 = vmax.xlane.f32.xlu1 %v2568_v51  ;;  %v2487_v52 = vpop.f32.mrf.mxu0  ;;  %v2561_v53 = vpop.f32.mrf.mxu1 }
 0x9f4   : > { %v2488_v54 = vadd.f32 %v7616_v43, %v2487_v52  ;;  %v2562_v57 = vadd.f32 %v7616_v43, %v2561_v53 }
 0x9f5   : > { %v6585_v55 = vpop.f32.mrf.mxu0  ;;  %v6590_v56 = vpop.f32.mrf.mxu1 }
 0x9f6   : > { %v2571_v58 = vsel %vm1088_vm11, %v2488_v54, -inf  ;;  %v2574_v59 = vsel %vm1088_vm11, %v2562_v57, -inf }
 0x9f7   : > { %2572 = vmax.xlane.f32.xlu0 %v2571_v58 }
 0x9fb   : > { %2575 = vmax.xlane.f32.xlu0 %v2574_v59 }
 0xa04   : > { %2609 = vrot.lane.b32.xlu1 %v2241_v30, %s8361_s21 }
 0xa0a   : > { %v2567_v60 = vpop.xlane.xlu0 %2566 }
 0xa0b   : > { %v2577_v61 = vsub.f32 %v2340_v45, %v2567_v60  ;;  %v6162_v60 = vld [vmem:[%s8363_s17] ss:$0 sm:$0xff] }
 0xa0d   : > { %v2581_v62 = vmul.f32 1.442695, %v2577_v61 }
 0xa0f   : > { %6954 = vpow2.f32 %v2581_v62 }
 0xa1c   : > { %v6955_v63 = vpop.eup %6954 }
 0xa1d   : > { %v2589_v0 = vsel %vm1088_vm11, %v6955_v63, 0.0 }
 0xa28   : > { %2590 = vadd.xlane.f32.xlu1 %v2589_v0 }
 0xa7c   : > { %v2570_v1 = vpop.xlane.xlu1 %2569 }
 0xa7d   : > { %v2578_v3 = vsub.f32 %v2414_v49, %v2570_v1 }
 0xa7f   : > { %v2583_v4 = vmul.f32 1.442695, %v2578_v3 }
 0xa80   : > { %v2610_v5 = vpop.permute.xlu1 %2609  ;;  %v2573_v6 = vpop.xlane.xlu0 %2572 }
 0xa81   : > { %6956 = vpow2.f32 %v2583_v4  ;;  %v2579_v7 = vsub.f32 %v2488_v54, %v2573_v6  ;;  %6592 = vmatpush3.msra.mxu0 %v2610_v5 }
 0xa82   : > { %6601 = vmatprep.subr.mxu0 %v7092_v2 }
 0xa83   : > { %v2585_v8 = vmul.f32 1.442695, %v2579_v7 }
 0xa84   : > { %v2576_v9 = vpop.xlane.xlu0 %2575 }
 0xa85   : > { %6958 = vpow2.f32 %v2585_v8  ;;  %v2580_v10 = vsub.f32 %v2562_v57, %v2576_v9  ;;  %v3252_v9 = vld [vmem:[%s8266_s22 + $0x18] sm:$0xff] }
 0xa87   : > { %v2587_v11 = vmul.f32 1.442695, %v2580_v10  ;;  %v3251_v10 = vld [vmem:[%s8266_s22 + $0x10] sm:$0xff] }
 0xa89   : > { %6960 = vpow2.f32 %v2587_v11  ;;  %v3249_v11 = vld [vmem:[%s8266_s22] sm:$0xff] }
 0xa8e   : > { %v6957_v34 = vpop.eup %6956 }
 0xa8f   : > { %v2592_v12 = vsel %vm1088_vm11, %v6957_v34, 0.0 }
 0xa90   : > { %2593 = vadd.xlane.f32.xlu0 %v2592_v12  ;;  %v3348_v12 = vld [vmem:[%s8268_s24 + $0x70] sm:$0xff] }
 0xa92   : > { %v6959_v13 = vpop.eup %6958 }
 0xa93   : > { %v2595_v15 = vsel %vm1088_vm11, %v6959_v13, 0.0 }
 0xa94   : > { %2596 = vadd.xlane.f32.xlu1 %v2595_v15  ;;  %v3346_v15 = vld [vmem:[%s8268_s24 + $0x60] sm:$0xff] }
 0xa96   : > { %v6961_v16 = vpop.eup %6960 }
 0xa97   : > { %v2598_v17 = vsel %vm1088_vm11, %v6961_v16, 0.0 }
 0xa98   : > { %2599 = vadd.xlane.f32.xlu0 %v2598_v17  ;;  %v3344_v17 = vld [vmem:[%s8268_s24 + $0x50] sm:$0xff] }
 0xaa5   : > { %2761 = vrot.lane.b32.xlu1 %v7587_v38, %s8361_s21 }
 0xaa9   : > { %2837 = vrot.lane.b32.xlu1 %v7595_v39, %s8361_s21 }
 0xaae   : > { %2685 = vrot.lane.b32.xlu0 %v7576_v32, %s8361_s21  ;;  %v2244_v32 = vld [vmem:[%s8362_s16] sm:$0xff] }
 0xab1   : > { %v2591_v18 = vpop.xlane.xlu1 %2590 }
 0xab2   : > { %6962 = vrcp.f32 %v2591_v18  ;;  %v3343_v18 = vld [vmem:[%s8268_s24 + $0x48] sm:$0xff] }
 0xabf   : > { %v6963_v19 = vpop.eup %6962 }
 0xac0   : > { %v2605_v20 = vmul.f32 %v6963_v19, %v6955_v63  ;;  %v3342_v19 = vld [vmem:[%s8268_s24 + $0x40] sm:$0xff] }
 0xac2   : > { %6594 = vmatmul.mubr.msk.f32.vlgmr.msra.gmra.mxu0 %vm1088_vm11, %v2605_v20  ;;  %v3341_v20 = vld [vmem:[%s8268_s24 + $0x38] sm:$0xff] }
 0xac3   : > { %6603 = vmatprep.mubr.msk.f32.mxu0 %vm7093_vm7, %v7092_v2 }
 0xb19   : > { %v2594_v21 = vpop.xlane.xlu0 %2593 }
 0xb1a   : > { %6964 = vrcp.f32 %v2594_v21  ;;  %v3340_v21 = vld [vmem:[%s8268_s24 + $0x30] sm:$0xff] }
 0xb1d   : > { %v2597_v22 = vpop.xlane.xlu1 %2596 }
 0xb1e   : > { %6966 = vrcp.f32 %v2597_v22  ;;  %v3339_v22 = vld [vmem:[%s8268_s24 + $0x28] sm:$0xff] }
 0xb21   : > { %v2762_v23 = vpop.permute.xlu1 %2761  ;;  %v2600_v24 = vpop.xlane.xlu0 %2599 }
 0xb22   : > { %6968 = vrcp.f32 %v2600_v24  ;;  %6602 = vmatpush3.msra.mxu0 %v2762_v23  ;;  %v3338_v23 = vld [vmem:[%s8268_s24 + $0x20] sm:$0xff]  ;;  %v3337_v24 = vld [vmem:[%s8268_s24 + $0x18] sm:$0xff] }
 0xb23   : > { %6611 = vmatprep.subr.mxu0 %v7092_v2 }
 0xb25   : > { %v2686_v25 = vpop.permute.xlu0 %2685  ;;  %v2838_v29 = vpop.permute.xlu1 %2837 }
 0xb26   : > { %6597 = vmatpush3.msra.mxu1 %v2686_v25 }
 0xb27   : > { %v6965_v26 = vpop.eup %6964  ;;  %6606 = vmatprep.subr.mxu1 %v7092_v2 }
 0xb28   : > { %v2606_v28 = vmul.f32 %v6965_v26, %v6957_v34  ;;  %v3349_v34 = vld [vmem:[%s8268_s24 + $0x78] sm:$0xff] }
 0xb2a   : > { %6599 = vmatmul.mubr.msk.f32.vlgmr.msra.gmra.mxu1 %vm1088_vm11, %v2606_v28 }
 0xb2b   : > { %v6967_v30 = vpop.eup %6966  ;;  %6607 = vmatpush3.msra.mxu1 %v2838_v29  ;;  %6608 = vmatprep.mubr.msk.f32.mxu1 %vm7093_vm7, %v7092_v2 }
 0xb2c   : > { %v2607_v31 = vmul.f32 %v6967_v30, %v6959_v13  ;;  %6616 = vmatprep.subr.mxu1 %v7092_v2  ;;  %v3347_v13 = vld [vmem:[%s8268_s24 + $0x68] sm:$0xff]  ;;  %v6163_v30 = vld [vmem:[%s8262_s18] ss:$0 sm:$0xff] }
 0xb2e   : > { %6604 = vmatmul.mubr.msk.f32.vlgmr.msra.gmra.mxu0 %vm1088_vm11, %v2607_v31 }
 0xb2f   : > { %v6969_v33 = vpop.eup %6968  ;;  %6612 = vmatpush3.msra.mxu0 %v2244_v32  ;;  %6613 = vmatprep.mubr.msk.f32.mxu0 %vm7093_vm7, %v7092_v2  ;;  %v6164_v32 = vld [vmem:[%s8263_s19] ss:$0 sm:$0xff] }
 0xb30   : > { %v2608_v35 = vmul.f32 %v6969_v33, %v6961_v16  ;;  %6621 = vmatprep.subr.mxu0 %v7092_v2  ;;  %v3345_v16 = vld [vmem:[%s8268_s24 + $0x58] sm:$0xff] }
 0xb32   : > { %6609 = vmatmul.mubr.msk.f32.vlgmr.msra.gmra.mxu1 %vm1088_vm11, %v2608_v35 }
 0xb33   : > { %6618 = vmatprep.mubr.msk.f32.mxu1 %vm7093_vm7, %v7092_v2  ;;  %6617 = vmatpush3.msra.mxu1 %v2245_v36  ;;  %v3336_v36 = vld [vmem:[%s8268_s24 + $0x10] sm:$0xff] }
 0xb34   : > { %6626 = vmatprep.subr.mxu1 %v7092_v2 }
 0xb82   : > { %v2681_v38 = vpop.f32.mrf.mxu0 }
 0xb83   : > { %6614 = vmatmul.mubr.msk.f32.vlgmr.msra.gmra.mxu0 %vm1088_vm11, %v2681_v38  ;;  %v3334_v38 = vld [vmem:[%s8268_s24] sm:$0xff] }
 0xb84   : > { %v6595_v39 = vpop.f32.mrf.mxu0  ;;  %6622 = vmatpush3.msra.mxu0 %v2246_v37  ;;  %6623 = vmatprep.mubr.msk.f32.mxu0 %vm7093_vm7, %v7092_v2  ;;  %v3335_v37 = vld [vmem:[%s8268_s24 + $0x8] sm:$0xff] }
 0xb85   : > { %6631 = vmatprep.subr.mxu0 %v7092_v2  ;;  %v6165_v39 = vld [vmem:[%s8267_s23] ss:$0 sm:$0xff] }
 0xbea   : > { %v2757_v41 = vpop.f32.mrf.mxu1 }
 0xbeb   : > { %6619 = vmatmul.mubr.msk.f32.vlgmr.msra.gmra.mxu1 %vm1088_vm11, %v2757_v41 }
 0xbec   : > { %v6600_v42 = vpop.f32.mrf.mxu1  ;;  %6627 = vmatpush3.msra.mxu1 %v2247_v40  ;;  %6628 = vmatprep.mubr.msk.f32.mxu1 %vm7093_vm7, %v7092_v2 }
 0xbed   : > { %6642 = vmatprep.subr.mxu1 %v7092_v2 }
 0xbee   : > { %v2833_v44 = vpop.f32.mrf.mxu0 }
 0xbef   : > { %6624 = vmatmul.mubr.msk.f32.vlgmr.msra.gmra.mxu0 %vm1088_vm11, %v2833_v44 }
 0xbf0   : > { %v6605_v45 = vpop.f32.mrf.mxu0  ;;  %6639 = vmatprep.mubr.msk.f32.mxu0 %vm7093_vm7, %v7092_v2  ;;  %6632 = vmatpush3.msra.mxu0 %v3252_v9 }
 0xbf1   : > { %6633 = vmatprep.subr.mxu0 %v7092_v2  ;;  %v6167_v45 = vld [vmem:[%s8269_s25] ss:$0 sm:$0xff] }
 0xbf2   : > { %v2909_v46 = vpop.f32.mrf.mxu1  ;;  %6634 = vmatpush3.msra.mxu0 %v3251_v10 }
 0xbf3   : > { %6629 = vmatmul.mubr.msk.f32.vlgmr.msra.gmra.mxu1 %vm1088_vm11, %v2909_v46  ;;  %6635 = vmatprep.subr.mxu0 %v7092_v2 }
 0xbf4   : > { %v6610_v47 = vpop.f32.mrf.mxu1  ;;  %6674 = vmatprep.mubr.msk.f32.mxu1 %vm7093_vm7, %v7092_v2  ;;  %6643 = vmatpush3.msra.mxu1 %v3349_v34 }
 0xbf5   : > { %6644 = vmatprep.subr.mxu1 %v7092_v2 }
 0xbf6   : > { %6645 = vmatpush3.msra.mxu1 %v3348_v12 }
 0xbf7   : > { %6646 = vmatprep.subr.mxu1 %v7092_v2 }
 0xbf8   : > { %6647 = vmatpush3.msra.mxu1 %v3347_v13 }
 0xbf9   : > { %6648 = vmatprep.subr.mxu1 %v7092_v2 }
 0xbfa   : > { %6649 = vmatpush3.msra.mxu1 %v3346_v15 }
 0xbfb   : > { %6650 = vmatprep.subr.mxu1 %v7092_v2 }
 0xbfc   : > { %6651 = vmatpush3.msra.mxu1 %v3345_v16 }
 0xbfd   : > { %6652 = vmatprep.subr.mxu1 %v7092_v2 }
 0xbfe   : > { %6653 = vmatpush3.msra.mxu1 %v3344_v17  ;;  %v7012_v17 = vld [vmem:[%s8347_s9] sm:$0xff] }
 0xbff   : > { %6654 = vmatprep.subr.mxu1 %v7092_v2 }
 0xc00   : > { %6655 = vmatpush3.msra.mxu1 %v3343_v18 }
 0xc01   : > { %6656 = vmatprep.subr.mxu1 %v7092_v2 }
 0xc02   : > { %6657 = vmatpush3.msra.mxu1 %v3342_v19 }
 0xc03   : > { %6658 = vmatprep.subr.mxu1 %v7092_v2 }
 0xc04   : > { %6659 = vmatpush3.msra.mxu1 %v3341_v20 }
 0xc05   : > { %6660 = vmatprep.subr.mxu1 %v7092_v2 }
 0xc06   : > { %6661 = vmatpush3.msra.mxu1 %v3340_v21 }
 0xc07   : > { %6662 = vmatprep.subr.mxu1 %v7092_v2 }
 0xc08   : > { %6663 = vmatpush3.msra.mxu1 %v3339_v22 }
 0xc09   : > { %6664 = vmatprep.subr.mxu1 %v7092_v2 }
 0xc0a   : > { %6665 = vmatpush3.msra.mxu1 %v3338_v23 }
 0xc0b   : > { %6666 = vmatprep.subr.mxu1 %v7092_v2 }
 0xc0c   : > { %6667 = vmatpush3.msra.mxu1 %v3337_v24 }
 0xc0d   : > { %6668 = vmatprep.subr.mxu1 %v7092_v2 }
 0xc0e   : > { %6669 = vmatpush3.msra.mxu1 %v3336_v36 }
 0xc0f   : > { %6670 = vmatprep.subr.mxu1 %v7092_v2 }
 0xc10   : > { %6671 = vmatpush3.msra.mxu1 %v3335_v37 }
 0xc11   : > { %6672 = vmatprep.subr.mxu1 %v7092_v2 }
 0xc12   : > { %6673 = vmatpush3.msra.mxu1 %v3334_v38 }
 0xc13   : > { %6713 = vmatprep.subr.mxu1 %v7092_v2 }
 0xc43   : > { %v2982_v48 = vpop.f32.mrf.mxu0 }
 0xc44   : > { %v3205_v54 = vsel %vm1000_vm10, %v2982_v48, 0.0 }
 0xc45   : > { %v6615_v49 = vpop.f32.mrf.mxu0 }
 0xcab   : > { %v3055_v50 = vpop.f32.mrf.mxu1 }
 0xcac   : > { %v3206_v52 = vsel %vm1000_vm10, %v3055_v50, 0.0 }
 0xcad   : > { %v6620_v51 = vpop.f32.mrf.mxu1  ;;  %v3207_v56 = vadd.f32 %v3206_v52, %v3205_v54 }
 0xcaf   : > { %v3128_v53 = vpop.f32.mrf.mxu0 }
 0xcb0   : > { %v3208_v55 = vsel %vm1000_vm10, %v3128_v53, 0.0 }
 0xcb1   : > { %v6625_v57 = vpop.f32.mrf.mxu0  ;;  %v3209_v58 = vadd.f32 %v3208_v55, %v3207_v56  ;;  %v6173_v56 = vld [vmem:[%s8344_s12 + $0x38] sm:$0xff] }
 0xcb2   : > { %v6172_v57 = vld [vmem:[%s8344_s12 + $0x30] sm:$0xff] }
 0xcb3   : > { %v3201_v59 = vpop.f32.mrf.mxu1 }
 0xcb4   : > { %v3210_v61 = vsel %vm1000_vm10, %v3201_v59, 0.0  ;;  %v6170_v59 = vld [vmem:[%s8344_s12 + $0x20] sm:$0xff] }
 0xcb5   : > { %v3211_v62 = vadd.f32 %v3210_v61, %v3209_v58  ;;  %v6630_v63 = vpop.f32.mrf.mxu1  ;;  %v6171_v58 = vld [vmem:[%s8344_s12 + $0x28] sm:$0xff] }
 0xcb7   : > { %v3218_v0 = vadd.f32 %v6162_v60, %v3211_v62 }
 0xcb9   : > { %v3219_v1 = vadd.f32 %v3218_v0, %v7562_v27  ;;  %v3250_v27 = vld [vmem:[%s8266_s22 + $0x8] sm:$0xff]  ;;  %v6168_v0 = vld [vmem:[%s8264_s20] ss:$0 sm:$0xff] }
 0xcba   : > { %6636 = vmatpush3.msra.mxu0 %v3250_v27 }
 0xcbb   : > { %v3222_v3 = vsel %vm1000_vm10, %v3219_v1, 0.0  ;;  %6637 = vmatprep.subr.mxu0 %v7092_v2 }
 0xcbc   : > { %3223 = vadd.xlane.f32.xlu0 %v3222_v3  ;;  %6638 = vmatpush3.msra.mxu0 %v3249_v11  ;;  %v6169_v3 = vld [vmem:[%s8364_s26] ss:$0 sm:$0xff] }
 0xcbd   : > { %6677 = vmatprep.subr.mxu0 %v7092_v2 }
 0xd45   : > { %v3224_v4 = vpop.xlane.xlu0 %3223 }
 0xd46   : > { %v3225_v5 = vmul.f32 0.03125, %v3224_v4 }
 0xd48   : > { %v3226_v6 = vsub.f32 %v3219_v1, %v3225_v5 }
 0xd4a   : > { %v3227_v7 = vmul.f32 %v3226_v6, %v3226_v6 }
 0xd4c   : > { %v3228_v8 = vsel %vm1000_vm10, %v3227_v7, 0.0 }
 0xd4d   : > { %3229 = vadd.xlane.f32.xlu1 %v3228_v8 }
 0xdd6   : > { %v3230_v25 = vpop.xlane.xlu1 %3229 }
 0xdd7   : > { %v3231_v26 = vmul.f32 0.03125, %v3230_v25 }
 0xdd9   : > { %v3232_v28 = vadd.f32 1e-05, %v3231_v26 }
 0xddb   : > { %6970 = vrsqrt.f32 %v3232_v28 }
 0xde8   : > { %v6971_v29 = vpop.eup %6970 }
 0xde9   : > { %v3234_v31 = vmul.f32 %v6971_v29, %v3226_v6  ;;  %v6175_v6 = vld [vmem:[%s8346_s29 + $0x1] ss:$0 sm:$0xff] }
 0xdeb   : > { %v3241_v33 = vmul.f32 %v6163_v30, %v3234_v31 }
 0xded   : > { %v3248_v35 = vadd.f32 %v6164_v32, %v3241_v33 }
 0xdef   : > { %6640 = vmatmul.mubr.msk.f32.vlgmr.msra.gmra.mxu0 %vm1000_vm10, %v3248_v35 }
 0xdf0   : > { %6685 = vmatprep.mubr.msk.f32.mxu0 %vm7093_vm7, %v7092_v2  ;;  %6678 = vmatpush3.msra.mxu0 %v6173_v56 }
 0xdf1   : > { %6679 = vmatprep.subr.mxu0 %v7092_v2 }
 0xdf2   : > { %6680 = vmatpush3.msra.mxu0 %v6172_v57 }
 0xdf3   : > { %6681 = vmatprep.subr.mxu0 %v7092_v2 }
 0xdf4   : > { %6682 = vmatpush3.msra.mxu0 %v6171_v58 }
 0xdf5   : > { %6683 = vmatprep.subr.mxu0 %v7092_v2 }
 0xdf6   : > { %6684 = vmatpush3.msra.mxu0 %v6170_v59 }
 0xdf7   : > { %6688 = vmatprep.subr.mxu0 %v7092_v2 }
 0xeaf   : > { %v3329_v40 = vpop.f32.mrf.mxu0 }
 0xeb0   : > { %v3330_v41 = vadd.f32 %v6165_v39, %v3329_v40 }
 0xeb1   : > { %v6641_v42 = vpop.f32.mrf.mxu0 }
 0xeb2   : > { %v3333_v44 = vmax.f32 %v3330_v41, 0.0 }
 0xeb4   : > { %6675 = vmatmul.mubr.f32.vlgmr.msra.gmra.mxu1 %v3333_v44 }
 0xeb5   : > { %6715 = vmatprep.mubr.msk.f32.mxu1 %vm7093_vm7, %v7092_v2 }
 0xf74   : > { %v3423_v46 = vpop.f32.mrf.mxu1 }
 0xf75   : > { %v3424_v47 = vadd.f32 %v6167_v45, %v3423_v46 }
 0xf76   : > { %v6676_v48 = vpop.f32.mrf.mxu1 }
 0xf77   : > { %v3427_v49 = vadd.f32 %v3424_v47, %v3248_v35 }
 0xf79   : > { %v3430_v50 = vsel %vm1000_vm10, %v3427_v49, 0.0 }
 0xf7a   : > { %3431 = vadd.xlane.f32.xlu0 %v3430_v50 }
0x1003   : > { %v3432_v51 = vpop.xlane.xlu0 %3431 }
0x1004   : > { %v3433_v52 = vmul.f32 0.03125, %v3432_v51 }
0x1006   : > { %v3434_v53 = vsub.f32 %v3427_v49, %v3433_v52 }
0x1008   : > { %v3435_v54 = vmul.f32 %v3434_v53, %v3434_v53 }
0x100a   : > { %v3436_v55 = vsel %vm1000_vm10, %v3435_v54, 0.0 }
0x100b   : > { %3437 = vadd.xlane.f32.xlu0 %v3436_v55 }
0x1094   : > { %v3438_v60 = vpop.xlane.xlu0 %3437 }
0x1095   : > { %v3439_v61 = vmul.f32 0.03125, %v3438_v60 }
0x1097   : > { %v3440_v62 = vadd.f32 1e-05, %v3439_v61 }
0x1099   : > { %6972 = vrsqrt.f32 %v3440_v62 }
0x10a6   : > { %v6973_v63 = vpop.eup %6972 }
0x10a7   : > { %v3442_v1 = vmul.f32 %v6973_v63, %v3434_v53 }
0x10a9   : > { %v3449_v4 = vmul.f32 %v6168_v0, %v3442_v1 }
0x10ab   : > { %v7812_v5 = vadd.f32 %v6169_v3, %v3449_v4 }
0x10ad   : > { %6686 = vmatmul.mubr.msk.f32.vlgmr.msra.gmra.mxu0 %vm1000_vm10, %v7812_v5 }
0x10ae   : > { %6690 = vmatprep.mubr.msk.f32.mxu0 %vm7093_vm7, %v7092_v2 }
0x116d   : > { %v3539_v7 = vpop.f32.mrf.mxu0 }
0x116e   : > { %v3540_v8 = vadd.f32 %v6175_v6, %v3539_v7 }
0x116f   : > { %v6687_v9 = vpop.f32.mrf.mxu0 }
0x1170   : > { %3553 = vrot.lane.b32.xlu0 %v3540_v8, %s8357_s8  ;;  %3551 = vrot.lane.b32.xlu1 %v3540_v8, %s8358_s2 }
0x1174   : > { %3555 = vrot.lane.b32.xlu1 %v3540_v8, %s8359_s10 }
0x1178   : > { %3557 = vrot.lane.b32.xlu1 %v3540_v8, %s8361_s21 }
0x11e2   : > { %v7825_v10 = vpop.permute.xlu0 %3553  ;;  %v3552_v27 = vpop.permute.xlu1 %3551 }
0x11e3   : > { %3709 = vrot.lane.b32.xlu1 %v7825_v10, %s8361_s21  ;;  %3633 = vrot.lane.b32.xlu0 %v3552_v27, %s8361_s21 }
0x11e6   : > { %v7830_v11 = vpop.permute.xlu1 %3555 }
0x11e7   : > { %3785 = vrot.lane.b32.xlu0 %v7830_v11, %s8361_s21 }
0x11ea   : > { %v3558_v34 = vpop.permute.xlu1 %3557 }
0x11eb   : > { %6689 = vmatpush3.xpose.msk.msra.mxu0 %vm1088_vm11, %v3558_v34 }
0x11ec   : > { %6693 = vmatprep.subr.mxu0 %v7092_v2 }
0x11ee   : > { %6691 = vmatmul.mubr.msk.f32.vlgmr.msra.gmra.mxu0 %vm1088_vm11, %v3540_v8 }
0x11ef   : > { %6695 = vmatprep.mubr.msk.f32.mxu0 %vm7093_vm7, %v7092_v2 }
0x1255   : > { %v3634_v12 = vpop.permute.xlu0 %3633  ;;  %v3710_v13 = vpop.permute.xlu1 %3709 }
0x1256   : > { %6694 = vmatpush3.xpose.msk.msra.mxu0 %vm1088_vm11, %v3634_v12 }
0x1257   : > { %6698 = vmatprep.subr.mxu0 %v7092_v2 }
0x1259   : > { %6696 = vmatmul.mubr.msk.f32.vlgmr.msra.gmra.mxu0 %vm1088_vm11, %v3552_v27  ;;  %v3786_v15 = vpop.permute.xlu0 %3785 }
0x125a   : > { %6699 = vmatpush3.xpose.msk.msra.mxu0 %vm1088_vm11, %v3710_v13  ;;  %6700 = vmatprep.mubr.msk.f32.mxu0 %vm7093_vm7, %v7092_v2  ;;  %v6180_v13 = vld [vmem:[%s8348_s3 + $0x38] sm:$0xff] }
0x125b   : > { %6703 = vmatprep.subr.mxu0 %v7092_v2 }
0x125d   : > { %6701 = vmatmul.mubr.msk.f32.vlgmr.msra.gmra.mxu0 %vm1088_vm11, %v7825_v10 }
0x125e   : > { %6704 = vmatpush3.xpose.msk.msra.mxu0 %vm1088_vm11, %v3786_v15  ;;  %6705 = vmatprep.mubr.msk.f32.mxu0 %vm7093_vm7, %v7092_v2 }
0x125f   : > { %6708 = vmatprep.subr.mxu0 %v7092_v2 }
0x1261   : > { %6706 = vmatmul.mubr.msk.f32.vlgmr.msra.gmra.mxu0 %vm1088_vm11, %v7830_v11 }
0x1262   : > { %6710 = vmatprep.mubr.msk.f32.mxu0 %vm7093_vm7, %v7092_v2 }
0x12ae   : > { %v3629_v16 = vpop.f32.mrf.mxu0 }
0x12af   : > { %v3630_v18 = vadd.f32 %v7012_v17, %v3629_v16 }
0x12b0   : > { %v6692_v19 = vpop.f32.mrf.mxu0 }
0x12b1   : > { %v3861_v20 = vsel %vm1088_vm11, %v3630_v18, -inf }
0x12b2   : > { %3862 = vmax.xlane.f32.xlu1 %v3861_v20 }
0x1319   : > { %v3705_v21 = vpop.f32.mrf.mxu0 }
0x131a   : > { %v3706_v22 = vadd.f32 %v7012_v17, %v3705_v21 }
0x131b   : > { %v6697_v23 = vpop.f32.mrf.mxu0 }
0x131c   : > { %v3864_v24 = vsel %vm1088_vm11, %v3706_v22, -inf }
0x131d   : > { %3865 = vmax.xlane.f32.xlu0 %v3864_v24  ;;  %v3781_v25 = vpop.f32.mrf.mxu0 }
0x131e   : > { %v3782_v26 = vadd.f32 %v7012_v17, %v3781_v25 }
0x131f   : > { %v6702_v28 = vpop.f32.mrf.mxu0 }
0x1320   : > { %v3867_v29 = vsel %vm1088_vm11, %v3782_v26, -inf }
0x1321   : > { %3868 = vmax.xlane.f32.xlu0 %v3867_v29  ;;  %v3857_v30 = vpop.f32.mrf.mxu0 }
0x1322   : > { %v3858_v31 = vadd.f32 %v7012_v17, %v3857_v30 }
0x1323   : > { %v6707_v32 = vpop.f32.mrf.mxu0 }
0x1324   : > { %v3870_v33 = vsel %vm1088_vm11, %v3858_v31, -inf }
0x1325   : > { %3871 = vmax.xlane.f32.xlu1 %v3870_v33 }
0x1336   : > { %3981 = vrot.lane.b32.xlu1 %v3552_v27, %s8365_s11  ;;  %v6178_v27 = vld [vmem:[%s8348_s3 + $0x28] sm:$0xff] }
0x1337   : > { %3905 = vrot.lane.b32.xlu0 %v3540_v8, %s8365_s11  ;;  %v6177_v8 = vld [vmem:[%s8348_s3 + $0x20] sm:$0xff] }
0x133b   : > { %v3863_v35 = vpop.xlane.xlu1 %3862 }
0x133c   : > { %v3873_v36 = vsub.f32 %v3630_v18, %v3863_v35  ;;  %v6198_v35 = vld [vmem:[%s8350_s4 + $0x1] ss:$0 sm:$0xff]  ;;  %s838_s4 = scalar_lea.vmem [#allocation4], %s6113_s0 }
0x133e   : > { %v3877_v37 = vmul.f32 1.442695, %v3873_v36 }
0x1340   : > { %6974 = vpow2.f32 %v3877_v37 }
0x134d   : > { %v6975_v38 = vpop.eup %6974 }
0x134e   : > { %v3885_v39 = vsel %vm1088_vm11, %v6975_v38, 0.0 }
0x1356   : > { %3886 = vadd.xlane.f32.xlu0 %v3885_v39 }
0x13a6   : > { %v3866_v40 = vpop.xlane.xlu0 %3865 }
0x13a7   : > { %v3874_v41 = vsub.f32 %v3706_v22, %v3866_v40 }
0x13a9   : > { %v3879_v42 = vmul.f32 1.442695, %v3874_v41 }
0x13aa   : > { %v3869_v44 = vpop.xlane.xlu0 %3868 }
0x13ab   : > { %6976 = vpow2.f32 %v3879_v42  ;;  %v3875_v45 = vsub.f32 %v3782_v26, %v3869_v44 }
0x13ad   : > { %v3881_v46 = vmul.f32 1.442695, %v3875_v45 }
0x13ae   : > { %v3906_v47 = vpop.permute.xlu0 %3905  ;;  %v3872_v48 = vpop.xlane.xlu1 %3871 }
0x13af   : > { %6978 = vpow2.f32 %v3881_v46  ;;  %v3876_v49 = vsub.f32 %v3858_v31, %v3872_v48  ;;  %6709 = vmatpush3.msra.mxu0 %v3906_v47  ;;  %v6213_v48 = vld [vmem:[%s8258_s14 + $0x38] sm:$0xff] }
0x13b0   : > { %6718 = vmatprep.subr.mxu0 %v7092_v2 }
0x13b1   : > { %v3883_v50 = vmul.f32 1.442695, %v3876_v49  ;;  %v6211_v49 = vld [vmem:[%s8258_s14 + $0x28] sm:$0xff] }
0x13b2   : > { %v3982_v51 = vpop.permute.xlu1 %3981 }
0x13b3   : > { %6980 = vpow2.f32 %v3883_v50  ;;  %6714 = vmatpush3.msra.mxu1 %v3982_v51  ;;  %v6210_v50 = vld [vmem:[%s8258_s14 + $0x20] sm:$0xff]  ;;  %v6206_v51 = vld [vmem:[%s8353_s5 + $0x38] sm:$0xff] }
0x13b4   : > { %6723 = vmatprep.subr.mxu1 %v7092_v2 }
0x13b8   : > { %v6977_v52 = vpop.eup %6976 }
0x13b9   : > { %v3888_v53 = vsel %vm1088_vm11, %v6977_v52, 0.0 }
0x13ba   : > { %3889 = vadd.xlane.f32.xlu1 %v3888_v53  ;;  %v6203_v53 = vld [vmem:[%s8353_s5 + $0x20] sm:$0xff] }
0x13bc   : > { %v6979_v54 = vpop.eup %6978 }
0x13bd   : > { %v3891_v55 = vsel %vm1088_vm11, %v6979_v54, 0.0 }
0x13be   : > { %3892 = vadd.xlane.f32.xlu0 %v3891_v55 }
0x13c0   : > { %v6981_v56 = vpop.eup %6980 }
0x13c1   : > { %v3894_v57 = vsel %vm1088_vm11, %v6981_v56, 0.0 }
0x13c2   : > { %3895 = vadd.xlane.f32.xlu1 %v3894_v57 }
0x13d3   : > { %4057 = vrot.lane.b32.xlu1 %v7825_v10, %s8365_s11 }
0x13d4   : > { %4133 = vrot.lane.b32.xlu0 %v7830_v11, %s8365_s11  ;;  %v6179_v11 = vld [vmem:[%s8348_s3 + $0x30] sm:$0xff]  ;;  %s8373_s3 = sld [smem:[#allocation34_spill]] }
0x13df   : > { %v3887_v58 = vpop.xlane.xlu0 %3886 }
0x13e0   : > { %6982 = vrcp.f32 %v3887_v58  ;;  %v6201_v58 = vld [vmem:[%s8355_s7 + $0x1] ss:$0 sm:$0xff]  ;;  %s8374_s7 = sld [smem:[#allocation35_spill]] }
0x13ed   : > { %v6983_v59 = vpop.eup %6982 }
0x13ee   : > { %v3901_v60 = vmul.f32 %v6983_v59, %v6975_v38 }
0x13f0   : > { %6711 = vmatmul.mubr.msk.f32.vlgmr.msra.gmra.mxu0 %vm1088_vm11, %v3901_v60  ;;  %v6202_v60 = vld [vmem:[%s8356_s30 + $0x1] ss:$0 sm:$0xff] }
0x13f1   : > { %6720 = vmatprep.mubr.msk.f32.mxu0 %vm7093_vm7, %v7092_v2 }
0x1443   : > { %v3890_v61 = vpop.xlane.xlu1 %3889 }
0x1444   : > { %6984 = vrcp.f32 %v3890_v61 }
0x1447   : > { %v3893_v62 = vpop.xlane.xlu0 %3892 }
0x1448   : > { %6986 = vrcp.f32 %v3893_v62 }
0x144b   : > { %v3896_v63 = vpop.xlane.xlu1 %3895  ;;  %v4134_v4 = vpop.permute.xlu0 %4133 }
0x144c   : > { %6988 = vrcp.f32 %v3896_v63  ;;  %v6215_v63 = vld [vmem:[%s8259_s15 + $0x1] ss:$0 sm:$0xff] }
0x144f   : > { %v4058_v0 = vpop.permute.xlu1 %4057 }
0x1450   : > { %6719 = vmatpush3.msra.mxu0 %v4058_v0 }
0x1451   : > { %v6985_v1 = vpop.eup %6984  ;;  %6728 = vmatprep.subr.mxu0 %v7092_v2 }
0x1452   : > { %v3902_v3 = vmul.f32 %v6985_v1, %v6977_v52  ;;  %v6205_v52 = vld [vmem:[%s8353_s5 + $0x30] sm:$0xff] }
0x1454   : > { %6716 = vmatmul.mubr.msk.f32.vlgmr.msra.gmra.mxu1 %vm1088_vm11, %v3902_v3 }
0x1455   : > { %v6987_v6 = vpop.eup %6986  ;;  %6724 = vmatpush3.msra.mxu1 %v4134_v4  ;;  %6725 = vmatprep.mubr.msk.f32.mxu1 %vm7093_vm7, %v7092_v2 }
0x1456   : > { %v3903_v7 = vmul.f32 %v6987_v6, %v6979_v54  ;;  %6733 = vmatprep.subr.mxu1 %v7092_v2  ;;  %v6208_v6 = vld [vmem:[%s8257_s13 + $0x1] ss:$0 sm:$0xff] }
0x1458   : > { %6721 = vmatmul.mubr.msk.f32.vlgmr.msra.gmra.mxu0 %vm1088_vm11, %v3903_v7 }
0x1459   : > { %v6989_v9 = vpop.eup %6988  ;;  %6729 = vmatpush3.msra.mxu0 %v6177_v8  ;;  %6730 = vmatprep.mubr.msk.f32.mxu0 %vm7093_vm7, %v7092_v2 }
0x145a   : > { %v3904_v10 = vmul.f32 %v6989_v9, %v6981_v56  ;;  %6738 = vmatprep.subr.mxu0 %v7092_v2 }
0x145c   : > { %6726 = vmatmul.mubr.msk.f32.vlgmr.msra.gmra.mxu1 %vm1088_vm11, %v3904_v10 }
0x145d   : > { %6735 = vmatprep.mubr.msk.f32.mxu1 %vm7093_vm7, %v7092_v2  ;;  %6734 = vmatpush3.msra.mxu1 %v6178_v27 }
0x145e   : > { %6743 = vmatprep.subr.mxu1 %v7092_v2 }
0x14b0   : > { %v3977_v34 = vpop.f32.mrf.mxu0 }
0x14b1   : > { %6731 = vmatmul.mubr.msk.f32.vlgmr.msra.gmra.mxu0 %vm1088_vm11, %v3977_v34 }
0x14b2   : > { %v6712_v12 = vpop.f32.mrf.mxu0  ;;  %6739 = vmatpush3.msra.mxu0 %v6179_v11  ;;  %6740 = vmatprep.mubr.msk.f32.mxu0 %vm7093_vm7, %v7092_v2 }
0x14b3   : > { %6748 = vmatprep.subr.mxu0 %v7092_v2 }
0x1514   : > { %v4053_v15 = vpop.f32.mrf.mxu1 }
0x1515   : > { %6736 = vmatmul.mubr.msk.f32.vlgmr.msra.gmra.mxu1 %vm1088_vm11, %v4053_v15 }
0x1516   : > { %v6717_v16 = vpop.f32.mrf.mxu1  ;;  %6744 = vmatpush3.msra.mxu1 %v6180_v13  ;;  %6745 = vmatprep.mubr.msk.f32.mxu1 %vm7093_vm7, %v7092_v2 }
0x1517   : > { %6759 = vmatprep.subr.mxu1 %v7092_v2 }
0x1518   : > { %v4129_v17 = vpop.f32.mrf.mxu0 }
0x1519   : > { %6741 = vmatmul.mubr.msk.f32.vlgmr.msra.gmra.mxu0 %vm1088_vm11, %v4129_v17 }
0x151a   : > { %v6722_v18 = vpop.f32.mrf.mxu0  ;;  %6756 = vmatprep.mubr.msk.f32.mxu0 %vm7093_vm7, %v7092_v2  ;;  %6749 = vmatpush3.msra.mxu0 %v6206_v51 }
0x151b   : > { %6750 = vmatprep.subr.mxu0 %v7092_v2 }
0x151c   : > { %v4205_v19 = vpop.f32.mrf.mxu1  ;;  %6751 = vmatpush3.msra.mxu0 %v6205_v52 }
0x151d   : > { %6746 = vmatmul.mubr.msk.f32.vlgmr.msra.gmra.mxu1 %vm1088_vm11, %v4205_v19  ;;  %6752 = vmatprep.subr.mxu0 %v7092_v2  ;;  %v7013_v19 = vld [vmem:[%s7613_s6] ss:$0 sm:$0xff]  ;;  %s6019_s6 = scalar_lea.sflag [#allocation5], %s836_s27 }
0x151e   : > { %v6727_v20 = vpop.f32.mrf.mxu1  ;;  %6767 = vmatprep.mubr.msk.f32.mxu1 %vm7093_vm7, %v7092_v2  ;;  %6760 = vmatpush3.msra.mxu1 %v6213_v48 }
0x151f   : > { %6761 = vmatprep.subr.mxu1 %v7092_v2 }
0x1571   : > { %v4278_v21 = vpop.f32.mrf.mxu0 }
0x1572   : > { %v4501_v28 = vsel %vm1000_vm10, %v4278_v21, 0.0 }
0x1573   : > { %v6732_v22 = vpop.f32.mrf.mxu0 }
0x15d5   : > { %v4351_v23 = vpop.f32.mrf.mxu1 }
0x15d6   : > { %v4502_v25 = vsel %vm1000_vm10, %v4351_v23, 0.0 }
0x15d7   : > { %v6737_v24 = vpop.f32.mrf.mxu1  ;;  %v4503_v30 = vadd.f32 %v4502_v25, %v4501_v28 }
0x15d9   : > { %v4424_v26 = vpop.f32.mrf.mxu0 }
0x15da   : > { %v4504_v29 = vsel %vm1000_vm10, %v4424_v26, 0.0 }
0x15db   : > { %v6742_v31 = vpop.f32.mrf.mxu0  ;;  %v4505_v32 = vadd.f32 %v4504_v29, %v4503_v30 }
0x15dd   : > { %v4497_v33 = vpop.f32.mrf.mxu1 }
0x15de   : > { %v4506_v36 = vsel %vm1000_vm10, %v4497_v33, 0.0 }
0x15df   : > { %v4507_v37 = vadd.f32 %v4506_v36, %v4505_v32  ;;  %v6747_v38 = vpop.f32.mrf.mxu1 }
0x15e1   : > { %v4514_v39 = vadd.f32 %v6198_v35, %v4507_v37 }
0x15e3   : > { %v4515_v40 = vadd.f32 %v4514_v39, %v7812_v5  ;;  %v6212_v5 = vld [vmem:[%s8258_s14 + $0x30] sm:$0xff] }
0x15e4   : > { %6762 = vmatpush3.msra.mxu1 %v6212_v5 }
0x15e5   : > { %v4520_v41 = vsel %vm1000_vm10, %v4515_v40, 0.0  ;;  %6763 = vmatprep.subr.mxu1 %v7092_v2 }
0x15e6   : > { %4521 = vadd.xlane.f32.xlu1 %v4520_v41  ;;  %6764 = vmatpush3.msra.mxu1 %v6211_v49 }
0x15e7   : > { %6765 = vmatprep.subr.mxu1 %v7092_v2 }
0x15e8   : > { %6766 = vmatpush3.msra.mxu1 %v6210_v50 }
0x15e9   : > { %6768 = vmatmul.mubr.msk.f32.vlgmr.msra.gmra.mxu1 %vm1000_vm10, %v7533_v14  ;;  %6775 = vmatprep.subr.mxu1 %v7092_v2  ;;  %v6204_v14 = vld [vmem:[%s8353_s5 + $0x28] sm:$0xff]  ;;  %s6032_s5 = sshll.u32 %s838_s4, 4  ;;  %s6033_s5 = int_to_ptr.vmem [resolvable:$true] %s6032_s5 }
0x15ea   : > { %6777 = vmatprep.mubr.msk.f32.mxu1 %vm7093_vm7, %v7092_v2  ;;  %6753 = vmatpush3.msra.mxu0 %v6204_v14  ;;  %s7026_s9 = scalar_lea.vmem %s6033_s5, 128 }
0x15eb   : > { %6754 = vmatprep.subr.mxu0 %v7092_v2  ;;  %p7027_p2 = scmp.ne.s32.totalorder %s6033_s5, %s7026_s9 }
0x15ec   : > { %6755 = vmatpush3.msra.mxu0 %v6203_v53 }
0x15ed   : > { %6770 = vmatprep.subr.mxu0 %v7092_v2  ;;  %p7028_p3 = pnand %p7027_p2, %p7286_p10 }
0x15ef   : > { %p7029_p4 = pneg %p7028_p3 }
0x166f   : > { %v4522_v42 = vpop.xlane.xlu1 %4521 }
0x1670   : > { %v4523_v44 = vmul.f32 0.03125, %v4522_v42 }
0x1672   : > { %v4524_v45 = vsub.f32 %v4515_v40, %v4523_v44 }
0x1674   : > { %v4525_v46 = vmul.f32 %v4524_v45, %v4524_v45 }
0x1676   : > { %v4526_v47 = vsel %vm1000_vm10, %v4525_v46, 0.0 }
0x1677   : > { %4527 = vadd.xlane.f32.xlu0 %v4526_v47 }
0x16a9   : > { %v4712_v0 = vpop.f32.mrf.mxu1 }
0x16aa   : > { %v4713_v1 = vadd.f32 %v6215_v63, %v4712_v0 }
0x16ab   : > { %v6769_v3 = vpop.f32.mrf.mxu1 }
0x16ac   : > { %4731 = vrot.lane.b32.xlu0 %v4713_v1, %s8358_s2  ;;  %4733 = vrot.lane.b32.xlu1 %v4713_v1, %s8357_s8 }
0x16b0   : > { %4735 = vrot.lane.b32.xlu0 %v4713_v1, %s8359_s10 }
0x1700   : > { %v4528_v54 = vpop.xlane.xlu0 %4527 }
0x1701   : > { %v4529_v55 = vmul.f32 0.03125, %v4528_v54 }
0x1703   : > { %v4530_v56 = vadd.f32 1e-05, %v4529_v55 }
0x1705   : > { %6990 = vrsqrt.f32 %v4530_v56 }
0x1712   : > { %v6991_v57 = vpop.eup %6990 }
0x1713   : > { %v4532_v59 = vmul.f32 %v6991_v57, %v4524_v45 }
0x1715   : > { %v4539_v61 = vmul.f32 %v6201_v58, %v4532_v59 }
0x1717   : > { %v7969_v62 = vadd.f32 %v6202_v60, %v4539_v61 }
0x1719   : > { %6757 = vmatmul.mubr.msk.f32.vlgmr.msra.gmra.mxu0 %vm1000_vm10, %v7969_v62 }
0x171a   : > { %6772 = vmatprep.mubr.msk.f32.mxu0 %vm7093_vm7, %v7092_v2  ;;  %6771 = vmatpush3.xpose.msk.msra.mxu0 %vm1088_vm11, %v4713_v1 }
0x171b   : > { %6780 = vmatprep.subr.mxu0 %v7092_v2 }
0x171e   : > { %v4732_v4 = vpop.permute.xlu0 %4731  ;;  %v7988_v10 = vpop.permute.xlu1 %4733 }
0x171f   : > { %6776 = vmatpush3.xpose.msk.msra.mxu1 %vm1088_vm11, %v4732_v4 }
0x1720   : > { %6785 = vmatprep.subr.mxu1 %v7092_v2 }
0x1722   : > { %v7999_v27 = vpop.permute.xlu0 %4735 }
0x17d9   : > { %v4629_v7 = vpop.f32.mrf.mxu0 }
0x17da   : > { %v4630_v8 = vadd.f32 %v6208_v6, %v4629_v7 }
0x17db   : > { %v6758_v9 = vpop.f32.mrf.mxu0 }
0x17dc   : > { %4728 = vrot.lane.b32.xlu0 %v4630_v8, %s8359_s10  ;;  %4724 = vrot.lane.b32.xlu1 %v4630_v8, %s8358_s2  ;;  %s8366_s10 = sld [smem:[#allocation30_spill]] }
0x17dd   : > { %6773 = vmatmul.mubr.msk.f32.vlgmr.msra.gmra.mxu0 %vm1088_vm11, %v4630_v8 }
0x17de   : > { %6781 = vmatpush3.xpose.msk.msra.mxu0 %vm1088_vm11, %v7988_v10  ;;  %6782 = vmatprep.mubr.msk.f32.mxu0 %vm7093_vm7, %v7092_v2 }
0x17df   : > { %6790 = vmatprep.subr.mxu0 %v7092_v2 }
0x17e0   : > { %4726 = vrot.lane.b32.xlu1 %v4630_v8, %s8357_s8 }
0x17e2   : > { %v6217_v6 = vld [vmem:[%s8366_s10 + $0x20] sm:$0xff]  ;;  %v6218_v7 = vld [vmem:[%s8366_s10 + $0x28] sm:$0xff]  ;;  %v6219_v8 = vld [vmem:[%s8366_s10 + $0x30] sm:$0xff] }
0x184e   : > { %v4725_v11 = vpop.permute.xlu1 %4724  ;;  %v4729_v34 = vpop.permute.xlu0 %4728 }
0x184f   : > { %6778 = vmatmul.mubr.msk.f32.vlgmr.msra.gmra.mxu1 %vm1088_vm11, %v4725_v11 }
0x1850   : > { %6786 = vmatpush3.xpose.msk.msra.mxu1 %vm1088_vm11, %v7999_v27  ;;  %6787 = vmatprep.mubr.msk.f32.mxu1 %vm7093_vm7, %v7092_v2 }
0x1851   : > { %6795 = vmatprep.subr.mxu1 %v7092_v2 }
0x1852   : > { %v4727_v12 = vpop.permute.xlu1 %4726 }
0x1853   : > { %6783 = vmatmul.mubr.msk.f32.vlgmr.msra.gmra.mxu0 %vm1088_vm11, %v4727_v12  ;;  %6788 = vmatmul.mubr.msk.f32.vlgmr.msra.gmra.mxu1 %vm1088_vm11, %v4729_v34 }
0x1854   : > { %6792 = vmatprep.mubr.msk.f32.mxu0 %vm7093_vm7, %v7092_v2  ;;  %6797 = vmatprep.mubr.msk.f32.mxu1 %vm7093_vm7, %v7092_v2 }
0x189d   : > { %v4807_v13 = vpop.f32.mrf.mxu0 }
0x189e   : > { %v4808_v15 = vadd.f32 %v7616_v43, %v4807_v13 }
0x189f   : > { %v6774_v16 = vpop.f32.mrf.mxu0 }
0x18a0   : > { %v5033_v17 = vsel %vm1088_vm11, %v4808_v15, -inf }
0x18a1   : > { %5034 = vmax.xlane.f32.xlu1 %v5033_v17 }
0x190f   : > { %v4881_v18 = vpop.f32.mrf.mxu1 }
0x1910   : > { %v4882_v20 = vadd.f32 %v7013_v19, %v4881_v18 }
0x1911   : > { %v6779_v21 = vpop.f32.mrf.mxu1 }
0x1912   : > { %v5036_v22 = vsel %vm1088_vm11, %v4882_v20, -inf }
0x1913   : > { %5037 = vmax.xlane.f32.xlu0 %v5036_v22  ;;  %v4955_v23 = vpop.f32.mrf.mxu0  ;;  %v5029_v24 = vpop.f32.mrf.mxu1 }
0x1914   : > { %v4956_v25 = vadd.f32 %v7013_v19, %v4955_v23  ;;  %v5030_v26 = vadd.f32 %v7013_v19, %v5029_v24 }
0x1915   : > { %v6784_v28 = vpop.f32.mrf.mxu0  ;;  %v6789_v29 = vpop.f32.mrf.mxu1 }
0x1916   : > { %v5042_v30 = vsel %vm1088_vm11, %v5030_v26, -inf  ;;  %v5039_v43 = vsel %vm1088_vm11, %v4956_v25, -inf }
0x1917   : > { %5043 = vmax.xlane.f32.xlu1 %v5042_v30  ;;  %5040 = vmax.xlane.f32.xlu0 %v5039_v43  ;;  %v6238_v43 = vld [vmem:[%s8367_s28 + $0x1] ss:$0 sm:$0xff]  ;;  %s8371_s28 = sld [smem:[#allocation16_spill]] }
0x1928   : > { %5153 = vrot.lane.b32.xlu1 %v4732_v4, %s8361_s21 }
0x192a   : > { %v5035_v31 = vpop.xlane.xlu1 %5034 }
0x192b   : > { %v5045_v32 = vsub.f32 %v4808_v15, %v5035_v31 }
0x192d   : > { %5077 = vrot.lane.b32.xlu0 %v4713_v1, %s8361_s21  ;;  %v5049_v33 = vmul.f32 1.442695, %v5045_v32 }
0x192f   : > { %6992 = vpow2.f32 %v5049_v33 }
0x193c   : > { %v6993_v35 = vpop.eup %6992 }
0x193d   : > { %v5057_v36 = vsel %vm1088_vm11, %v6993_v35, 0.0 }
0x194c   : > { %5058 = vadd.xlane.f32.xlu0 %v5057_v36 }
0x199c   : > { %v5038_v37 = vpop.xlane.xlu0 %5037 }
0x199d   : > { %v5046_v38 = vsub.f32 %v4882_v20, %v5038_v37 }
0x199f   : > { %v5051_v39 = vmul.f32 1.442695, %v5046_v38 }
0x19a0   : > { %v5044_v40 = vpop.xlane.xlu1 %5043  ;;  %v5041_v41 = vpop.xlane.xlu0 %5040 }
0x19a1   : > { %6994 = vpow2.f32 %v5051_v39  ;;  %v5048_v42 = vsub.f32 %v5030_v26, %v5044_v40  ;;  %v5047_v44 = vsub.f32 %v4956_v25, %v5041_v41 }
0x19a3   : > { %v5055_v45 = vmul.f32 1.442695, %v5048_v42  ;;  %v5053_v46 = vmul.f32 1.442695, %v5047_v44  ;;  %v6246_v42 = vld [vmem:[%s8266_s22 + $0x38] sm:$0xff]  ;;  %v6244_v44 = vld [vmem:[%s8266_s22 + $0x28] sm:$0xff] }
0x19a4   : > { %v5154_v47 = vpop.permute.xlu1 %5153  ;;  %v5078_v48 = vpop.permute.xlu0 %5077 }
0x19a5   : > { %6996 = vpow2.f32 %v5055_v45  ;;  %6791 = vmatpush3.msra.mxu0 %v5078_v48  ;;  %6796 = vmatpush3.msra.mxu1 %v5154_v47  ;;  %v6243_v45 = vld [vmem:[%s8266_s22 + $0x20] sm:$0xff]  ;;  %v6264_v47 = vld [vmem:[%s8268_s24 + $0xf0] sm:$0xff]  ;;  %v6263_v48 = vld [vmem:[%s8268_s24 + $0xe8] sm:$0xff] }
0x19a6   : > { %6998 = vpow2.f32 %v5053_v46  ;;  %6800 = vmatprep.subr.mxu0 %v7092_v2  ;;  %6805 = vmatprep.subr.mxu1 %v7092_v2  ;;  %v6265_v46 = vld [vmem:[%s8268_s24 + $0xf8] sm:$0xff] }
0x19ae   : > { %v6995_v5 = vpop.eup %6994 }
0x19af   : > { %v5060_v49 = vsel %vm1088_vm11, %v6995_v5, 0.0 }
0x19b0   : > { %5061 = vadd.xlane.f32.xlu1 %v5060_v49  ;;  %v6261_v49 = vld [vmem:[%s8268_s24 + $0xd8] sm:$0xff] }
0x19b2   : > { %v6997_v50 = vpop.eup %6996 }
0x19b3   : > { %v6999_v51 = vpop.eup %6998  ;;  %v5066_v52 = vsel %vm1088_vm11, %v6997_v50, 0.0 }
0x19b4   : > { %5067 = vadd.xlane.f32.xlu1 %v5066_v52  ;;  %v5063_v14 = vsel %vm1088_vm11, %v6999_v51, 0.0  ;;  %v6258_v52 = vld [vmem:[%s8268_s24 + $0xc0] sm:$0xff] }
0x19b5   : > { %5064 = vadd.xlane.f32.xlu0 %v5063_v14  ;;  %v6257_v14 = vld [vmem:[%s8268_s24 + $0xb8] sm:$0xff] }
0x19c5   : > { %5229 = vrot.lane.b32.xlu1 %v7988_v10, %s8361_s21 }
0x19cb   : > { %5305 = vrot.lane.b32.xlu0 %v7999_v27, %s8361_s21  ;;  %v6220_v27 = vld [vmem:[%s8366_s10 + $0x38] sm:$0xff]  ;;  %s8368_s10 = sld [smem:[#allocation33_spill]] }
0x19d1   : > { %s8369_s21 = smov %s8368_s10 }
0x19d5   : > { %v5059_v53 = vpop.xlane.xlu0 %5058 }
0x19d6   : > { %7000 = vrcp.f32 %v5059_v53  ;;  %v6256_v53 = vld [vmem:[%s8268_s24 + $0xb0] sm:$0xff] }
0x19e3   : > { %v7001_v54 = vpop.eup %7000 }
0x19e4   : > { %v5073_v55 = vmul.f32 %v7001_v54, %v6993_v35  ;;  %v6255_v54 = vld [vmem:[%s8268_s24 + $0xa8] sm:$0xff] }
0x19e6   : > { %6793 = vmatmul.mubr.msk.f32.vlgmr.msra.gmra.mxu0 %vm1088_vm11, %v5073_v55  ;;  %v6254_v55 = vld [vmem:[%s8268_s24 + $0xa0] sm:$0xff] }
0x19e7   : > { %6802 = vmatprep.mubr.msk.f32.mxu0 %vm7093_vm7, %v7092_v2 }
0x1a39   : > { %v5062_v56 = vpop.xlane.xlu1 %5061 }
0x1a3a   : > { %7002 = vrcp.f32 %v5062_v56  ;;  %v6253_v56 = vld [vmem:[%s8268_s24 + $0x98] sm:$0xff] }
0x1a3d   : > { %v5068_v57 = vpop.xlane.xlu1 %5067 }
0x1a3e   : > { %7004 = vrcp.f32 %v5068_v57  ;;  %v5065_v58 = vpop.xlane.xlu0 %5064 }
0x1a3f   : > { %7006 = vrcp.f32 %v5065_v58 }
0x1a41   : > { %v5230_v59 = vpop.permute.xlu1 %5229 }
0x1a42   : > { %6801 = vmatpush3.msra.mxu0 %v5230_v59  ;;  %v5306_v63 = vpop.permute.xlu0 %5305 }
0x1a43   : > { %6810 = vmatprep.subr.mxu0 %v7092_v2 }
0x1a47   : > { %v7003_v60 = vpop.eup %7002 }
0x1a48   : > { %v5074_v61 = vmul.f32 %v7003_v60, %v6995_v5  ;;  %v6262_v5 = vld [vmem:[%s8268_s24 + $0xe0] sm:$0xff] }
0x1a4a   : > { %6798 = vmatmul.mubr.msk.f32.vlgmr.msra.gmra.mxu1 %vm1088_vm11, %v5074_v61  ;;  %v6241_v61 = vld [vmem:[%s8262_s18 + $0x1] ss:$0 sm:$0xff] }
0x1a4b   : > { %v7005_v0 = vpop.eup %7004  ;;  %6806 = vmatpush3.msra.mxu1 %v5306_v63  ;;  %6807 = vmatprep.mubr.msk.f32.mxu1 %vm7093_vm7, %v7092_v2 }
0x1a4c   : > { %v7007_v1 = vpop.eup %7006  ;;  %v5076_v3 = vmul.f32 %v7005_v0, %v6997_v50  ;;  %6815 = vmatprep.subr.mxu1 %v7092_v2  ;;  %v6260_v50 = vld [vmem:[%s8268_s24 + $0xd0] sm:$0xff]  ;;  %v6242_v0 = vld [vmem:[%s8263_s19 + $0x1] ss:$0 sm:$0xff] }
0x1a4d   : > { %v5075_v4 = vmul.f32 %v7007_v1, %v6999_v51  ;;  %v6259_v51 = vld [vmem:[%s8268_s24 + $0xc8] sm:$0xff] }
0x1a4e   : > { %6808 = vmatmul.mubr.msk.f32.vlgmr.msra.gmra.mxu1 %vm1088_vm11, %v5076_v3 }
0x1a4f   : > { %6803 = vmatmul.mubr.msk.f32.vlgmr.msra.gmra.mxu0 %vm1088_vm11, %v5075_v4  ;;  %6817 = vmatprep.mubr.msk.f32.mxu1 %vm7093_vm7, %v7092_v2  ;;  %v6252_v4 = vld [vmem:[%s8268_s24 + $0x90] sm:$0xff] }
0x1a50   : > { %6811 = vmatpush3.msra.mxu0 %v6217_v6  ;;  %6812 = vmatprep.mubr.msk.f32.mxu0 %vm7093_vm7, %v7092_v2  ;;  %v6251_v6 = vld [vmem:[%s8268_s24 + $0x88] sm:$0xff] }
0x1a51   : > { %6820 = vmatprep.subr.mxu0 %v7092_v2  ;;  %6816 = vmatpush3.msra.mxu1 %v6218_v7  ;;  %v6250_v7 = vld [vmem:[%s8268_s24 + $0x80] sm:$0xff] }
0x1a52   : > { %6825 = vmatprep.subr.mxu1 %v7092_v2 }
0x1aa6   : > { %v5149_v9 = vpop.f32.mrf.mxu0 }
0x1aa7   : > { %6813 = vmatmul.mubr.msk.f32.vlgmr.msra.gmra.mxu0 %vm1088_vm11, %v5149_v9 }
0x1aa8   : > { %v6794_v10 = vpop.f32.mrf.mxu0  ;;  %6821 = vmatpush3.msra.mxu0 %v6219_v8  ;;  %6822 = vmatprep.mubr.msk.f32.mxu0 %vm7093_vm7, %v7092_v2  ;;  %v6248_v8 = vld [vmem:[%s8267_s23 + $0x1] ss:$0 sm:$0xff] }
0x1aa9   : > { %6830 = vmatprep.subr.mxu0 %v7092_v2 }
0x1b0a   : > { %v5225_v11 = vpop.f32.mrf.mxu1 }
0x1b0b   : > { %6818 = vmatmul.mubr.msk.f32.vlgmr.msra.gmra.mxu1 %vm1088_vm11, %v5225_v11 }
0x1b0c   : > { %v6799_v34 = vpop.f32.mrf.mxu1  ;;  %6826 = vmatpush3.msra.mxu1 %v6220_v27  ;;  %6827 = vmatprep.mubr.msk.f32.mxu1 %vm7093_vm7, %v7092_v2 }
0x1b0d   : > { %6841 = vmatprep.subr.mxu1 %v7092_v2  ;;  %v6267_v34 = vld [vmem:[%s8269_s25 + $0x1] ss:$0 sm:$0xff] }
0x1b0e   : > { %v5377_v12 = vpop.f32.mrf.mxu1 }
0x1b0f   : > { %v5301_v13 = vpop.f32.mrf.mxu0  ;;  %6828 = vmatmul.mubr.msk.f32.vlgmr.msra.gmra.mxu1 %vm1088_vm11, %v5377_v12 }
0x1b10   : > { %6823 = vmatmul.mubr.msk.f32.vlgmr.msra.gmra.mxu0 %vm1088_vm11, %v5301_v13  ;;  %v6809_v15 = vpop.f32.mrf.mxu1  ;;  %6873 = vmatprep.mubr.msk.f32.mxu1 %vm7093_vm7, %v7092_v2 }
0x1b11   : > { %v6804_v16 = vpop.f32.mrf.mxu0  ;;  %6838 = vmatprep.mubr.msk.f32.mxu0 %vm7093_vm7, %v7092_v2  ;;  %6831 = vmatpush3.msra.mxu0 %v6246_v42 }
0x1b12   : > { %6832 = vmatprep.subr.mxu0 %v7092_v2  ;;  %6842 = vmatpush3.msra.mxu1 %v6265_v46 }
0x1b13   : > { %6843 = vmatprep.subr.mxu1 %v7092_v2 }
0x1b14   : > { %6844 = vmatpush3.msra.mxu1 %v6264_v47 }
0x1b15   : > { %6845 = vmatprep.subr.mxu1 %v7092_v2 }
0x1b16   : > { %6846 = vmatpush3.msra.mxu1 %v6263_v48 }
0x1b17   : > { %6847 = vmatprep.subr.mxu1 %v7092_v2 }
0x1b18   : > { %6848 = vmatpush3.msra.mxu1 %v6262_v5 }
0x1b19   : > { %6849 = vmatprep.subr.mxu1 %v7092_v2 }
0x1b1a   : > { %6850 = vmatpush3.msra.mxu1 %v6261_v49 }
0x1b1b   : > { %6851 = vmatprep.subr.mxu1 %v7092_v2 }
0x1b1c   : > { %6852 = vmatpush3.msra.mxu1 %v6260_v50 }
0x1b1d   : > { %6853 = vmatprep.subr.mxu1 %v7092_v2 }
0x1b1e   : > { %6854 = vmatpush3.msra.mxu1 %v6259_v51 }
0x1b1f   : > { %6855 = vmatprep.subr.mxu1 %v7092_v2 }
0x1b20   : > { %6856 = vmatpush3.msra.mxu1 %v6258_v52 }
0x1b21   : > { %6857 = vmatprep.subr.mxu1 %v7092_v2 }
0x1b22   : > { %6858 = vmatpush3.msra.mxu1 %v6257_v14 }
0x1b23   : > { %6859 = vmatprep.subr.mxu1 %v7092_v2 }
0x1b24   : > { %6860 = vmatpush3.msra.mxu1 %v6256_v53 }
0x1b25   : > { %6861 = vmatprep.subr.mxu1 %v7092_v2 }
0x1b26   : > { %6862 = vmatpush3.msra.mxu1 %v6255_v54 }
0x1b27   : > { %6863 = vmatprep.subr.mxu1 %v7092_v2 }
0x1b28   : > { %6864 = vmatpush3.msra.mxu1 %v6254_v55 }
0x1b29   : > { %6865 = vmatprep.subr.mxu1 %v7092_v2 }
0x1b2a   : > { %6866 = vmatpush3.msra.mxu1 %v6253_v56 }
0x1b2b   : > { %6867 = vmatprep.subr.mxu1 %v7092_v2 }
0x1b2c   : > { %6868 = vmatpush3.msra.mxu1 %v6252_v4 }
0x1b2d   : > { %6869 = vmatprep.subr.mxu1 %v7092_v2 }
0x1b2e   : > { %6870 = vmatpush3.msra.mxu1 %v6251_v6 }
0x1b2f   : > { %6871 = vmatprep.subr.mxu1 %v7092_v2 }
0x1b30   : > { %6872 = vmatpush3.msra.mxu1 %v6250_v7 }
0x1b67   : > { %v5450_v17 = vpop.f32.mrf.mxu0 }
0x1b68   : > { %v5673_v22 = vsel %vm1000_vm10, %v5450_v17, 0.0 }
0x1b69   : > { %v6814_v18 = vpop.f32.mrf.mxu0 }
0x1bcb   : > { %v5523_v19 = vpop.f32.mrf.mxu1 }
0x1bcc   : > { %v5674_v20 = vsel %vm1000_vm10, %v5523_v19, 0.0 }
0x1bcd   : > { %v6819_v21 = vpop.f32.mrf.mxu1  ;;  %v5675_v24 = vadd.f32 %v5674_v20, %v5673_v22 }
0x1bcf   : > { %v5669_v23 = vpop.f32.mrf.mxu1 }
0x1bd0   : > { %v5596_v25 = vpop.f32.mrf.mxu0  ;;  %v5678_v31 = vsel %vm1000_vm10, %v5669_v23, 0.0  ;;  %v5936_v23 = vld [vmem:[%s8368_s10 + $0x18] sm:$0xff]  ;;  %s8209_s10 = scalar_lea.hbm %s8374_s7, %s8371_s28 }
0x1bd1   : > { %v5676_v26 = vsel %vm1000_vm10, %v5596_v25, 0.0  ;;  %v6829_v28 = vpop.f32.mrf.mxu1  ;;  %v5934_v25 = vld [vmem:[%s8369_s21 + $0x8] sm:$0xff] }
0x1bd2   : > { %v5677_v29 = vadd.f32 %v5676_v26, %v5675_v24  ;;  %v6824_v30 = vpop.f32.mrf.mxu0  ;;  %v5935_v24 = vld [vmem:[%s8369_s21 + $0x10] sm:$0xff]  ;;  %v5933_v26 = vld [vmem:[%s8369_s21] sm:$0xff] }
0x1bd4   : > { %v5679_v32 = vadd.f32 %v5678_v31, %v5677_v29  ;;  %v6270_v31 = vld [vmem:[%s8264_s20 + $0x1] ss:$0 sm:$0xff] }
0x1bd6   : > { %v5686_v33 = vadd.f32 %v6238_v43, %v5679_v32 }
0x1bd8   : > { %v5687_v35 = vadd.f32 %v5686_v33, %v7969_v62  ;;  %v6245_v62 = vld [vmem:[%s8266_s22 + $0x30] sm:$0xff]  ;;  %v6271_v33 = vld [vmem:[%s8364_s26 + $0x1] ss:$0 sm:$0xff] }
0x1bd9   : > { %6833 = vmatpush3.msra.mxu0 %v6245_v62 }
0x1bda   : > { %v5692_v36 = vsel %vm1000_vm10, %v5687_v35, 0.0  ;;  %6834 = vmatprep.subr.mxu0 %v7092_v2 }
0x1bdb   : > { %5693 = vadd.xlane.f32.xlu1 %v5692_v36  ;;  %6835 = vmatpush3.msra.mxu0 %v6244_v44 }
0x1bdc   : > { %6836 = vmatprep.subr.mxu0 %v7092_v2 }
0x1bdd   : > { %6837 = vmatpush3.msra.mxu0 %v6243_v45 }
0x1bde   : > { %6876 = vmatprep.subr.mxu0 %v7092_v2 }
0x1c64   : > { %v5694_v37 = vpop.xlane.xlu1 %5693 }
0x1c65   : > { %v5695_v38 = vmul.f32 0.03125, %v5694_v37 }
0x1c67   : > { %v5696_v39 = vsub.f32 %v5687_v35, %v5695_v38 }
0x1c69   : > { %v5697_v40 = vmul.f32 %v5696_v39, %v5696_v39 }
0x1c6b   : > { %v5698_v41 = vsel %vm1000_vm10, %v5697_v40, 0.0 }
0x1c6c   : > { %5699 = vadd.xlane.f32.xlu0 %v5698_v41 }
0x1cf5   : > { %v5700_v57 = vpop.xlane.xlu0 %5699 }
0x1cf6   : > { %v5701_v58 = vmul.f32 0.03125, %v5700_v57 }
0x1cf8   : > { %v5702_v59 = vadd.f32 1e-05, %v5701_v58 }
0x1cfa   : > { %7008 = vrsqrt.f32 %v5702_v59 }
0x1d07   : > { %v7009_v60 = vpop.eup %7008 }
0x1d08   : > { %v5704_v63 = vmul.f32 %v7009_v60, %v5696_v39 }
0x1d0a   : > { %v5711_v1 = vmul.f32 %v6241_v61, %v5704_v63 }
0x1d0c   : > { %v5718_v3 = vadd.f32 %v6242_v0, %v5711_v1 }
0x1d0e   : > { %6839 = vmatmul.mubr.msk.f32.vlgmr.msra.gmra.mxu0 %vm1000_vm10, %v5718_v3 }
0x1d0f   : > { %6884 = vmatprep.mubr.msk.f32.mxu0 %vm7093_vm7, %v7092_v2  ;;  %6877 = vmatpush3.msra.mxu0 %v5936_v23 }
0x1d10   : > { %6878 = vmatprep.subr.mxu0 %v7092_v2 }
0x1d11   : > { %6879 = vmatpush3.msra.mxu0 %v5935_v24 }
0x1d12   : > { %6880 = vmatprep.subr.mxu0 %v7092_v2 }
0x1d13   : > { %6881 = vmatpush3.msra.mxu0 %v5934_v25 }
0x1d14   : > { %6882 = vmatprep.subr.mxu0 %v7092_v2  ;;  %v6272_v2 = vld [vmem:[%s8373_s3] ss:$0 sm:$0xff]  ;;  %s7030_s3 = sshll.u32 %s7099_s1, 4  ;;  %s7031_s3 = int_to_ptr.vmem [resolvable:$false] %s7030_s3 }
0x1d15   : > { %6883 = vmatpush3.msra.mxu0 %v5933_v26  ;;  %s7032_s0 = scalar_lea.vmem %s7031_s3, 256  ;;  %p7033_p5 = scmp.lt.s32.totalorder %s6033_s5, %s7031_s3 }
0x1d16   : > { %p7034_p6 = scmp.lt.s32.totalorder %s7032_s0, %s7026_s9 }
0x1d18   : > { %p7035_p7 = por %p7034_p6, %p7033_p5 }
0x1d1a   : > { %p7036_p8 = pnand %p7035_p7, %p7029_p4 }
0x1dce   : > { %v5801_v9 = vpop.f32.mrf.mxu0 }
0x1dcf   : > { %v5802_v10 = vadd.f32 %v6248_v8, %v5801_v9 }
0x1dd0   : > { %v6840_v27 = vpop.f32.mrf.mxu0 }
0x1dd1   : > { %v5805_v11 = vmax.f32 %v5802_v10, 0.0 }
0x1dd3   : > { %6874 = vmatmul.mubr.f32.vlgmr.msra.gmra.mxu1 %v5805_v11 }
0x1e93   : > { %v5897_v12 = vpop.f32.mrf.mxu1 }
0x1e94   : > { %v5898_v13 = vadd.f32 %v6267_v34, %v5897_v12 }
0x1e95   : > { %v6875_v15 = vpop.f32.mrf.mxu1 }
0x1e96   : > { %v5901_v16 = vadd.f32 %v5898_v13, %v5718_v3 }
0x1e98   : > { %v5906_v17 = vsel %vm1000_vm10, %v5901_v16, 0.0 }
0x1e99   : > { %5907 = vadd.xlane.f32.xlu0 %v5906_v17 }
0x1f22   : > { %v5908_v18 = vpop.xlane.xlu0 %5907 }
0x1f23   : > { %v5909_v19 = vmul.f32 0.03125, %v5908_v18 }
0x1f25   : > { %v5910_v20 = vsub.f32 %v5901_v16, %v5909_v19 }
0x1f27   : > { %v5911_v21 = vmul.f32 %v5910_v20, %v5910_v20 }
0x1f29   : > { %v5912_v22 = vsel %vm1000_vm10, %v5911_v21, 0.0 }
0x1f2a   : > { %5913 = vadd.xlane.f32.xlu1 %v5912_v22 }
0x1fb3   : > { %v5914_v28 = vpop.xlane.xlu1 %5913 }
0x1fb4   : > { %v5915_v29 = vmul.f32 0.03125, %v5914_v28 }
0x1fb6   : > { %v5916_v30 = vadd.f32 1e-05, %v5915_v29 }
0x1fb8   : > { %7010 = vrsqrt.f32 %v5916_v30 }
0x1fc5   : > { %v7011_v43 = vpop.eup %7010 }
0x1fc6   : > { %v5918_v32 = vmul.f32 %v7011_v43, %v5910_v20 }
0x1fc8   : > { %v5925_v35 = vmul.f32 %v6270_v31, %v5918_v32 }
0x1fca   : > { %v5932_v36 = vadd.f32 %v6271_v33, %v5925_v35 }
0x1fcc   : > { %6885 = vmatmul.mubr.msk.f32.vlgmr.msra.gmra.mxu0 %vm1000_vm10, %v5932_v36 }
0x208c   : > { %v6013_v37 = vpop.f32.mrf.mxu0 }
0x208d   : > { %v6014_v38 = vadd.f32 %v6272_v2, %v6013_v37 }
0x208e   : > { %v6886_v39 = vpop.f32.mrf.mxu0 }
0x208f   : > { %6017 = vst [vmem:[%s838_s4] sm:$0xff] %v6014_v38 }
0x2090   : > { %7039 = shalt.err (!%p7036_p8)
}
0x2091   : > { %s7040_s4 = scalar_lea.hbm %s8209_s10, 128  ;;  %s7044_s16 = scalar_lea.hbm %s8374_s7, 256 }
0x2092   : > { %p7041_p9 = scmp.ne.s32.totalorder %s8209_s10, %s7040_s4  ;;  %p7045_p0 = scmp.lt.s32.totalorder %s8209_s10, %s8374_s7 }
0x2093   : > { %p7046_p1 = scmp.lt.s32.totalorder %s7044_s16, %s7040_s4 }
0x2094   : > { %p7042_p12 = pnand %p7041_p9, %p7286_p10 }
0x2095   : > { %p7047_p2 = por %p7046_p1, %p7045_p0 }
0x2096   : > { %p7043_p13 = pneg %p7042_p12 }
0x2098   : > { %p7048_p3 = pnand %p7047_p2, %p7043_p13 }
0x209a   : > { %7051 = shalt.err (!%p7048_p3)
}
0x209b   : > { %6887 = dma.vmem_to_hbm [thread:$0]  (%p7286_p10), %s6033_s5, 128, %s8209_s10, %s6019_s6  }
0x209c PF: > { %s8375_s9 = sld [smem:[#allocation11_spill]] }
0x209d   : > { %s8376_s2 = sld [smem:[#allocation8_spill]] }
0x20a2   : > { %p6893_p4 = scmp.ge.s32.totalorder %s8375_s9, 2 }
0x20a3   : > { %s6044_s3 = sand.u32 1, %s8376_s2  }
0x20a4   : > { %p6890_p5 = pnand %p6893_p4, %p7290_p11  ;;  %s6045_s0 = scalar_lea.sflag [#allocation5], %s6044_s3 }
0x20a6   : > { %p6891_p6 = pneg %p6890_p5 }
0x20a8   : > { %7071 = dma.done.wait (%p6891_p6), %s6045_s0, 128  }
0x20a9   : > { %7073 = vsyncadd (%p6891_p6), %s6045_s0, 4294967168  ;;  %s8378_s11 = sld [smem:[#allocation12_spill]] }
0x20aa   : > { %s8379_s6 = sld [smem:[#allocation9_spill]] }
0x20ab   : > { %s8380_s10 = sld [smem:[#allocation10_spill]] }
0x20ac   : > { %s8381_s0 = sld [smem:[#allocation13_spill]] }
0x20af   : > { %p44_p7 = scmp.ge.s32.totalorder %s8378_s11, 4  }
0x20b1   :  { %46 = sbr.rel (!%p44_p7) target bundleno = 43 (0x2b), region = 189 }
0x20b6   :  { %6050 = vsyncpa [#allocation5], 1 }
0x20b7   :  { %6052 = vsyncpa [#allocation5 + $0x1], 1 }

</bundles_post_ra>
